<compile_context>
chip_gen: v6e
topology: v6e:2x2x1
jax: 0.10.0
libtpu: 0.0.40
codegen_flags: <defaults>
</compile_context>

<pallas_src>
import functools
import math

import jax
import jax.numpy as jnp
from jax.experimental import pallas as pl
from jax.experimental.pallas import tpu as pltpu

EPS = 1e-5


def _transformer_block_kernel(
    x_ref,                      # (TN, B, D)   TN rows of the (N, B, D) tensor
    g1_ref, b1_ref,             # (1, D)  LayerNorm1 gamma/beta
    wq_ref, wk_ref, wv_ref,     # (D, D)  pre-transposed: y = x @ W
    bq_ref, bk_ref, bv_ref,     # (1, D)
    wo_ref, bo_ref,             # (D, D), (1, D)  out projection
    g2_ref, b2_ref,             # (1, D)  LayerNorm2 gamma/beta
    wf1_ref, bf1_ref,           # (D, Dh), (1, Dh) FFN layer 1
    wf2_ref, bf2_ref,           # (Dh, D), (1, D)  FFN layer 2
    o_ref,                      # (TN, B, D)
    *, num_heads: int,
):
    TN, B, D = x_ref.shape
    T = TN * B                               # tokens processed this grid step
    hd = D // num_heads
    scale = 1.0 / math.sqrt(hd)
    cdt = wq_ref.dtype                       # MXU operand dtype (f32 or bf16)

    # Flatten (TN, B, D) -> (T, D); free relayout since B % 8 == 0.
    x = x_ref[...].astype(jnp.float32).reshape(T, D)

    def layer_norm(v, g_ref, b_ref):
        mu = jnp.mean(v, axis=-1, keepdims=True)
        var = jnp.mean(jnp.square(v - mu), axis=-1, keepdims=True)
        return (v - mu) * jax.lax.rsqrt(var + EPS) * g_ref[0] + b_ref[0]

    def matmul(a, w_ref):                    # lane-dense MXU matmul, f32 accum
        return jnp.dot(a.astype(cdt), w_ref[...],
                       preferred_element_type=jnp.float32)

    # ---- LayerNorm 1 + QKV projections (single (T, D) matmuls) ----
    xn = layer_norm(x, g1_ref, b1_ref)
    q = (matmul(xn, wq_ref) + bq_ref[0]) * scale   # scale applied once, full q
    k = matmul(xn, wk_ref) + bk_ref[0]
    v = matmul(xn, wv_ref) + bv_ref[0]

    # ---- Multi-head self attention, batched over (num_heads * TN) ----
    def split_heads(t):                      # (T, D) -> (H*TN, B, hd)
        return jnp.concatenate(
            [t[:, h * hd:(h + 1) * hd].reshape(TN, B, hd)
             for h in range(num_heads)], axis=0)

    qh, kh, vh = split_heads(q), split_heads(k), split_heads(v)

    s = jnp.einsum('nqd,nkd->nqk', qh, kh,
                   preferred_element_type=jnp.float32)          # (H*TN, B, B)
    s = s - jnp.max(s, axis=-1, keepdims=True)
    p = jnp.exp(s)
    p = p * pl.reciprocal(jnp.sum(p, axis=-1, keepdims=True), approx=True)
    ctx = jnp.einsum('nqk,nkd->nqd', p, vh,
                     preferred_element_type=jnp.float32)        # (H*TN, B, hd)

    # Output projection without a lane-axis concat: accumulate per-head
    # partial products ctx_h @ wo[h*hd:(h+1)*hd, :] (each output D lanes wide).
    attn = None
    for h in range(num_heads):
        ctx_h = ctx[h * TN:(h + 1) * TN].reshape(T, hd)
        part = jnp.dot(ctx_h.astype(cdt), wo_ref[h * hd:(h + 1) * hd, :],
                       preferred_element_type=jnp.float32)
        attn = part if attn is None else attn + part

    x1 = x + attn + bo_ref[0]                # residual 1

    # ---- LayerNorm 2 + FFN (synthetic MLP: Linear -> GELU(tanh) -> Linear) ----
    x2n = layer_norm(x1, g2_ref, b2_ref)
    hmid = jax.nn.gelu(matmul(x2n, wf1_ref) + bf1_ref[0], approximate=True)
    y = matmul(hmid, wf2_ref) + bf2_ref[0]

    o_ref[...] = (x1 + y).reshape(TN, B, D).astype(o_ref.dtype)   # residual 2


def transformer_block(x, params, num_heads, *, block_n=8,
                      compute_dtype=jnp.float32):
    """x: (B, N, D) as in the PyTorch docstring. Returns (out, None)."""
    B, N, D = x.shape
    Dh = params["wf1"].shape[1]
    assert D % num_heads == 0, "num_heads must divide token_dim"
    hd = D // num_heads
    assert B % 8 == 0, "attention sequence length (axis 0 of x) must be a multiple of 8"
    assert D % 128 == 0 and Dh % 128 == 0, "pad D / Dh to multiples of 128 for lane-dense matmuls"
    assert hd % 8 == 0, "head_dim should be a multiple of 8 for good layouts"

    TN = max(1, math.gcd(N, block_n))        # rows of n per grid step

    # PyTorch MHA (batch_first=False): attention runs along axis 0.
    xt = jnp.transpose(x, (1, 0, 2))         # (N, S=B, D)
    # TODO(synk): at scale, fold this (B,N,D)<->(N,B,D) swap into the BlockSpec
    # index math / keep (N,B,D) end-to-end to avoid two extra HBM passes.

    # Cast weight matrices to the MXU compute dtype (bf16 on v6e/v7x halves
    # weight DMA + VMEM); LayerNorm params and biases stay f32.
    wdt = jnp.dtype(compute_dtype)
    pr = dict(params)
    for name in ("wq", "wk", "wv", "wo", "wf1", "wf2"):
        pr[name] = params[name].astype(wdt)

    flat = (
        pr["g1"], pr["b1"],
        pr["wq"], pr["wk"], pr["wv"],
        pr["bq"], pr["bk"], pr["bv"],
        pr["wo"], pr["bo"],
        pr["g2"], pr["b2"],
        pr["wf1"], pr["bf1"], pr["wf2"], pr["bf2"],
    )

    # Grid-invariant params: full-shape blocks with a constant index_map (DMA'd
    # once across the grid).
    param_specs = [pl.BlockSpec(p.shape, lambda i: (0, 0)) for p in flat]
    in_specs = [pl.BlockSpec((TN, B, D), lambda i: (i, 0, 0))] + param_specs

    param_bytes = sum(int(p.size) * p.dtype.itemsize for p in flat)
    block_bytes = TN * B * D * jnp.dtype(x.dtype).itemsize
    vmem_limit = int(min(64 * 1024 * 1024,
                         max(32 * 1024 * 1024, 2 * param_bytes + 8 * block_bytes)))

    out = pl.pallas_call(
        functools.partial(_transformer_block_kernel, num_heads=num_heads),
        out_shape=jax.ShapeDtypeStruct((N, B, D), x.dtype),
        grid=(N // TN,),
        in_specs=in_specs,
        out_specs=pl.BlockSpec((TN, B, D), lambda i: (i, 0, 0)),
        compiler_params=pltpu.CompilerParams(
            dimension_semantics=("parallel",),
            vmem_limit_bytes=vmem_limit,
        ),
    )(xt, *flat)

    return jnp.transpose(out, (1, 0, 2)), None   # load_balancing_losses = None


def reference(x, params, num_heads):
    """Pure-JAX reference of the same math (for a correctness check)."""
    B, N, D = x.shape
    hd = D // num_heads
    scale = 1.0 / math.sqrt(hd)
    xt = jnp.transpose(x, (1, 0, 2))             # (N, S=B, D)

    def ln(v, g, b):
        mu = jnp.mean(v, -1, keepdims=True)
        var = jnp.mean((v - mu) ** 2, -1, keepdims=True)
        return (v - mu) * jax.lax.rsqrt(var + EPS) * g + b

    xn = ln(xt, params["g1"][0], params["b1"][0])
    q = (xn @ params["wq"] + params["bq"][0]) * scale
    k = xn @ params["wk"] + params["bk"][0]
    v = xn @ params["wv"] + params["bv"][0]

    def split(t):  # (N, S, D) -> (N, H, S, hd)
        return jnp.transpose(t.reshape(N, B, num_heads, hd), (0, 2, 1, 3))

    qh, kh, vh = split(q), split(k), split(v)
    s = jnp.einsum("nhqd,nhkd->nhqk", qh, kh)
    p = jax.nn.softmax(s, axis=-1)
    a = jnp.einsum("nhqk,nhkd->nhqd", p, vh)
    a = jnp.transpose(a, (0, 2, 1, 3)).reshape(N, B, D)
    a = a @ params["wo"] + params["bo"][0]
    x1 = xt + a
    x2 = ln(x1, params["g2"][0], params["b2"][0])
    h = jax.nn.gelu(x2 @ params["wf1"] + params["bf1"][0], approximate=True)
    y = h @ params["wf2"] + params["bf2"][0]
    return jnp.transpose(x1 + y, (1, 0, 2))


def init_params(key, token_dim, num_heads, ffn_hidden):
    D, Dh = token_dim, ffn_hidden
    ks = jax.random.split(key, 8)
    scl = 0.05
    return {
        "g1": jnp.ones((1, D), jnp.float32),
        "b1": jnp.zeros((1, D), jnp.float32),
        # weights stored pre-transposed (in, out) so the kernel does x @ W
        "wq": scl * jax.random.normal(ks[0], (D, D), jnp.float32),
        "wk": scl * jax.random.normal(ks[1], (D, D), jnp.float32),
        "wv": scl * jax.random.normal(ks[2], (D, D), jnp.float32),
        "bq": scl * jax.random.normal(ks[3], (1, D), jnp.float32),
        "bk": jnp.zeros((1, D), jnp.float32),
        "bv": jnp.zeros((1, D), jnp.float32),
        "wo": scl * jax.random.normal(ks[4], (D, D), jnp.float32),
        "bo": jnp.zeros((1, D), jnp.float32),
        "g2": jnp.ones((1, D), jnp.float32),
        "b2": jnp.zeros((1, D), jnp.float32),
        "wf1": scl * jax.random.normal(ks[5], (D, Dh), jnp.float32),
        "bf1": scl * jax.random.normal(ks[6], (1, Dh), jnp.float32),
        "wf2": scl * jax.random.normal(ks[7], (Dh, D), jnp.float32),
        "bf2": jnp.zeros((1, D), jnp.float32),
    }


if __name__ == "__main__":
    # Small but lane-dense shapes: D and Dh multiples of 128, B multiple of 8,
    # even grid (N/TN = 2) so both v7x TensorCores get work.
    B, N, D = 8, 16, 128        # x: (B, N, D) per the module docstring
    num_heads = 4               # head_dim = 32
    ffn_hidden = 256

    key = jax.random.PRNGKey(0)
    kx, kp = jax.random.split(key)
    x = jax.random.normal(kx, (B, N, D), jnp.float32)
    params = init_params(kp, D, num_heads, ffn_hidden)

    out, lb_losses = transformer_block(x, params, num_heads, block_n=8)
    out = jax.block_until_ready(out)
    ref = reference(x, params, num_heads)
    assert out.shape == (B, N, D)
    assert lb_losses is None
    # Tolerance covers the EUP approximate-reciprocal softmax denominator.
    assert jnp.allclose(out, ref, atol=1e-2, rtol=1e-2), \
        f"max err {jnp.max(jnp.abs(out - ref))}"

    # bf16 MXU operand path (v6e/v7x): same kernel, f32 accumulation.
    out_bf16, _ = transformer_block(x, params, num_heads, block_n=8,
                                    compute_dtype=jnp.bfloat16)
    out_bf16 = jax.block_until_ready(out_bf16)
    assert out_bf16.shape == (B, N, D)
    assert jnp.allclose(out_bf16, ref, atol=1.5e-1, rtol=1e-1), \
        f"bf16 max err {jnp.max(jnp.abs(out_bf16 - ref))}"

    print("KERNEL_OK")
</pallas_src>

<mosaic_0001>
module attributes {stable_mosaic.version = 11 : i64} {
  func.func @_transformer_block_kernel(%arg0: i32, %arg1: memref<8x8x128xf32, #tpu.memory_space<vmem>>, %arg2: memref<1x128xf32, #tpu.memory_space<vmem>>, %arg3: memref<1x128xf32, #tpu.memory_space<vmem>>, %arg4: memref<128x128xf32, #tpu.memory_space<vmem>>, %arg5: memref<128x128xf32, #tpu.memory_space<vmem>>, %arg6: memref<128x128xf32, #tpu.memory_space<vmem>>, %arg7: memref<1x128xf32, #tpu.memory_space<vmem>>, %arg8: memref<1x128xf32, #tpu.memory_space<vmem>>, %arg9: memref<1x128xf32, #tpu.memory_space<vmem>>, %arg10: memref<128x128xf32, #tpu.memory_space<vmem>>, %arg11: memref<1x128xf32, #tpu.memory_space<vmem>>, %arg12: memref<1x128xf32, #tpu.memory_space<vmem>>, %arg13: memref<1x128xf32, #tpu.memory_space<vmem>>, %arg14: memref<128x256xf32, #tpu.memory_space<vmem>>, %arg15: memref<1x256xf32, #tpu.memory_space<vmem>>, %arg16: memref<256x128xf32, #tpu.memory_space<vmem>>, %arg17: memref<1x128xf32, #tpu.memory_space<vmem>>, %arg18: memref<8x8x128xf32, #tpu.memory_space<vmem>>) attributes {dimension_semantics = [#tpu.dimension_semantics<parallel>], iteration_bounds = array<i64: 2>, scalar_prefetch = 0 : i64, scratch_operands = 0 : i64, tpu.core_type = #tpu.core_type<tc>, window_params = [{transform_indices = @transform_0, window_bounds = array<i64: 8, 8, 128>}, {pipeline_mode = #tpu.pipeline_mode<synchronous>, transform_indices = @transform_1, window_bounds = array<i64: 1, 128>}, {pipeline_mode = #tpu.pipeline_mode<synchronous>, transform_indices = @transform_2, window_bounds = array<i64: 1, 128>}, {pipeline_mode = #tpu.pipeline_mode<synchronous>, transform_indices = @transform_3, window_bounds = array<i64: 128, 128>}, {pipeline_mode = #tpu.pipeline_mode<synchronous>, transform_indices = @transform_4, window_bounds = array<i64: 128, 128>}, {pipeline_mode = #tpu.pipeline_mode<synchronous>, transform_indices = @transform_5, window_bounds = array<i64: 128, 128>}, {pipeline_mode = #tpu.pipeline_mode<synchronous>, transform_indices = @transform_6, window_bounds = array<i64: 1, 128>}, {pipeline_mode = #tpu.pipeline_mode<synchronous>, transform_indices = @transform_7, window_bounds = array<i64: 1, 128>}, {pipeline_mode = #tpu.pipeline_mode<synchronous>, transform_indices = @transform_8, window_bounds = array<i64: 1, 128>}, {pipeline_mode = #tpu.pipeline_mode<synchronous>, transform_indices = @transform_9, window_bounds = array<i64: 128, 128>}, {pipeline_mode = #tpu.pipeline_mode<synchronous>, transform_indices = @transform_10, window_bounds = array<i64: 1, 128>}, {pipeline_mode = #tpu.pipeline_mode<synchronous>, transform_indices = @transform_11, window_bounds = array<i64: 1, 128>}, {pipeline_mode = #tpu.pipeline_mode<synchronous>, transform_indices = @transform_12, window_bounds = array<i64: 1, 128>}, {pipeline_mode = #tpu.pipeline_mode<synchronous>, transform_indices = @transform_13, window_bounds = array<i64: 128, 256>}, {pipeline_mode = #tpu.pipeline_mode<synchronous>, transform_indices = @transform_14, window_bounds = array<i64: 1, 256>}, {pipeline_mode = #tpu.pipeline_mode<synchronous>, transform_indices = @transform_15, window_bounds = array<i64: 256, 128>}, {pipeline_mode = #tpu.pipeline_mode<synchronous>, transform_indices = @transform_16, window_bounds = array<i64: 1, 128>}, {transform_indices = @transform_17, window_bounds = array<i64: 8, 8, 128>}]} {
    %c0 = arith.constant 0 : index
    %c0_0 = arith.constant 0 : index
    %c0_1 = arith.constant 0 : index
    %0 = vector.load %arg1[%c0, %c0_0, %c0_1] : memref<8x8x128xf32, #tpu.memory_space<vmem>>, vector<8x8x128xf32>
    %1 = vector.shape_cast %0 : vector<8x8x128xf32> to vector<64x128xf32>
    %cst = arith.constant dense<0.000000e+00> : vector<64xf32>
    %2 = vector.multi_reduction <add>, %1, %cst [1] : vector<64x128xf32> to vector<64xf32>
    %3 = vector.shape_cast %2 : vector<64xf32> to vector<64x1xf32>
    %cst_2 = arith.constant 1.280000e+02 : f32
    %4 = vector.broadcast %cst_2 : f32 to vector<64x1xf32>
    %5 = arith.divf %3, %4 : vector<64x1xf32>
    %6 = vector.broadcast %5 : vector<64x1xf32> to vector<64x128xf32>
    %7 = arith.subf %1, %6 : vector<64x128xf32>
    %8 = arith.mulf %7, %7 : vector<64x128xf32>
    %cst_3 = arith.constant dense<0.000000e+00> : vector<64xf32>
    %9 = vector.multi_reduction <add>, %8, %cst_3 [1] : vector<64x128xf32> to vector<64xf32>
    %10 = vector.shape_cast %9 : vector<64xf32> to vector<64x1xf32>
    %cst_4 = arith.constant 1.280000e+02 : f32
    %11 = vector.broadcast %cst_4 : f32 to vector<64x1xf32>
    %12 = arith.divf %10, %11 : vector<64x1xf32>
    %13 = vector.broadcast %5 : vector<64x1xf32> to vector<64x128xf32>
    %14 = arith.subf %1, %13 : vector<64x128xf32>
    %cst_5 = arith.constant 9.99999974E-6 : f32
    %15 = vector.broadcast %cst_5 : f32 to vector<64x1xf32>
    %16 = arith.addf %12, %15 : vector<64x1xf32>
    %17 = math.rsqrt %16 : vector<64x1xf32>
    %18 = vector.broadcast %17 : vector<64x1xf32> to vector<64x128xf32>
    %19 = arith.mulf %14, %18 : vector<64x128xf32>
    %c0_6 = arith.constant 0 : index
    %c0_7 = arith.constant 0 : index
    %20 = vector.load %arg2[%c0_6, %c0_7] : memref<1x128xf32, #tpu.memory_space<vmem>>, vector<1x128xf32>
    %21 = vector.shape_cast %20 : vector<1x128xf32> to vector<128xf32>
    %22 = vector.shape_cast %21 : vector<128xf32> to vector<1x128xf32>
    %23 = vector.broadcast %22 : vector<1x128xf32> to vector<64x128xf32>
    %24 = arith.mulf %19, %23 : vector<64x128xf32>
    %c0_8 = arith.constant 0 : index
    %c0_9 = arith.constant 0 : index
    %25 = vector.load %arg3[%c0_8, %c0_9] : memref<1x128xf32, #tpu.memory_space<vmem>>, vector<1x128xf32>
    %26 = vector.shape_cast %25 : vector<1x128xf32> to vector<128xf32>
    %27 = vector.shape_cast %26 : vector<128xf32> to vector<1x128xf32>
    %28 = vector.broadcast %27 : vector<1x128xf32> to vector<64x128xf32>
    %29 = arith.addf %24, %28 : vector<64x128xf32>
    %c0_10 = arith.constant 0 : index
    %c0_11 = arith.constant 0 : index
    %30 = vector.load %arg4[%c0_10, %c0_11] : memref<128x128xf32, #tpu.memory_space<vmem>>, vector<128x128xf32>
    %cst_12 = arith.constant dense<0.000000e+00> : vector<64x128xf32>
    %31 = tpu.matmul %29, %30, %cst_12 {dimension_numbers = #tpu.dot_dimension_numbers<[1], [0], [0], [1], [0, 0, 1, 1], [], []>} : vector<64x128xf32>, vector<128x128xf32>, vector<64x128xf32> -> vector<64x128xf32>
    %c0_13 = arith.constant 0 : index
    %c0_14 = arith.constant 0 : index
    %32 = vector.load %arg7[%c0_13, %c0_14] : memref<1x128xf32, #tpu.memory_space<vmem>>, vector<1x128xf32>
    %33 = vector.shape_cast %32 : vector<1x128xf32> to vector<128xf32>
    %34 = vector.shape_cast %33 : vector<128xf32> to vector<1x128xf32>
    %35 = vector.broadcast %34 : vector<1x128xf32> to vector<64x128xf32>
    %36 = arith.addf %31, %35 : vector<64x128xf32>
    %cst_15 = arith.constant 0.176776692 : f32
    %37 = vector.broadcast %cst_15 : f32 to vector<64x128xf32>
    %38 = arith.mulf %36, %37 : vector<64x128xf32>
    %c0_16 = arith.constant 0 : index
    %c0_17 = arith.constant 0 : index
    %39 = vector.load %arg5[%c0_16, %c0_17] : memref<128x128xf32, #tpu.memory_space<vmem>>, vector<128x128xf32>
    %cst_18 = arith.constant dense<0.000000e+00> : vector<64x128xf32>
    %40 = tpu.matmul %29, %39, %cst_18 {dimension_numbers = #tpu.dot_dimension_numbers<[1], [0], [0], [1], [0, 0, 1, 1], [], []>} : vector<64x128xf32>, vector<128x128xf32>, vector<64x128xf32> -> vector<64x128xf32>
    %c0_19 = arith.constant 0 : index
    %c0_20 = arith.constant 0 : index
    %41 = vector.load %arg8[%c0_19, %c0_20] : memref<1x128xf32, #tpu.memory_space<vmem>>, vector<1x128xf32>
    %42 = vector.shape_cast %41 : vector<1x128xf32> to vector<128xf32>
    %43 = vector.shape_cast %42 : vector<128xf32> to vector<1x128xf32>
    %44 = vector.broadcast %43 : vector<1x128xf32> to vector<64x128xf32>
    %45 = arith.addf %40, %44 : vector<64x128xf32>
    %c0_21 = arith.constant 0 : index
    %c0_22 = arith.constant 0 : index
    %46 = vector.load %arg6[%c0_21, %c0_22] : memref<128x128xf32, #tpu.memory_space<vmem>>, vector<128x128xf32>
    %cst_23 = arith.constant dense<0.000000e+00> : vector<64x128xf32>
    %47 = tpu.matmul %29, %46, %cst_23 {dimension_numbers = #tpu.dot_dimension_numbers<[1], [0], [0], [1], [0, 0, 1, 1], [], []>} : vector<64x128xf32>, vector<128x128xf32>, vector<64x128xf32> -> vector<64x128xf32>
    %c0_24 = arith.constant 0 : index
    %c0_25 = arith.constant 0 : index
    %48 = vector.load %arg9[%c0_24, %c0_25] : memref<1x128xf32, #tpu.memory_space<vmem>>, vector<1x128xf32>
    %49 = vector.shape_cast %48 : vector<1x128xf32> to vector<128xf32>
    %50 = vector.shape_cast %49 : vector<128xf32> to vector<1x128xf32>
    %51 = vector.broadcast %50 : vector<1x128xf32> to vector<64x128xf32>
    %52 = arith.addf %47, %51 : vector<64x128xf32>
    %53 = vector.extract_strided_slice %38 {offsets = [0, 0], sizes = [64, 32], strides = [1, 1]} : vector<64x128xf32> to vector<64x32xf32>
    %54 = vector.shape_cast %53 : vector<64x32xf32> to vector<8x8x32xf32>
    %55 = vector.extract_strided_slice %38 {offsets = [0, 32], sizes = [64, 32], strides = [1, 1]} : vector<64x128xf32> to vector<64x32xf32>
    %56 = vector.shape_cast %55 : vector<64x32xf32> to vector<8x8x32xf32>
    %57 = vector.extract_strided_slice %38 {offsets = [0, 64], sizes = [64, 32], strides = [1, 1]} : vector<64x128xf32> to vector<64x32xf32>
    %58 = vector.shape_cast %57 : vector<64x32xf32> to vector<8x8x32xf32>
    %59 = vector.extract_strided_slice %38 {offsets = [0, 96], sizes = [64, 32], strides = [1, 1]} : vector<64x128xf32> to vector<64x32xf32>
    %60 = vector.shape_cast %59 : vector<64x32xf32> to vector<8x8x32xf32>
    %61 = tpu.concatenate %54, %56, %58, %60 in 0 : vector<8x8x32xf32>, vector<8x8x32xf32>, vector<8x8x32xf32>, vector<8x8x32xf32> -> vector<32x8x32xf32>
    %62 = vector.extract_strided_slice %45 {offsets = [0, 0], sizes = [64, 32], strides = [1, 1]} : vector<64x128xf32> to vector<64x32xf32>
    %63 = vector.shape_cast %62 : vector<64x32xf32> to vector<8x8x32xf32>
    %64 = vector.extract_strided_slice %45 {offsets = [0, 32], sizes = [64, 32], strides = [1, 1]} : vector<64x128xf32> to vector<64x32xf32>
    %65 = vector.shape_cast %64 : vector<64x32xf32> to vector<8x8x32xf32>
    %66 = vector.extract_strided_slice %45 {offsets = [0, 64], sizes = [64, 32], strides = [1, 1]} : vector<64x128xf32> to vector<64x32xf32>
    %67 = vector.shape_cast %66 : vector<64x32xf32> to vector<8x8x32xf32>
    %68 = vector.extract_strided_slice %45 {offsets = [0, 96], sizes = [64, 32], strides = [1, 1]} : vector<64x128xf32> to vector<64x32xf32>
    %69 = vector.shape_cast %68 : vector<64x32xf32> to vector<8x8x32xf32>
    %70 = tpu.concatenate %63, %65, %67, %69 in 0 : vector<8x8x32xf32>, vector<8x8x32xf32>, vector<8x8x32xf32>, vector<8x8x32xf32> -> vector<32x8x32xf32>
    %71 = vector.extract_strided_slice %52 {offsets = [0, 0], sizes = [64, 32], strides = [1, 1]} : vector<64x128xf32> to vector<64x32xf32>
    %72 = vector.shape_cast %71 : vector<64x32xf32> to vector<8x8x32xf32>
    %73 = vector.extract_strided_slice %52 {offsets = [0, 32], sizes = [64, 32], strides = [1, 1]} : vector<64x128xf32> to vector<64x32xf32>
    %74 = vector.shape_cast %73 : vector<64x32xf32> to vector<8x8x32xf32>
    %75 = vector.extract_strided_slice %52 {offsets = [0, 64], sizes = [64, 32], strides = [1, 1]} : vector<64x128xf32> to vector<64x32xf32>
    %76 = vector.shape_cast %75 : vector<64x32xf32> to vector<8x8x32xf32>
    %77 = vector.extract_strided_slice %52 {offsets = [0, 96], sizes = [64, 32], strides = [1, 1]} : vector<64x128xf32> to vector<64x32xf32>
    %78 = vector.shape_cast %77 : vector<64x32xf32> to vector<8x8x32xf32>
    %79 = tpu.concatenate %72, %74, %76, %78 in 0 : vector<8x8x32xf32>, vector<8x8x32xf32>, vector<8x8x32xf32>, vector<8x8x32xf32> -> vector<32x8x32xf32>
    "tpu.trace_start"() <{level = 10 : i32, message = "nqd,nkd->nqk"}> : () -> ()
    %cst_26 = arith.constant dense<0.000000e+00> : vector<32x8x8xf32>
    %80 = tpu.matmul %61, %70, %cst_26 {dimension_numbers = #tpu.dot_dimension_numbers<[2], [2], [1], [1], [0, 0, 0, 1, 1, 1], [0], [0]>} : vector<32x8x32xf32>, vector<32x8x32xf32>, vector<32x8x8xf32> -> vector<32x8x8xf32>
    "tpu.trace_stop"() : () -> ()
    %cst_27 = arith.constant dense<0xFF800000> : vector<32x8xf32>
    %81 = vector.multi_reduction <maximumf>, %80, %cst_27 [2] : vector<32x8x8xf32> to vector<32x8xf32>
    %82 = vector.shape_cast %81 : vector<32x8xf32> to vector<32x8x1xf32>
    %83 = vector.broadcast %82 : vector<32x8x1xf32> to vector<32x8x8xf32>
    %84 = arith.subf %80, %83 : vector<32x8x8xf32>
    %85 = math.exp %84 : vector<32x8x8xf32>
    %cst_28 = arith.constant dense<0.000000e+00> : vector<32x8xf32>
    %86 = vector.multi_reduction <add>, %85, %cst_28 [2] : vector<32x8x8xf32> to vector<32x8xf32>
    %87 = vector.shape_cast %86 : vector<32x8xf32> to vector<32x8x1xf32>
    %88 = tpu.reciprocal %87 {approx = true} : vector<32x8x1xf32> -> vector<32x8x1xf32>
    %89 = vector.broadcast %88 : vector<32x8x1xf32> to vector<32x8x8xf32>
    %90 = arith.mulf %85, %89 : vector<32x8x8xf32>
    "tpu.trace_start"() <{level = 10 : i32, message = "nqk,nkd->nqd"}> : () -> ()
    %cst_29 = arith.constant dense<0.000000e+00> : vector<32x8x32xf32>
    %91 = tpu.matmul %90, %79, %cst_29 {dimension_numbers = #tpu.dot_dimension_numbers<[2], [1], [1], [2], [0, 0, 0, 1, 1, 2], [0], [0]>} : vector<32x8x8xf32>, vector<32x8x32xf32>, vector<32x8x32xf32> -> vector<32x8x32xf32>
    "tpu.trace_stop"() : () -> ()
    %92 = vector.extract_strided_slice %91 {offsets = [0, 0, 0], sizes = [8, 8, 32], strides = [1, 1, 1]} : vector<32x8x32xf32> to vector<8x8x32xf32>
    %93 = vector.shape_cast %92 : vector<8x8x32xf32> to vector<64x32xf32>
    %c0_30 = arith.constant 0 : index
    %c0_31 = arith.constant 0 : index
    %94 = vector.load %arg10[%c0_30, %c0_31] : memref<128x128xf32, #tpu.memory_space<vmem>>, vector<32x128xf32>
    %cst_32 = arith.constant dense<0.000000e+00> : vector<64x128xf32>
    %95 = tpu.matmul %93, %94, %cst_32 {dimension_numbers = #tpu.dot_dimension_numbers<[1], [0], [0], [1], [0, 0, 1, 1], [], []>} : vector<64x32xf32>, vector<32x128xf32>, vector<64x128xf32> -> vector<64x128xf32>
    %96 = vector.extract_strided_slice %91 {offsets = [8, 0, 0], sizes = [8, 8, 32], strides = [1, 1, 1]} : vector<32x8x32xf32> to vector<8x8x32xf32>
    %97 = vector.shape_cast %96 : vector<8x8x32xf32> to vector<64x32xf32>
    %c32 = arith.constant 32 : index
    %c0_33 = arith.constant 0 : index
    %98 = vector.load %arg10[%c32, %c0_33] : memref<128x128xf32, #tpu.memory_space<vmem>>, vector<32x128xf32>
    %cst_34 = arith.constant dense<0.000000e+00> : vector<64x128xf32>
    %99 = tpu.matmul %97, %98, %cst_34 {dimension_numbers = #tpu.dot_dimension_numbers<[1], [0], [0], [1], [0, 0, 1, 1], [], []>} : vector<64x32xf32>, vector<32x128xf32>, vector<64x128xf32> -> vector<64x128xf32>
    %100 = arith.addf %95, %99 : vector<64x128xf32>
    %101 = vector.extract_strided_slice %91 {offsets = [16, 0, 0], sizes = [8, 8, 32], strides = [1, 1, 1]} : vector<32x8x32xf32> to vector<8x8x32xf32>
    %102 = vector.shape_cast %101 : vector<8x8x32xf32> to vector<64x32xf32>
    %c64 = arith.constant 64 : index
    %c0_35 = arith.constant 0 : index
    %103 = vector.load %arg10[%c64, %c0_35] : memref<128x128xf32, #tpu.memory_space<vmem>>, vector<32x128xf32>
    %cst_36 = arith.constant dense<0.000000e+00> : vector<64x128xf32>
    %104 = tpu.matmul %102, %103, %cst_36 {dimension_numbers = #tpu.dot_dimension_numbers<[1], [0], [0], [1], [0, 0, 1, 1], [], []>} : vector<64x32xf32>, vector<32x128xf32>, vector<64x128xf32> -> vector<64x128xf32>
    %105 = arith.addf %100, %104 : vector<64x128xf32>
    %106 = vector.extract_strided_slice %91 {offsets = [24, 0, 0], sizes = [8, 8, 32], strides = [1, 1, 1]} : vector<32x8x32xf32> to vector<8x8x32xf32>
    %107 = vector.shape_cast %106 : vector<8x8x32xf32> to vector<64x32xf32>
    %c96 = arith.constant 96 : index
    %c0_37 = arith.constant 0 : index
    %108 = vector.load %arg10[%c96, %c0_37] : memref<128x128xf32, #tpu.memory_space<vmem>>, vector<32x128xf32>
    %cst_38 = arith.constant dense<0.000000e+00> : vector<64x128xf32>
    %109 = tpu.matmul %107, %108, %cst_38 {dimension_numbers = #tpu.dot_dimension_numbers<[1], [0], [0], [1], [0, 0, 1, 1], [], []>} : vector<64x32xf32>, vector<32x128xf32>, vector<64x128xf32> -> vector<64x128xf32>
    %110 = arith.addf %105, %109 : vector<64x128xf32>
    %111 = arith.addf %1, %110 : vector<64x128xf32>
    %c0_39 = arith.constant 0 : index
    %c0_40 = arith.constant 0 : index
    %112 = vector.load %arg11[%c0_39, %c0_40] : memref<1x128xf32, #tpu.memory_space<vmem>>, vector<1x128xf32>
    %113 = vector.shape_cast %112 : vector<1x128xf32> to vector<128xf32>
    %114 = vector.shape_cast %113 : vector<128xf32> to vector<1x128xf32>
    %115 = vector.broadcast %114 : vector<1x128xf32> to vector<64x128xf32>
    %116 = arith.addf %111, %115 : vector<64x128xf32>
    %cst_41 = arith.constant dense<0.000000e+00> : vector<64xf32>
    %117 = vector.multi_reduction <add>, %116, %cst_41 [1] : vector<64x128xf32> to vector<64xf32>
    %118 = vector.shape_cast %117 : vector<64xf32> to vector<64x1xf32>
    %cst_42 = arith.constant 1.280000e+02 : f32
    %119 = vector.broadcast %cst_42 : f32 to vector<64x1xf32>
    %120 = arith.divf %118, %119 : vector<64x1xf32>
    %121 = vector.broadcast %120 : vector<64x1xf32> to vector<64x128xf32>
    %122 = arith.subf %116, %121 : vector<64x128xf32>
    %123 = arith.mulf %122, %122 : vector<64x128xf32>
    %cst_43 = arith.constant dense<0.000000e+00> : vector<64xf32>
    %124 = vector.multi_reduction <add>, %123, %cst_43 [1] : vector<64x128xf32> to vector<64xf32>
    %125 = vector.shape_cast %124 : vector<64xf32> to vector<64x1xf32>
    %cst_44 = arith.constant 1.280000e+02 : f32
    %126 = vector.broadcast %cst_44 : f32 to vector<64x1xf32>
    %127 = arith.divf %125, %126 : vector<64x1xf32>
    %128 = vector.broadcast %120 : vector<64x1xf32> to vector<64x128xf32>
    %129 = arith.subf %116, %128 : vector<64x128xf32>
    %cst_45 = arith.constant 9.99999974E-6 : f32
    %130 = vector.broadcast %cst_45 : f32 to vector<64x1xf32>
    %131 = arith.addf %127, %130 : vector<64x1xf32>
    %132 = math.rsqrt %131 : vector<64x1xf32>
    %133 = vector.broadcast %132 : vector<64x1xf32> to vector<64x128xf32>
    %134 = arith.mulf %129, %133 : vector<64x128xf32>
    %c0_46 = arith.constant 0 : index
    %c0_47 = arith.constant 0 : index
    %135 = vector.load %arg12[%c0_46, %c0_47] : memref<1x128xf32, #tpu.memory_space<vmem>>, vector<1x128xf32>
    %136 = vector.shape_cast %135 : vector<1x128xf32> to vector<128xf32>
    %137 = vector.shape_cast %136 : vector<128xf32> to vector<1x128xf32>
    %138 = vector.broadcast %137 : vector<1x128xf32> to vector<64x128xf32>
    %139 = arith.mulf %134, %138 : vector<64x128xf32>
    %c0_48 = arith.constant 0 : index
    %c0_49 = arith.constant 0 : index
    %140 = vector.load %arg13[%c0_48, %c0_49] : memref<1x128xf32, #tpu.memory_space<vmem>>, vector<1x128xf32>
    %141 = vector.shape_cast %140 : vector<1x128xf32> to vector<128xf32>
    %142 = vector.shape_cast %141 : vector<128xf32> to vector<1x128xf32>
    %143 = vector.broadcast %142 : vector<1x128xf32> to vector<64x128xf32>
    %144 = arith.addf %139, %143 : vector<64x128xf32>
    %c0_50 = arith.constant 0 : index
    %c0_51 = arith.constant 0 : index
    %145 = vector.load %arg14[%c0_50, %c0_51] : memref<128x256xf32, #tpu.memory_space<vmem>>, vector<128x256xf32>
    %cst_52 = arith.constant dense<0.000000e+00> : vector<64x256xf32>
    %146 = tpu.matmul %144, %145, %cst_52 {dimension_numbers = #tpu.dot_dimension_numbers<[1], [0], [0], [1], [0, 0, 1, 1], [], []>} : vector<64x128xf32>, vector<128x256xf32>, vector<64x256xf32> -> vector<64x256xf32>
    %c0_53 = arith.constant 0 : index
    %c0_54 = arith.constant 0 : index
    %147 = vector.load %arg15[%c0_53, %c0_54] : memref<1x256xf32, #tpu.memory_space<vmem>>, vector<1x256xf32>
    %148 = vector.shape_cast %147 : vector<1x256xf32> to vector<256xf32>
    %149 = vector.shape_cast %148 : vector<256xf32> to vector<1x256xf32>
    %150 = vector.broadcast %149 : vector<1x256xf32> to vector<64x256xf32>
    %151 = arith.addf %146, %150 : vector<64x256xf32>
    %152 = arith.mulf %151, %151 : vector<64x256xf32>
    %153 = arith.mulf %151, %152 : vector<64x256xf32>
    %cst_55 = arith.constant 4.471500e-02 : f32
    %154 = vector.broadcast %cst_55 : f32 to vector<64x256xf32>
    %155 = arith.mulf %154, %153 : vector<64x256xf32>
    %156 = arith.addf %151, %155 : vector<64x256xf32>
    %cst_56 = arith.constant 0.797884583 : f32
    %157 = vector.broadcast %cst_56 : f32 to vector<64x256xf32>
    %158 = arith.mulf %157, %156 : vector<64x256xf32>
    %159 = math.tanh %158 : vector<64x256xf32>
    %cst_57 = arith.constant 1.000000e+00 : f32
    %160 = vector.broadcast %cst_57 : f32 to vector<64x256xf32>
    %161 = arith.addf %160, %159 : vector<64x256xf32>
    %cst_58 = arith.constant 5.000000e-01 : f32
    %162 = vector.broadcast %cst_58 : f32 to vector<64x256xf32>
    %163 = arith.mulf %162, %161 : vector<64x256xf32>
    %164 = arith.mulf %151, %163 : vector<64x256xf32>
    %c0_59 = arith.constant 0 : index
    %c0_60 = arith.constant 0 : index
    %165 = vector.load %arg16[%c0_59, %c0_60] : memref<256x128xf32, #tpu.memory_space<vmem>>, vector<256x128xf32>
    %cst_61 = arith.constant dense<0.000000e+00> : vector<64x128xf32>
    %166 = tpu.matmul %164, %165, %cst_61 {dimension_numbers = #tpu.dot_dimension_numbers<[1], [0], [0], [1], [0, 0, 1, 1], [], []>} : vector<64x256xf32>, vector<256x128xf32>, vector<64x128xf32> -> vector<64x128xf32>
    %c0_62 = arith.constant 0 : index
    %c0_63 = arith.constant 0 : index
    %167 = vector.load %arg17[%c0_62, %c0_63] : memref<1x128xf32, #tpu.memory_space<vmem>>, vector<1x128xf32>
    %168 = vector.shape_cast %167 : vector<1x128xf32> to vector<128xf32>
    %169 = vector.shape_cast %168 : vector<128xf32> to vector<1x128xf32>
    %170 = vector.broadcast %169 : vector<1x128xf32> to vector<64x128xf32>
    %171 = arith.addf %166, %170 : vector<64x128xf32>
    %172 = arith.addf %116, %171 : vector<64x128xf32>
    %173 = vector.shape_cast %172 : vector<64x128xf32> to vector<8x8x128xf32>
    %c0_64 = arith.constant 0 : index
    %c0_65 = arith.constant 0 : index
    %c0_66 = arith.constant 0 : index
    %174 = vector.load %arg18[%c0_64, %c0_65, %c0_66] : memref<8x8x128xf32, #tpu.memory_space<vmem>>, vector<8x8x128xf32>
    tpu.vector_store %arg18[%c0_64, %c0_65, %c0_66], %173 {strides = array<i32>} : memref<8x8x128xf32, #tpu.memory_space<vmem>>, vector<8x8x128xf32>,
    return
  }
  func.func @transform_0(%arg0: i32) -> (i32, i32, i32) {
    %c0_i32 = arith.constant 0 : i32
    %c0_i32_0 = arith.constant 0 : i32
    %c0_i32_1 = arith.constant 0 : i32
    return %arg0, %c0_i32, %c0_i32_0 : i32, i32, i32
  }
  func.func @transform_1(%arg0: i32) -> (i32, i32) {
    %c0_i32 = arith.constant 0 : i32
    %c0_i32_0 = arith.constant 0 : i32
    %c0_i32_1 = arith.constant 0 : i32
    return %c0_i32, %c0_i32_0 : i32, i32
  }
  func.func @transform_2(%arg0: i32) -> (i32, i32) {
    %c0_i32 = arith.constant 0 : i32
    %c0_i32_0 = arith.constant 0 : i32
    %c0_i32_1 = arith.constant 0 : i32
    return %c0_i32, %c0_i32_0 : i32, i32
  }
  func.func @transform_3(%arg0: i32) -> (i32, i32) {
    %c0_i32 = arith.constant 0 : i32
    %c0_i32_0 = arith.constant 0 : i32
    %c0_i32_1 = arith.constant 0 : i32
    return %c0_i32, %c0_i32_0 : i32, i32
  }
  func.func @transform_4(%arg0: i32) -> (i32, i32) {
    %c0_i32 = arith.constant 0 : i32
    %c0_i32_0 = arith.constant 0 : i32
    %c0_i32_1 = arith.constant 0 : i32
    return %c0_i32, %c0_i32_0 : i32, i32
  }
  func.func @transform_5(%arg0: i32) -> (i32, i32) {
    %c0_i32 = arith.constant 0 : i32
    %c0_i32_0 = arith.constant 0 : i32
    %c0_i32_1 = arith.constant 0 : i32
    return %c0_i32, %c0_i32_0 : i32, i32
  }
  func.func @transform_6(%arg0: i32) -> (i32, i32) {
    %c0_i32 = arith.constant 0 : i32
    %c0_i32_0 = arith.constant 0 : i32
    %c0_i32_1 = arith.constant 0 : i32
    return %c0_i32, %c0_i32_0 : i32, i32
  }
  func.func @transform_7(%arg0: i32) -> (i32, i32) {
    %c0_i32 = arith.constant 0 : i32
    %c0_i32_0 = arith.constant 0 : i32
    %c0_i32_1 = arith.constant 0 : i32
    return %c0_i32, %c0_i32_0 : i32, i32
  }
  func.func @transform_8(%arg0: i32) -> (i32, i32) {
    %c0_i32 = arith.constant 0 : i32
    %c0_i32_0 = arith.constant 0 : i32
    %c0_i32_1 = arith.constant 0 : i32
    return %c0_i32, %c0_i32_0 : i32, i32
  }
  func.func @transform_9(%arg0: i32) -> (i32, i32) {
    %c0_i32 = arith.constant 0 : i32
    %c0_i32_0 = arith.constant 0 : i32
    %c0_i32_1 = arith.constant 0 : i32
    return %c0_i32, %c0_i32_0 : i32, i32
  }
  func.func @transform_10(%arg0: i32) -> (i32, i32) {
    %c0_i32 = arith.constant 0 : i32
    %c0_i32_0 = arith.constant 0 : i32
    %c0_i32_1 = arith.constant 0 : i32
    return %c0_i32, %c0_i32_0 : i32, i32
  }
  func.func @transform_11(%arg0: i32) -> (i32, i32) {
    %c0_i32 = arith.constant 0 : i32
    %c0_i32_0 = arith.constant 0 : i32
    %c0_i32_1 = arith.constant 0 : i32
    return %c0_i32, %c0_i32_0 : i32, i32
  }
  func.func @transform_12(%arg0: i32) -> (i32, i32) {
    %c0_i32 = arith.constant 0 : i32
    %c0_i32_0 = arith.constant 0 : i32
    %c0_i32_1 = arith.constant 0 : i32
    return %c0_i32, %c0_i32_0 : i32, i32
  }
  func.func @transform_13(%arg0: i32) -> (i32, i32) {
    %c0_i32 = arith.constant 0 : i32
    %c0_i32_0 = arith.constant 0 : i32
    %c0_i32_1 = arith.constant 0 : i32
    return %c0_i32, %c0_i32_0 : i32, i32
  }
  func.func @transform_14(%arg0: i32) -> (i32, i32) {
    %c0_i32 = arith.constant 0 : i32
    %c0_i32_0 = arith.constant 0 : i32
    %c0_i32_1 = arith.constant 0 : i32
    return %c0_i32, %c0_i32_0 : i32, i32
  }
  func.func @transform_15(%arg0: i32) -> (i32, i32) {
    %c0_i32 = arith.constant 0 : i32
    %c0_i32_0 = arith.constant 0 : i32
    %c0_i32_1 = arith.constant 0 : i32
    return %c0_i32, %c0_i32_0 : i32, i32
  }
  func.func @transform_16(%arg0: i32) -> (i32, i32) {
    %c0_i32 = arith.constant 0 : i32
    %c0_i32_0 = arith.constant 0 : i32
    %c0_i32_1 = arith.constant 0 : i32
    return %c0_i32, %c0_i32_0 : i32, i32
  }
  func.func @transform_17(%arg0: i32) -> (i32, i32, i32) {
    %c0_i32 = arith.constant 0 : i32
    %c0_i32_0 = arith.constant 0 : i32
    %c0_i32_1 = arith.constant 0 : i32
    return %arg0, %c0_i32, %c0_i32_0 : i32, i32, i32
  }
}

</mosaic_0001>

<bundles_post_ra>
// kernel: tpu_custom_call.1
= control target key start
LH: loop header
LB: loop body
LE: loop exit
PB: predicated region body
PF: predicated region fallthrough
CT: control target
= control target key end

     0   :  { %s10989_s0 = inlined_call_operand.hbm [shape: f32[16,8,128], index: 0, kind: input, shape index: {}]   ;;  %s10990_s1 = inlined_call_operand.vmem [shape: f32[1,128], index: 1, kind: input, shape index: {}]   ;;  %s10991_s2 = inlined_call_operand.hbm [shape: f32[1,128], index: 2, kind: input, shape index: {}]   ;;  %s10992_s3 = inlined_call_operand.hbm [shape: f32[128,128], index: 3, kind: input, shape index: {}]   ;;  %s10993_s4 = inlined_call_operand.hbm [shape: f32[128,128], index: 4, kind: input, shape index: {}]   ;;  %s10994_s5 = inlined_call_operand.hbm [shape: f32[128,128], index: 5, kind: input, shape index: {}]   ;;  %s10995_s6 = inlined_call_operand.vmem [shape: f32[1,128], index: 6, kind: input, shape index: {}]   ;;  %s10996_s7 = inlined_call_operand.vmem [shape: f32[1,128], index: 7, kind: input, shape index: {}]   ;;  %s10997_s8 = inlined_call_operand.vmem [shape: f32[1,128], index: 8, kind: input, shape index: {}]   ;;  %s10998_s9 = inlined_call_operand.hbm [shape: f32[128,128], index: 9, kind: input, shape index: {}]   ;;  %s10999_s10 = inlined_call_operand.vmem [shape: f32[1,128], index: 10, kind: input, shape index: {}]   ;;  %s11000_s11 = inlined_call_operand.vmem [shape: f32[1,128], index: 11, kind: input, shape index: {}]   ;;  %s11001_s12 = inlined_call_operand.vmem [shape: f32[1,128], index: 12, kind: input, shape index: {}]   ;;  %s11002_s13 = inlined_call_operand.hbm [shape: f32[128,256], index: 13, kind: input, shape index: {}]   ;;  %s11003_s14 = inlined_call_operand.vmem [shape: f32[1,256], index: 14, kind: input, shape index: {}]   ;;  %s11004_s15 = inlined_call_operand.hbm [shape: f32[256,128], index: 15, kind: input, shape index: {}]   ;;  %s11005_s16 = inlined_call_operand.vmem [shape: f32[1,128], index: 16, kind: input, shape index: {}]   ;;  %s11006_s17 = inlined_call_operand.hbm [shape: f32[16,8,128], index: 17, kind: output, shape index: {}]  }
   0x1   :  { %11022 = sst [smem:[#allocation33_spill]] %s10989_s0 }
   0x2   :  { %11023 = sst [smem:[#allocation34_spill]] %s10990_s1 }
   0x3   :  { %11024 = sst [smem:[#allocation35_spill]] %s10991_s2 }
   0x4   :  { %11025 = sst [smem:[#allocation36_spill]] %s10992_s3 }
   0x5   :  { %11026 = sst [smem:[#allocation37_spill]] %s10993_s4 }
   0x6   :  { %11027 = sst [smem:[#allocation38_spill]] %s10994_s5 }
   0x7   :  { %11028 = sst [smem:[#allocation39_spill]] %s10998_s9 }
   0x8   :  { %11029 = sst [smem:[#allocation40_spill]] %s11002_s13 }
   0x9   :  { %11030 = sst [smem:[#allocation41_spill]] %s11004_s15 }
   0xa   :  { %11031 = sst [smem:[#allocation42_spill]] %s11006_s17 }
   0xb   :  { %22 = vsyncpa [#allocation3], 0 }
   0xc   :  { %24 = vsyncpa [#allocation3 + $0x1], 0 }
   0xd   :  { %25 = vsyncpa [#allocation6], 0 }
   0xe   :  { %26 = vsyncpa [#allocation9], 0 }
   0xf   :  { %27 = vsyncpa [#allocation12], 0 }
  0x10   :  { %28 = vsyncpa [#allocation15], 0 }
  0x11   :  { %29 = vsyncpa [#allocation4], 0 }
  0x12   :  { %31 = vsyncpa [#allocation4 + $0x1], 0  ;;  %s9475_s24 = smov 0   ;;  %s9477_s25 = smov 0  }
  0x13   :  { %s9479_s26 = smov 0   ;;  %s9481_s27 = smov 0  }
  0x14 LB: > { %11032 = sst [smem:[#allocation23_spill]] %s9359_s26  ;;  %s9365_s28 = smov [#allocation5]   ;;  %s9363_s27 = sphi %s9481_s27, %s11082_s27   ;;  %s9359_s26 = sphi %s9479_s26, %s11084_s26   ;;  %s9355_s25 = sphi %s9477_s25, %s11086_s25   ;;  %s9351_s24 = sphi %s9475_s24, %s11085_s24  }
  0x15   : > { %s446_s29 = sshll.u32 %s9365_s28, 4  ;;  %s9496_s0 = sadd.s32 4294967295, %s9363_s27   ;;  %s447_s29 = int_to_ptr.vmem [resolvable:$true] %s446_s29 }
  0x16   : > { %p7743_p0 = scmp.ge.s32.totalorder %s9363_s27, 1  ;;  %p11012_p1 = scmp.eq.s32.totalorder %s9496_s0, 0 }
  0x17   : > { %p430_p2 = scmp.lt.s32.totalorder %s9363_s27, 3  ;;  %s9366_s18 = smov [#allocation8]  }
  0x18   : > { %s469_s19 = sshll.u32 %s9366_s18, 4  ;;  %s9367_s20 = smov [#allocation11]   ;;  %s9514_s19 = int_to_ptr.vmem [resolvable:$true] %s469_s19 }
  0x19   : > { %p9501_p3 = pnand %p7743_p0, %p430_p2  ;;  %s504_s21 = sshll.u32 %s9367_s20, 4  ;;  %s9516_s21 = int_to_ptr.vmem [resolvable:$true] %s504_s21 }
  0x1a   : > { %s9084_s23 = scalar_lea.vmem %s447_s29, 16  ;;  %s9091_s28 = scalar_lea.vmem %s447_s29, 32 }
  0x1b   : > { %s11033_s30 = scalar_select %p9501_p3, 1, 0 }
  0x1c   : > { %p8777_p5 = pneg %p9501_p3  ;;  %p9085_p8 = scmp.ne.s32.totalorder %s447_s29, %s9084_s23 }
  0x1d   : > { %p9092_p11 = scmp.lt.s32.totalorder %s447_s29, %s447_s29  ;;  %p9093_p12 = scmp.lt.s32.totalorder %s9091_s28, %s9084_s23 }
  0x1e   : > { %p9510_p6 = pnand %p8777_p5, %p11012_p1 }
  0x1f   : > { %p9094_p13 = por %p9093_p12, %p9092_p11 }
  0x20   : > { %p9520_p7 = pneg %p9510_p6 }
  0x22   : > { %p9087_p9 = pnand %p9085_p8, %p9520_p7 }
  0x24   : > { %p9088_p10 = pneg %p9087_p9 }
  0x26   : > { %p9095_p0 = pnand %p9094_p13, %p9088_p10 }
  0x28   : > { %9098 = shalt.err (!%p9095_p0)
}
  0x29   : > { %s11036_s2 = sld [smem:[#allocation35_spill]]  ;;  %s9110_s17 = scalar_lea.vmem %s9514_s19, 2048 }
  0x2a   : > { %p9111_p2 = scmp.ne.s32.totalorder %s9514_s19, %s9110_s17  ;;  %p9118_p9 = scmp.lt.s32.totalorder %s9514_s19, %s9514_s19 }
  0x2b   : > { %p9119_p11 = scmp.lt.s32.totalorder %s9110_s17, %s9110_s17 }
  0x2c   : > { %p9113_p5 = pnand %p9111_p2, %p9520_p7 }
  0x2d   : > { %p9120_p10 = por %p9119_p11, %p9118_p9 }
  0x2e   : > { %p9114_p8 = pneg %p9113_p5 }
  0x2f   : > { %8780 = dma.hbm_to_vmem [thread:$0]  (!%p9510_p6), %s11036_s2, 16, %s447_s29, [#allocation6]  }
  0x30   : > { %p9121_p12 = pnand %p9120_p10, %p9114_p8 }
  0x32   : > { %9124 = shalt.err (!%p9121_p12)
}
  0x33   : > { %s11009_s23 = smov 128   ;;  %s11011_s28 = smov 8  }
  0x34   : > { %s11037_s4 = sld [smem:[#allocation37_spill]]  ;;  %s9136_s17 = scalar_lea.vmem %s9516_s21, 2048 }
  0x35   : > { %p9137_p13 = scmp.ne.s32.totalorder %s9516_s21, %s9136_s17  ;;  %p9144_p5 = scmp.lt.s32.totalorder %s9516_s21, %s9516_s21 }
  0x36   : > { %p9145_p8 = scmp.lt.s32.totalorder %s9136_s17, %s9136_s17 }
  0x37   : > { %p9139_p0 = pnand %p9137_p13, %p9520_p7 }
  0x38   : > { %p9146_p9 = por %p9145_p8, %p9144_p5 }
  0x39   : > { %p9140_p2 = pneg %p9139_p0 }
  0x3a   : > { %8786 = dma.hbm_to_vmem [thread:$0]  (!%p9510_p6), %s11037_s4, 2048, %s9514_s19, [#allocation9], %s11009_s23, %s11009_s23, %s11011_s28  }
  0x3b   : > { %p9147_p11 = pnand %p9146_p9, %p9140_p2 }
  0x3d   : > { %9150 = shalt.err (!%p9147_p11)
}
  0x3e   : > { %s11038_s9 = sld [smem:[#allocation39_spill]]  ;;  %s9370_s19 = smov [#allocation7]  }
  0x3f   : > { %s456_s18 = sshll.u32 %s9370_s19, 4  ;;  %s9371_s2 = smov [#allocation10]   ;;  %s457_s18 = int_to_ptr.vmem [resolvable:$true] %s456_s18 }
  0x40   : > { %s482_s4 = sshll.u32 %s9371_s2, 4  ;;  %s9162_s17 = scalar_lea.vmem %s457_s18, 2048  ;;  %s483_s4 = int_to_ptr.vmem [resolvable:$true] %s482_s4 }
  0x41   : > { %p9163_p10 = scmp.ne.s32.totalorder %s457_s18, %s9162_s17  ;;  %p9170_p0 = scmp.lt.s32.totalorder %s457_s18, %s457_s18 }
  0x42   : > { %p9171_p2 = scmp.lt.s32.totalorder %s9162_s17, %s9162_s17 }
  0x43   : > { %p9165_p12 = pnand %p9163_p10, %p9520_p7 }
  0x44   : > { %8792 = dma.hbm_to_vmem [thread:$0]  (!%p9510_p6), %s11038_s9, 2048, %s9516_s21, [#allocation12], %s11009_s23, %s11009_s23, %s11011_s28  }
  0x45   : > { %p9166_p13 = pneg %p9165_p12  ;;  %p9172_p5 = por %p9171_p2, %p9170_p0 }
  0x47   : > { %p9173_p8 = pnand %p9172_p5, %p9166_p13 }
  0x49   : > { %9176 = shalt.err (!%p9173_p8)
}
  0x4a   : > { %s11039_s3 = sld [smem:[#allocation36_spill]]  ;;  %s9188_s2 = scalar_lea.vmem %s483_s4, 2048 }
  0x4b   : > { %p9189_p9 = scmp.ne.s32.totalorder %s483_s4, %s9188_s2  ;;  %p9196_p12 = scmp.lt.s32.totalorder %s483_s4, %s483_s4 }
  0x4c   : > { %p9197_p0 = scmp.lt.s32.totalorder %s9188_s2, %s9188_s2 }
  0x4d   : > { %p9191_p11 = pnand %p9189_p9, %p9520_p7 }
  0x4e   : > { %p9198_p13 = por %p9197_p0, %p9196_p12 }
  0x4f   : > { %p9192_p10 = pneg %p9191_p11 }
  0x50   : > { %8783 = dma.hbm_to_vmem [thread:$0]  (!%p9510_p6), %s11039_s3, 2048, %s457_s18, [#allocation6], %s11009_s23, %s11009_s23, %s11011_s28  }
  0x51   : > { %p9199_p2 = pnand %p9198_p13, %p9192_p10 }
  0x53   : > { %9202 = shalt.err (!%p9199_p2)
}
  0x54   : > { %s11040_s5 = sld [smem:[#allocation38_spill]]  ;;  %s9372_s18 = smov [#allocation13]  }
  0x55   : > { %s526_s17 = sshll.u32 %s9372_s18, 4  ;;  %s527_s17 = int_to_ptr.vmem [resolvable:$true] %s526_s17 }
  0x56   : > { %s9214_s21 = scalar_lea.vmem %s527_s17, 4096  ;;  %p9222_p11 = scmp.lt.s32.totalorder %s527_s17, %s527_s17 }
  0x57   : > { %p9215_p5 = scmp.ne.s32.totalorder %s527_s17, %s9214_s21  ;;  %p9223_p10 = scmp.lt.s32.totalorder %s9214_s21, %s9214_s21 }
  0x59   : > { %p9217_p8 = pnand %p9215_p5, %p9520_p7  ;;  %p9224_p12 = por %p9223_p10, %p9222_p11 }
  0x5a   : > { %8789 = dma.hbm_to_vmem [thread:$0]  (!%p9510_p6), %s11040_s5, 2048, %s483_s4, [#allocation9], %s11009_s23, %s11009_s23, %s11011_s28  }
  0x5b   : > { %p9218_p9 = pneg %p9217_p8 }
  0x5d   : > { %p9225_p0 = pnand %p9224_p12, %p9218_p9 }
  0x5f   : > { %9228 = shalt.err (!%p9225_p0)
}
  0x60   : > { %s9373_s20 = smov 256   ;;  %s9374_s2 = smov 16  }
  0x61   : > { %s11041_s13 = sld [smem:[#allocation40_spill]]  ;;  %s9375_s19 = smov [#allocation14]  }
  0x62   : > { %s542_s18 = sshll.u32 %s9375_s19, 4  ;;  %s543_s18 = int_to_ptr.vmem [resolvable:$true] %s542_s18 }
  0x63   : > { %s9240_s23 = scalar_lea.vmem %s543_s18, 4096  ;;  %p9248_p8 = scmp.lt.s32.totalorder %s543_s18, %s543_s18 }
  0x64   : > { %p9241_p13 = scmp.ne.s32.totalorder %s543_s18, %s9240_s23  ;;  %p9249_p9 = scmp.lt.s32.totalorder %s9240_s23, %s9240_s23 }
  0x66   : > { %p9243_p2 = pnand %p9241_p13, %p9520_p7  ;;  %p9250_p11 = por %p9249_p9, %p9248_p8 }
  0x67   : > { %8795 = dma.hbm_to_vmem [thread:$0]  (!%p9510_p6), %s11041_s13, 4096, %s527_s17, [#allocation12], %s9373_s20, %s9373_s20, %s9374_s2  }
  0x68   : > { %p9244_p5 = pneg %p9243_p2 }
  0x6a   : > { %p9251_p10 = pnand %p9250_p11, %p9244_p5 }
  0x6c   : > { %9254 = shalt.err (!%p9251_p10)
}
  0x6d   : > { %s11042_s21 = smov 128   ;;  %s11043_s15 = sld [smem:[#allocation41_spill]] }
  0x6e   : > { %s7742_s1 = sadd.s32 4294967294, %s9363_s27   ;;  %s9600_s22 = sadd.s32 1, %s9363_s27  }
  0x6f   : > { %11044 = sst [smem:[#allocation24_spill]] %s9600_s22  ;;  %s44_s23 = sadd.s32 1, %s9359_s26 }
  0x70   : > { %s41_s20 = ssub.s32 %s9363_s27, %s9600_s22  ;;  %p51_p7 = scmp.ne.s32.totalorder %s9359_s26, %s9355_s25 }
  0x71   : > { %p42_p12 = scmp.eq.s32.totalorder %s41_s20, 0  ;;  %p52_p0 = scmp.eq.s32.totalorder %s9363_s27, 0 }
  0x72   : > { %p57_p13 = scmp.ne.s32.totalorder %s9355_s25, %s9351_s24  ;;  %p417_p2 = scmp.eq.s32.totalorder %s9496_s0, 1 }
  0x73   : > { %8798 = dma.hbm_to_vmem [thread:$0]  (!%p9510_p6), %s11043_s15, 4096, %s543_s18, [#allocation15], %s11042_s21, %s11042_s21, %s11011_s28  }
  0x74   : > { %s9612_s2 = scalar_select %p42_p12, %s9359_s26, %s44_s23  }
  0x75   : > { %p53_p5 = por %p52_p0, %p51_p7  ;;  %p9616_p8 = por %p11012_p1, %p57_p13 }
  0x76   : > { %11045 = sst [smem:[#allocation25_spill]] %s9612_s2  ;;  %p9620_p6 = por %p417_p2, %p51_p7 }
  0x77   : > { %s11046_s4 = scalar_select %p9616_p8, 1, 0 }
  0x78   : > { %s11047_s19 = scalar_select %p9620_p6, 1, 0 }
  0x79   : > { %p423_p9 = scmp.eq.s32.totalorder %s7742_s1, 1  ;;  %p8814_p11 = scmp.lt.s32.totalorder %s9363_s27, 2 }
  0x7a   : > { %s559_s18 = sand.u32 1, %s9359_s26   ;;  %s7907_s23 = sshll.u32 %s9363_s27, 10 }
  0x7b   : > { %p9626_p10 = por %p423_p9, %p57_p13  ;;  %s7752_s17 = sshll.u32 %s559_s18, 6 }
  0x7c   : > { %s11049_s3 = sld [smem:[#allocation33_spill]]  ;;  %s563_s9 = scalar_lea.vmem [#allocation2], %s7752_s17 }
  0x7d   : > { %s11048_s29 = scalar_select %p9626_p10, 1, 0 }
  0x7e   : > { %s570_s13 = sshll.u32 %s563_s9, 4  ;;  %p9636_p7 = pnand %p8814_p11, %p53_p5  ;;  %s9640_s13 = int_to_ptr.vmem [resolvable:$true] %s570_s13 }
  0x7f   : > { %s9642_s15 = scalar_lea.sflag [#allocation3], %s559_s18 }
  0x80   : > { %p9257_p0 = pneg %p9636_p7 }
  0x82   : > { %s9634_s5 = scalar_lea.hbm %s11049_s3, %s7907_s23  ;;  %s9260_s17 = scalar_lea.hbm %s11049_s3, 2048 }
  0x83   : > { %s9255_s2 = scalar_lea.hbm %s9634_s5, 1024  ;;  %p9261_p5 = scmp.lt.s32.totalorder %s9634_s5, %s11049_s3 }
  0x84   : > { %p9256_p12 = scmp.ne.s32.totalorder %s9634_s5, %s9255_s2  ;;  %p9262_p9 = scmp.lt.s32.totalorder %s9260_s17, %s9255_s2 }
  0x86   : > { %p9258_p13 = pnand %p9257_p0, %p9256_p12  ;;  %p9263_p11 = por %p9262_p9, %p9261_p5 }
  0x88   : > { %p9259_p2 = pneg %p9258_p13 }
  0x8a   : > { %p9264_p4 = pnand %p9263_p11, %p9259_p2 }
  0x8c   : > { %9267 = shalt.err (!%p9264_p4)
}
  0x8d   : > { %s9268_s18 = scalar_lea.vmem %s9640_s13, 1024  ;;  %s9376_s26 = smov [#allocation2]  }
  0x8e   : > { %p9269_p1 = scmp.ne.s32.totalorder %s9640_s13, %s9268_s18  ;;  %s9273_s22 = sshll.u32 %s9376_s26, 4  ;;  %s9274_s22 = int_to_ptr.vmem [resolvable:$false] %s9273_s22 }
  0x8f   : > { %s9275_s28 = scalar_lea.vmem %s9274_s22, 2048  ;;  %p9276_p13 = scmp.lt.s32.totalorder %s9640_s13, %s9274_s22 }
  0x90   : > { %p9271_p10 = pnand %p9269_p1, %p9257_p0  ;;  %p9277_p6 = scmp.lt.s32.totalorder %s9275_s28, %s9268_s18 }
  0x92   : > { %p9272_p12 = pneg %p9271_p10  ;;  %p9278_p8 = por %p9277_p6, %p9276_p13 }
  0x94   : > { %p9279_p3 = pnand %p9278_p8, %p9272_p12 }
  0x96   : > { %9282 = shalt.err (!%p9279_p3)
}
  0x97   : > { %s11051_s2 = smov 8   ;;  %p11052_p1 = scmp.ne.s32.totalorder %s11033_s30, 0 }
  0x98   : > { %8802 = dma.hbm_to_vmem [thread:$0]  (!%p9636_p7), %s9634_s5, 1024, %s9640_s13, %s9642_s15, %s11042_s21, %s11042_s21, %s11051_s2  }
  0x99   : > { %582 = sbr.rel (%p11052_p1) target bundleno = 2590 (0xa1e), region = 88 }
  0x9e   : > { %s9669_s26 = sand.u32 1, %s9355_s25   ;;  %p11053_p3 = scmp.ne.s32.totalorder %s11046_s4, 0 }
  0x9f   : > { %s7756_s22 = sshll.u32 %s9669_s26, 6  ;;  %s585_s23 = scalar_lea.sflag [#allocation3], %s9669_s26 }
  0xa0   : > { %s9675_s1 = scalar_lea.vmem [#allocation2], %s7756_s22 }
  0xa1   : > { %9326 = dma.done.wait (%p11053_p3), %s585_s23, 1024  }
  0xa2   : > { %9328 = vsyncadd (%p11053_p3), %s585_s23, 4294966272  ;;  %p11054_p4 = scmp.eq.s32.totalorder %s9496_s0, 0 }
  0xa4   : > { %9330 = dma.done.wait (%p11054_p4), [#allocation6], 2064   ;;  %p11055_p8 = pmov %p11054_p4 }
  0xa5   : > { %p11056_p6 = pmov %p11054_p4 }
  0xa6   : > { %9332 = vsyncadd (%p11055_p8), [#allocation6], 4294965232 }
  0xa7   : > { %9334 = dma.done.wait (%p11056_p6), [#allocation9], 4096   ;;  %p11057_p10 = pmov %p11054_p4 }
  0xa8   : > { %p11058_p7 = pmov %p11054_p4 }
  0xa9   : > { %9336 = vsyncadd (%p11057_p10), [#allocation9], 4294963200 }
  0xaa   : > { %9338 = dma.done.wait (%p11058_p7), [#allocation12], 6144   ;;  %p11059_p0 = pmov %p11054_p4 }
  0xac   : > { %9340 = vsyncadd (%p11059_p0), [#allocation12], 4294961152  ;;  %p11060_p2 = pmov %p11059_p0 }
  0xad   : > { %p11061_p5 = pmov %p11059_p0 }
  0xae   : > { %9342 = dma.done.wait (%p11060_p2), [#allocation15], 4096  }
  0xaf   : > { %9344 = vsyncadd (%p11061_p5), [#allocation15], 4294963200  ;;  %v669_v0 = vld [vmem:[%s9675_s1] sm:$0xff]  ;;  %v671_v1 = vld [vmem:[%s9675_s1 + $0x10] sm:$0xff]  ;;  %s11062_s15 = sld [smem:[#allocation34_spill]]  ;;  %vm9378_vm0 = vmmov 0  }
  0xb0   : > { %677 = vadd.xlane.f32.xlu0 %v669_v0  ;;  %681 = vadd.xlane.f32.xlu1 %v671_v1  ;;  %v670_v2 = vld [vmem:[%s9675_s1 + $0x8] sm:$0xff]  ;;  %v672_v3 = vld [vmem:[%s9675_s1 + $0x18] sm:$0xff]  ;;  %v673_v4 = vld [vmem:[%s9675_s1 + $0x20] sm:$0xff]  ;;  %vm1380_vm1 = vcmask 261120   ;;  %s9379_s9 = smov 96   ;;  %s9380_s20 = smov 64  }
  0xb1   : > { %v674_v5 = vld [vmem:[%s9675_s1 + $0x28] sm:$0xff]  ;;  %v675_v6 = vld [vmem:[%s9675_s1 + $0x30] sm:$0xff]  ;;  %v676_v7 = vld [vmem:[%s9675_s1 + $0x38] sm:$0xff]  ;;  %s9381_s18 = smov 32   ;;  %vm3749_vm2 = vcmask 64512   ;;  %s11078_s23 = sld [smem:[#allocation42_spill]] }
  0xb2   : > { %v811_v8 = vld [vmem:[#allocation7 + $0x78] sm:$0xff]  ;;  %v810_v10 = vld [vmem:[#allocation7 + $0x70] sm:$0xff]  ;;  %v809_v12 = vld [vmem:[#allocation7 + $0x68] sm:$0xff]  ;;  %p11079_p11 = scmp.ne.s32.totalorder %s11047_s19, 0 }
  0xb3   : > { %v947_v9 = vld [vmem:[#allocation8 + $0x78] sm:$0xff]  ;;  %8213 = vmatprep.subr.mxu0 %v811_v8  ;;  %v946_v11 = vld [vmem:[#allocation8 + $0x70] sm:$0xff]  ;;  %v945_v43 = vld [vmem:[#allocation8 + $0x68] sm:$0xff] }
  0xb4   : > { %679 = vadd.xlane.f32.xlu0 %v670_v2  ;;  %683 = vadd.xlane.f32.xlu1 %v672_v3  ;;  %v808_v45 = vld [vmem:[#allocation7 + $0x60] sm:$0xff]  ;;  %v807_v48 = vld [vmem:[#allocation7 + $0x58] sm:$0xff]  ;;  %v806_v50 = vld [vmem:[#allocation7 + $0x50] sm:$0xff] }
  0xb5   : > { %8257 = vmatprep.subr.mxu1 %v947_v9  ;;  %8214 = vmatpush3.msra.mxu0 %v811_v8  ;;  %v944_v46 = vld [vmem:[#allocation8 + $0x60] sm:$0xff]  ;;  %v943_v49 = vld [vmem:[#allocation8 + $0x58] sm:$0xff]  ;;  %v942_v51 = vld [vmem:[#allocation8 + $0x50] sm:$0xff] }
  0xb6   : > { %8258 = vmatpush3.msra.mxu1 %v947_v9  ;;  %8215 = vmatprep.subr.mxu0 %v810_v10  ;;  %v805_v52 = vld [vmem:[#allocation7 + $0x48] sm:$0xff]  ;;  %v804_v54 = vld [vmem:[#allocation7 + $0x40] sm:$0xff]  ;;  %v803_v56 = vld [vmem:[#allocation7 + $0x38] sm:$0xff] }
  0xb7   : > { %8259 = vmatprep.subr.mxu1 %v946_v11  ;;  %8216 = vmatpush3.msra.mxu0 %v810_v10  ;;  %v941_v53 = vld [vmem:[#allocation8 + $0x48] sm:$0xff]  ;;  %v940_v55 = vld [vmem:[#allocation8 + $0x40] sm:$0xff]  ;;  %v939_v57 = vld [vmem:[#allocation8 + $0x38] sm:$0xff] }
  0xb8   : > { %685 = vadd.xlane.f32.xlu0 %v673_v4  ;;  %687 = vadd.xlane.f32.xlu1 %v674_v5  ;;  %v802_v58 = vld [vmem:[#allocation7 + $0x30] sm:$0xff]  ;;  %v801_v60 = vld [vmem:[#allocation7 + $0x28] sm:$0xff]  ;;  %v800_v62 = vld [vmem:[#allocation7 + $0x20] sm:$0xff] }
  0xb9   : > { %8260 = vmatpush3.msra.mxu1 %v946_v11  ;;  %8217 = vmatprep.subr.mxu0 %v809_v12  ;;  %v938_v59 = vld [vmem:[#allocation8 + $0x30] sm:$0xff]  ;;  %v937_v61 = vld [vmem:[#allocation8 + $0x28] sm:$0xff]  ;;  %v936_v63 = vld [vmem:[#allocation8 + $0x20] sm:$0xff] }
  0xba   : > { %8218 = vmatpush3.msra.mxu0 %v809_v12  ;;  %8261 = vmatprep.subr.mxu1 %v945_v43  ;;  %v9737_v8 = vld [vmem:[#allocation10 + $0x78] sm:$0xff] }
  0xbb   : > { %8219 = vmatprep.subr.mxu0 %v808_v45  ;;  %8262 = vmatpush3.msra.mxu1 %v945_v43 }
  0xbc   : > { %689 = vadd.xlane.f32.xlu0 %v675_v6  ;;  %691 = vadd.xlane.f32.xlu1 %v676_v7 }
  0xbd   : > { %8220 = vmatpush3.msra.mxu0 %v808_v45  ;;  %8263 = vmatprep.subr.mxu1 %v944_v46 }
  0xbe   : > { %8221 = vmatprep.subr.mxu0 %v807_v48  ;;  %8264 = vmatpush3.msra.mxu1 %v944_v46 }
  0xbf   : > { %8222 = vmatpush3.msra.mxu0 %v807_v48  ;;  %8265 = vmatprep.subr.mxu1 %v943_v49 }
  0xc0   : > { %8223 = vmatprep.subr.mxu0 %v806_v50  ;;  %8266 = vmatpush3.msra.mxu1 %v943_v49 }
  0xc1   : > { %8224 = vmatpush3.msra.mxu0 %v806_v50  ;;  %8267 = vmatprep.subr.mxu1 %v942_v51 }
  0xc2   : > { %8225 = vmatprep.subr.mxu0 %v805_v52  ;;  %8268 = vmatpush3.msra.mxu1 %v942_v51 }
  0xc3   : > { %8226 = vmatpush3.msra.mxu0 %v805_v52  ;;  %8269 = vmatprep.subr.mxu1 %v941_v53 }
  0xc4   : > { %8227 = vmatprep.subr.mxu0 %v804_v54  ;;  %8270 = vmatpush3.msra.mxu1 %v941_v53 }
  0xc5   : > { %8228 = vmatpush3.msra.mxu0 %v804_v54  ;;  %8271 = vmatprep.subr.mxu1 %v940_v55 }
  0xc6   : > { %8229 = vmatprep.subr.mxu0 %v803_v56  ;;  %8272 = vmatpush3.msra.mxu1 %v940_v55 }
  0xc7   : > { %8230 = vmatpush3.msra.mxu0 %v803_v56  ;;  %8273 = vmatprep.subr.mxu1 %v939_v57 }
  0xc8   : > { %8231 = vmatprep.subr.mxu0 %v802_v58  ;;  %8274 = vmatpush3.msra.mxu1 %v939_v57  ;;  %v1074_v57 = vld [vmem:[#allocation10 + $0x70] sm:$0xff] }
  0xc9   : > { %8232 = vmatpush3.msra.mxu0 %v802_v58  ;;  %8275 = vmatprep.subr.mxu1 %v938_v59 }
  0xca   : > { %8233 = vmatprep.subr.mxu0 %v801_v60  ;;  %8276 = vmatpush3.msra.mxu1 %v938_v59  ;;  %v1073_v59 = vld [vmem:[#allocation10 + $0x68] sm:$0xff] }
  0xcb   : > { %8234 = vmatpush3.msra.mxu0 %v801_v60  ;;  %8277 = vmatprep.subr.mxu1 %v937_v61 }
  0xcc   : > { %8235 = vmatprep.subr.mxu0 %v800_v62  ;;  %8278 = vmatpush3.msra.mxu1 %v937_v61 }
  0xcd   : > { %8236 = vmatpush3.msra.mxu0 %v800_v62  ;;  %8279 = vmatprep.subr.mxu1 %v936_v63 }
  0xce   : > { %8280 = vmatpush3.msra.mxu1 %v936_v63 }
 0x139   : > { %v678_v13 = vpop.xlane.xlu0 %677  ;;  %v682_v14 = vpop.xlane.xlu1 %681 }
 0x13a   : > { %v694_v15 = vmul.f32 0.0078125, %v678_v13  ;;  %v696_v16 = vmul.f32 0.0078125, %v682_v14 }
 0x13c   : > { %v9705_v17 = vsub.f32 %v669_v0, %v694_v15  ;;  %v9707_v18 = vsub.f32 %v671_v1, %v696_v16  ;;  %v799_v0 = vld [vmem:[#allocation7 + $0x18] sm:$0xff] }
 0x13d   : > { %v680_v19 = vpop.xlane.xlu0 %679  ;;  %v684_v20 = vpop.xlane.xlu1 %683  ;;  %8237 = vmatprep.subr.mxu0 %v799_v0  ;;  %v935_v1 = vld [vmem:[#allocation8 + $0x18] sm:$0xff] }
 0x13e   : > { %v695_v21 = vmul.f32 0.0078125, %v680_v19  ;;  %v710_v22 = vmul.f32 %v9705_v17, %v9705_v17  ;;  %v697_v23 = vmul.f32 0.0078125, %v684_v20  ;;  %v712_v24 = vmul.f32 %v9707_v18, %v9707_v18  ;;  %8238 = vmatpush3.msra.mxu0 %v799_v0  ;;  %8281 = vmatprep.subr.mxu1 %v935_v1  ;;  %v1072_v0 = vld [vmem:[#allocation10 + $0x60] sm:$0xff] }
 0x13f   : > { %8282 = vmatpush3.msra.mxu1 %v935_v1 }
 0x140   : > { %718 = vadd.xlane.f32.xlu0 %v710_v22  ;;  %v9713_v25 = vsub.f32 %v670_v2, %v695_v21  ;;  %v9715_v26 = vsub.f32 %v672_v3, %v697_v23  ;;  %v798_v2 = vld [vmem:[#allocation7 + $0x10] sm:$0xff] }
 0x141   : > { %v686_v27 = vpop.xlane.xlu0 %685  ;;  %v688_v28 = vpop.xlane.xlu1 %687  ;;  %v934_v3 = vld [vmem:[#allocation8 + $0x10] sm:$0xff]  ;;  %8239 = vmatprep.subr.mxu0 %v798_v2 }
 0x142   : > { %v698_v29 = vmul.f32 0.0078125, %v686_v27  ;;  %v711_v30 = vmul.f32 %v9713_v25, %v9713_v25  ;;  %v699_v31 = vmul.f32 0.0078125, %v688_v28  ;;  %v713_v32 = vmul.f32 %v9715_v26, %v9715_v26  ;;  %8240 = vmatpush3.msra.mxu0 %v798_v2  ;;  %8283 = vmatprep.subr.mxu1 %v934_v3 }
 0x143   : > { %8284 = vmatpush3.msra.mxu1 %v934_v3 }
 0x144   : > { %722 = vadd.xlane.f32.xlu0 %v712_v24  ;;  %720 = vadd.xlane.f32.xlu1 %v711_v30  ;;  %v9721_v33 = vsub.f32 %v673_v4, %v698_v29  ;;  %v9723_v34 = vsub.f32 %v674_v5, %v699_v31  ;;  %v797_v4 = vld [vmem:[#allocation7 + $0x8] sm:$0xff] }
 0x145   : > { %v690_v35 = vpop.xlane.xlu0 %689  ;;  %v692_v36 = vpop.xlane.xlu1 %691  ;;  %8241 = vmatprep.subr.mxu0 %v797_v4  ;;  %v933_v5 = vld [vmem:[#allocation8 + $0x8] sm:$0xff] }
 0x146   : > { %v700_v37 = vmul.f32 0.0078125, %v690_v35  ;;  %v714_v38 = vmul.f32 %v9721_v33, %v9721_v33  ;;  %v701_v39 = vmul.f32 0.0078125, %v692_v36  ;;  %v715_v40 = vmul.f32 %v9723_v34, %v9723_v34  ;;  %8242 = vmatpush3.msra.mxu0 %v797_v4  ;;  %8285 = vmatprep.subr.mxu1 %v933_v5 }
 0x147   : > { %8286 = vmatpush3.msra.mxu1 %v933_v5 }
 0x148   : > { %724 = vadd.xlane.f32.xlu1 %v713_v32  ;;  %726 = vadd.xlane.f32.xlu0 %v714_v38  ;;  %v9729_v41 = vsub.f32 %v675_v6, %v700_v37  ;;  %v9731_v42 = vsub.f32 %v676_v7, %v701_v39  ;;  %v796_v6 = vld [vmem:[#allocation7] sm:$0xff]  ;;  %v7765_v39 = vld [vmem:[%s11062_s15] ss:$0 sm:$0xff] }
 0x149   : > { %v932_v7 = vld [vmem:[#allocation8] sm:$0xff]  ;;  %8243 = vmatprep.subr.mxu0 %v796_v6 }
 0x14a   : > { %v716_v44 = vmul.f32 %v9729_v41, %v9729_v41  ;;  %v717_v47 = vmul.f32 %v9731_v42, %v9731_v42  ;;  %8244 = vmatpush3.msra.mxu0 %v796_v6  ;;  %8287 = vmatprep.subr.mxu1 %v932_v7 }
 0x14b   : > { %8301 = vmatprep.subr.mxu0 %v9737_v8  ;;  %8288 = vmatpush3.msra.mxu1 %v932_v7  ;;  %v1070_v7 = vld [vmem:[#allocation10 + $0x50] sm:$0xff] }
 0x14c   : > { %728 = vadd.xlane.f32.xlu1 %v715_v40  ;;  %730 = vadd.xlane.f32.xlu0 %v716_v44  ;;  %v7766_v44 = vld [vmem:[#allocation5] ss:$0 sm:$0xff] }
 0x150   : > { %732 = vadd.xlane.f32.xlu1 %v717_v47 }
 0x1c9   : > { %v719_v9 = vpop.xlane.xlu0 %718 }
 0x1ca   : > { %v734_v10 = vmul.f32 0.0078125, %v719_v9  ;;  %v1069_v9 = vld [vmem:[#allocation10 + $0x48] sm:$0xff] }
 0x1cc   : > { %v742_v11 = vadd.f32 1e-05, %v734_v10  ;;  %v1068_v10 = vld [vmem:[#allocation10 + $0x40] sm:$0xff] }
 0x1cd   : > { %v721_v12 = vpop.xlane.xlu1 %720  ;;  %v723_v13 = vpop.xlane.xlu0 %722 }
 0x1ce   : > { %8873 = vrsqrt.f32 %v742_v11  ;;  %v735_v14 = vmul.f32 0.0078125, %v721_v12  ;;  %v736_v15 = vmul.f32 0.0078125, %v723_v13  ;;  %v1066_v11 = vld [vmem:[#allocation10 + $0x30] sm:$0xff]  ;;  %v1065_v12 = vld [vmem:[#allocation10 + $0x28] sm:$0xff]  ;;  %v1064_v13 = vld [vmem:[#allocation10 + $0x20] sm:$0xff] }
 0x1d0   : > { %v743_v16 = vadd.f32 1e-05, %v735_v14  ;;  %v744_v19 = vadd.f32 1e-05, %v736_v15  ;;  %v1063_v14 = vld [vmem:[#allocation10 + $0x18] sm:$0xff]  ;;  %v1062_v15 = vld [vmem:[#allocation10 + $0x10] sm:$0xff] }
 0x1d1   : > { %v725_v20 = vpop.xlane.xlu1 %724  ;;  %v727_v21 = vpop.xlane.xlu0 %726 }
 0x1d2   : > { %8875 = vrsqrt.f32 %v743_v16  ;;  %v737_v22 = vmul.f32 0.0078125, %v725_v20  ;;  %v738_v23 = vmul.f32 0.0078125, %v727_v21  ;;  %v1061_v16 = vld [vmem:[#allocation10 + $0x8] sm:$0xff]  ;;  %v11019_v20 = vmov 0.0   ;;  %v9786_v21 = vld [vmem:[%s10996_s7] ss:$0 sm:$0xff] }
 0x1d3   : > { %8877 = vrsqrt.f32 %v744_v19  ;;  %v1060_v19 = vld [vmem:[#allocation10] sm:$0xff]  ;;  %8345 = vmatprep.subr.mxu1 %v11019_v20 }
 0x1d4   : > { %v745_v24 = vadd.f32 1e-05, %v737_v22  ;;  %v746_v27 = vadd.f32 1e-05, %v738_v23 }
 0x1d5   : > { %v729_v28 = vpop.xlane.xlu1 %728  ;;  %v731_v29 = vpop.xlane.xlu0 %730 }
 0x1d6   : > { %8879 = vrsqrt.f32 %v745_v24  ;;  %v739_v30 = vmul.f32 0.0078125, %v729_v28  ;;  %v740_v31 = vmul.f32 0.0078125, %v731_v29 }
 0x1d7   : > { %8881 = vrsqrt.f32 %v746_v27  ;;  %v9794_v27 = vld [vmem:[%s10995_s6] ss:$0 sm:$0xff] }
 0x1d8   : > { %v747_v32 = vadd.f32 1e-05, %v739_v30  ;;  %v748_v35 = vadd.f32 1e-05, %v740_v31 }
 0x1d9   : > { %v733_v36 = vpop.xlane.xlu1 %732 }
 0x1da   : > { %8883 = vrsqrt.f32 %v747_v32  ;;  %v741_v37 = vmul.f32 0.0078125, %v733_v36 }
 0x1db   : > { %v8874_v38 = vpop.eup %8873  ;;  %8885 = vrsqrt.f32 %v748_v35 }
 0x1dc   : > { %v749_v40 = vadd.f32 1e-05, %v741_v37  ;;  %v758_v43 = vmul.f32 %v8874_v38, %v9705_v17 }
 0x1de   : > { %8887 = vrsqrt.f32 %v749_v40  ;;  %v773_v45 = vmul.f32 %v7765_v39, %v758_v43 }
 0x1df   : > { %v8876_v46 = vpop.eup %8875 }
 0x1e0   : > { %v8878_v47 = vpop.eup %8877  ;;  %v9744_v48 = vadd.f32 %v7766_v44, %v773_v45  ;;  %v759_v49 = vmul.f32 %v8876_v46, %v9713_v25 }
 0x1e1   : > { %v760_v50 = vmul.f32 %v8878_v47, %v9707_v18 }
 0x1e2   : > { %8245 = vmatprep.mubr.f32.mxu0 %v9744_v48  ;;  %8289 = vmatprep.mubr.f32.mxu1 %v9744_v48  ;;  %v774_v51 = vmul.f32 %v7765_v39, %v759_v49 }
 0x1e3   : > { %v8880_v52 = vpop.eup %8879  ;;  %v775_v53 = vmul.f32 %v7765_v39, %v760_v50 }
 0x1e4   : > { %v8882_v54 = vpop.eup %8881  ;;  %v9750_v17 = vadd.f32 %v7766_v44, %v774_v51  ;;  %v761_v55 = vmul.f32 %v8880_v52, %v9715_v26 }
 0x1e5   : > { %v9753_v56 = vadd.f32 %v7766_v44, %v775_v53  ;;  %v762_v58 = vmul.f32 %v8882_v54, %v9721_v33 }
 0x1e6   : > { %8246 = vmatmul.mubr.f32.vlgmr.msra.gmra.mxu0 %v9750_v17  ;;  %8290 = vmatmul.mubr.f32.vlgmr.msra.gmra.mxu1 %v9750_v17  ;;  %v776_v18 = vmul.f32 %v7765_v39, %v761_v55 }
 0x1e7   : > { %v8884_v25 = vpop.eup %8883  ;;  %8302 = vmatpush3.msra.mxu0 %v9737_v8  ;;  %8248 = vmatprep.mubr.f32.mxu0 %v9753_v56  ;;  %v777_v60 = vmul.f32 %v7765_v39, %v762_v58 }
 0x1e8   : > { %v8886_v61 = vpop.eup %8885  ;;  %8292 = vmatprep.mubr.f32.mxu1 %v9753_v56  ;;  %8303 = vmatprep.subr.mxu0 %v1074_v57  ;;  %v9761_v26 = vadd.f32 %v7766_v44, %v776_v18  ;;  %v763_v33 = vmul.f32 %v8884_v25, %v9723_v34  ;;  %v1071_v34 = vld [vmem:[#allocation10 + $0x58] sm:$0xff] }
 0x1e9   : > { %8304 = vmatpush3.msra.mxu0 %v1074_v57  ;;  %v9764_v62 = vadd.f32 %v7766_v44, %v777_v60  ;;  %v764_v63 = vmul.f32 %v8886_v61, %v9729_v41 }
 0x1ea   : > { %8305 = vmatprep.subr.mxu0 %v1073_v59  ;;  %8249 = vmatmul.mubr.f32.gmra.mxu0 %v9761_v26  ;;  %v778_v1 = vmul.f32 %v7765_v39, %v763_v33 }
 0x1eb   : > { %v8888_v2 = vpop.eup %8887  ;;  %8293 = vmatmul.mubr.f32.gmra.mxu1 %v9761_v26  ;;  %8306 = vmatpush3.msra.mxu0 %v1073_v59  ;;  %v779_v3 = vmul.f32 %v7765_v39, %v764_v63 }
 0x1ec   : > { %8251 = vmatprep.mubr.f32.mxu0 %v9764_v62  ;;  %8295 = vmatprep.mubr.f32.mxu1 %v9764_v62  ;;  %v793_v4 = vadd.f32 %v7766_v44, %v778_v1  ;;  %v765_v5 = vmul.f32 %v8888_v2, %v9731_v42  ;;  %v1067_v42 = vld [vmem:[#allocation10 + $0x38] sm:$0xff] }
 0x1ed   : > { %8307 = vmatprep.subr.mxu0 %v1072_v0  ;;  %v794_v41 = vadd.f32 %v7766_v44, %v779_v3  ;;  %v7769_v2 = vld [vmem:[%s10997_s8] ss:$0 sm:$0xff] }
 0x1ee   : > { %8308 = vmatpush3.msra.mxu0 %v1072_v0  ;;  %v780_v6 = vmul.f32 %v7765_v39, %v765_v5 }
 0x1ef   : > { %8309 = vmatprep.subr.mxu0 %v1071_v34  ;;  %8252 = vmatmul.mubr.f32.gmra.mxu0 %v793_v4 }
 0x1f0   : > { %8296 = vmatmul.mubr.f32.gmra.mxu1 %v793_v4  ;;  %8310 = vmatpush3.msra.mxu0 %v1071_v34  ;;  %v795_v8 = vadd.f32 %v7766_v44, %v780_v6 }
 0x1f1   : > { %8254 = vmatprep.mubr.f32.mxu0 %v794_v41  ;;  %8298 = vmatprep.mubr.f32.mxu1 %v794_v41 }
 0x1f2   : > { %8311 = vmatprep.subr.mxu0 %v1070_v7 }
 0x1f3   : > { %8312 = vmatpush3.msra.mxu0 %v1070_v7 }
 0x1f4   : > { %8313 = vmatprep.subr.mxu0 %v1069_v9  ;;  %8255 = vmatmul.mubr.f32.gmra.mxu0 %v795_v8 }
 0x1f5   : > { %8299 = vmatmul.mubr.f32.gmra.mxu1 %v795_v8  ;;  %8314 = vmatpush3.msra.mxu0 %v1069_v9 }
 0x1f6   : > { %8315 = vmatprep.subr.mxu0 %v1068_v10  ;;  %8333 = vmatprep.mubr.f32.mxu0 %v9744_v48 }
 0x1f7   : > { %8316 = vmatpush3.msra.mxu0 %v1068_v10  ;;  %8347 = vmatprep.mubr.msk.f32.mxu1 %vm9378_vm0, %v11019_v20 }
 0x1f8   : > { %8317 = vmatprep.subr.mxu0 %v1067_v42 }
 0x1f9   : > { %8318 = vmatpush3.msra.mxu0 %v1067_v42 }
 0x1fa   : > { %8319 = vmatprep.subr.mxu0 %v1066_v11 }
 0x1fb   : > { %8320 = vmatpush3.msra.mxu0 %v1066_v11 }
 0x1fc   : > { %8321 = vmatprep.subr.mxu0 %v1065_v12 }
 0x1fd   : > { %8322 = vmatpush3.msra.mxu0 %v1065_v12 }
 0x1fe   : > { %8323 = vmatprep.subr.mxu0 %v1064_v13 }
 0x1ff   : > { %8324 = vmatpush3.msra.mxu0 %v1064_v13 }
 0x200   : > { %8325 = vmatprep.subr.mxu0 %v1063_v14 }
 0x201   : > { %8326 = vmatpush3.msra.mxu0 %v1063_v14 }
 0x202   : > { %8327 = vmatprep.subr.mxu0 %v1062_v15 }
 0x203   : > { %8328 = vmatpush3.msra.mxu0 %v1062_v15 }
 0x204   : > { %8329 = vmatprep.subr.mxu0 %v1061_v16 }
 0x205   : > { %8330 = vmatpush3.msra.mxu0 %v1061_v16 }
 0x206   : > { %8331 = vmatprep.subr.mxu0 %v1060_v19 }
 0x207   : > { %8332 = vmatpush3.msra.mxu0 %v1060_v19 }
 0x208   : > { %8334 = vmatmul.mubr.f32.vlgmr.msra.gmra.mxu0 %v9750_v17  ;;  %8385 = vmatprep.subr.mxu0 %v11019_v20 }
 0x209   : > { %8336 = vmatprep.mubr.f32.mxu0 %v9753_v56 }
 0x20c   : > { %8337 = vmatmul.mubr.f32.gmra.mxu0 %v9761_v26 }
 0x20d   : > { %8339 = vmatprep.mubr.f32.mxu0 %v9764_v62 }
 0x210   : > { %8340 = vmatmul.mubr.f32.gmra.mxu0 %v793_v4 }
 0x211   : > { %8342 = vmatprep.mubr.f32.mxu0 %v794_v41 }
 0x214   : > { %8343 = vmatmul.mubr.f32.gmra.mxu0 %v795_v8 }
 0x215   : > { %8387 = vmatprep.mubr.msk.f32.mxu0 %vm9378_vm0, %v11019_v20 }
 0x2a6   : > { %v8247_v22 = vpop.f32.mrf.mxu0  ;;  %v8291_v23 = vpop.f32.mrf.mxu1 }
 0x2a7   : > { %v9789_v24 = vadd.f32 %v8291_v23, %v9786_v21  ;;  %v891_v35 = vadd.f32 %v8247_v22, %v9794_v27 }
 0x2a8   : > { %v885_v28 = vpop.f32.mrf.mxu0  ;;  %v1021_v29 = vpop.f32.mrf.mxu1 }
 0x2a9   : > { %v886_v30 = vadd.f32 %v9794_v27, %v885_v28  ;;  %v9798_v31 = vadd.f32 %v9786_v21, %v1021_v29  ;;  %1254 = vrot.lane.b32.xlu1 %v9789_v24, %s9379_s9  ;;  %v9814_v40 = vmul.f32 0.17677669, %v891_v35 }
 0x2aa   : > { %v8250_v32 = vpop.f32.mrf.mxu0 }
 0x2ab   : > { %v9803_v36 = vmul.f32 0.17677669, %v886_v30  ;;  %v8294_v37 = vpop.f32.mrf.mxu1  ;;  %1252 = vrot.lane.b32.xlu0 %v9798_v31, %s9379_s9  ;;  %8346 = vmatpush3.xpose.msk.msra.mxu1 %vm1380_vm1, %v9798_v31  ;;  %v901_v47 = vadd.f32 %v8250_v32, %v9794_v27 }
 0x2ac   : > { %8350 = vmatprep.subr.mxu1 %v11019_v20  ;;  %v895_v38 = vpop.f32.mrf.mxu0  ;;  %v9842_v49 = vadd.f32 %v8294_v37, %v9786_v21 }
 0x2ad   : > { %1270 = vrot.lane.b32.xlu1 %v9789_v24, %s9380_s20  ;;  %v1031_v39 = vpop.f32.mrf.mxu1  ;;  %v896_v43 = vadd.f32 %v9794_v27, %v895_v38  ;;  %v9852_v52 = vmul.f32 0.17677669, %v901_v47 }
 0x2ae   : > { %8348 = vmatmul.mubr.msk.f32.vlgmr.msra.gmra.mxu1 %vm1380_vm1, %v9803_v36  ;;  %v9825_v44 = vadd.f32 %v9786_v21, %v1031_v39 }
 0x2af   : > { %1268 = vrot.lane.b32.xlu0 %v9798_v31, %s9380_s20  ;;  %8351 = vmatpush3.xpose.msk.msra.mxu1 %vm1380_vm1, %v9789_v24  ;;  %v8253_v45 = vpop.f32.mrf.mxu0  ;;  %v9836_v48 = vmul.f32 0.17677669, %v896_v43 }
 0x2b0   : > { %8352 = vmatprep.mubr.msk.f32.mxu1 %vm9378_vm0, %v11019_v20  ;;  %8355 = vmatprep.subr.mxu1 %v11019_v20  ;;  %v8297_v46 = vpop.f32.mrf.mxu1  ;;  %v911_v56 = vadd.f32 %v8253_v45, %v9794_v27 }
 0x2b1   : > { %1198 = vrot.lane.b32.xlu1 %v9814_v40, %s9379_s9  ;;  %v905_v50 = vpop.f32.mrf.mxu0  ;;  %v1047_v58 = vadd.f32 %v8297_v46, %v9786_v21 }
 0x2b2   : > { %8353 = vmatmul.mubr.msk.f32.vlgmr.msra.gmra.mxu1 %vm1380_vm1, %v9814_v40  ;;  %v1041_v51 = vpop.f32.mrf.mxu1  ;;  %v906_v53 = vadd.f32 %v9794_v27, %v905_v50  ;;  %v929_v59 = vmul.f32 0.17677669, %v911_v56 }
 0x2b3   : > { %1212 = vrot.lane.b32.xlu0 %v9803_v36, %s9380_s20  ;;  %8356 = vmatpush3.xpose.msk.msra.mxu1 %vm1380_vm1, %v9825_v44  ;;  %v9859_v54 = vadd.f32 %v9786_v21, %v1041_v51 }
 0x2b4   : > { %8357 = vmatprep.mubr.msk.f32.mxu1 %vm9378_vm0, %v11019_v20  ;;  %8360 = vmatprep.subr.mxu1 %v11019_v20  ;;  %v8256_v17 = vpop.f32.mrf.mxu0  ;;  %v928_v57 = vmul.f32 0.17677669, %v906_v53 }
 0x2b5   : > { %1214 = vrot.lane.b32.xlu1 %v9814_v40, %s9380_s20  ;;  %v8300_v55 = vpop.f32.mrf.mxu1  ;;  %v921_v26 = vadd.f32 %v8256_v17, %v9794_v27 }
 0x2b6   : > { %8358 = vmatmul.mubr.msk.f32.vlgmr.msra.gmra.mxu1 %vm1380_vm1, %v9836_v48  ;;  %v915_v18 = vpop.f32.mrf.mxu0  ;;  %v1057_v62 = vadd.f32 %v8300_v55, %v9786_v21 }
 0x2b7   : > { %1256 = vrot.lane.b32.xlu0 %v9825_v44, %s9379_s9  ;;  %8361 = vmatpush3.xpose.msk.msra.mxu1 %vm1380_vm1, %v9842_v49  ;;  %v1051_v25 = vpop.f32.mrf.mxu1  ;;  %v916_v60 = vadd.f32 %v9794_v27, %v915_v18  ;;  %v931_v63 = vmul.f32 0.17677669, %v921_v26 }
 0x2b8   : > { %8362 = vmatprep.mubr.msk.f32.mxu1 %vm9378_vm0, %v11019_v20  ;;  %8365 = vmatprep.subr.mxu1 %v11019_v20  ;;  %v1052_v61 = vadd.f32 %v9786_v21, %v1051_v25 }
 0x2b9   : > { %1196 = vrot.lane.b32.xlu1 %v9803_v36, %s9379_s9  ;;  %v930_v33 = vmul.f32 0.17677669, %v916_v60 }
 0x2ba   : > { %8363 = vmatmul.mubr.msk.f32.vlgmr.msra.gmra.mxu1 %vm1380_vm1, %v9852_v52 }
 0x2bb   : > { %1272 = vrot.lane.b32.xlu0 %v9825_v44, %s9380_s20  ;;  %8366 = vmatpush3.xpose.msk.msra.mxu1 %vm1380_vm1, %v9859_v54 }
 0x2bc   : > { %8367 = vmatprep.mubr.msk.f32.mxu1 %vm9378_vm0, %v11019_v20  ;;  %8370 = vmatprep.subr.mxu1 %v11019_v20 }
 0x2bd   : > { %1258 = vrot.lane.b32.xlu1 %v9842_v49, %s9379_s9 }
 0x2be   : > { %8368 = vmatmul.mubr.msk.f32.vlgmr.msra.gmra.mxu1 %vm1380_vm1, %v928_v57 }
 0x2bf   : > { %1200 = vrot.lane.b32.xlu0 %v9836_v48, %s9379_s9  ;;  %8371 = vmatpush3.xpose.msk.msra.mxu1 %vm1380_vm1, %v1047_v58 }
 0x2c0   : > { %8372 = vmatprep.mubr.msk.f32.mxu1 %vm9378_vm0, %v11019_v20  ;;  %8375 = vmatprep.subr.mxu1 %v11019_v20 }
 0x2c1   : > { %1274 = vrot.lane.b32.xlu1 %v9842_v49, %s9380_s20 }
 0x2c2   : > { %8373 = vmatmul.mubr.msk.f32.vlgmr.msra.gmra.mxu1 %vm1380_vm1, %v929_v59 }
 0x2c3   : > { %1216 = vrot.lane.b32.xlu0 %v9836_v48, %s9380_s20  ;;  %8376 = vmatpush3.xpose.msk.msra.mxu1 %vm1380_vm1, %v1052_v61 }
 0x2c4   : > { %8377 = vmatprep.mubr.msk.f32.mxu1 %vm9378_vm0, %v11019_v20  ;;  %8380 = vmatprep.subr.mxu1 %v11019_v20 }
 0x2c5   : > { %1202 = vrot.lane.b32.xlu1 %v9852_v52, %s9379_s9 }
 0x2c6   : > { %8378 = vmatmul.mubr.msk.f32.vlgmr.msra.gmra.mxu1 %vm1380_vm1, %v930_v33 }
 0x2c7   : > { %1260 = vrot.lane.b32.xlu0 %v9859_v54, %s9379_s9  ;;  %8381 = vmatpush3.xpose.msk.msra.mxu1 %vm1380_vm1, %v1057_v62 }
 0x2c8   : > { %8382 = vmatprep.mubr.msk.f32.mxu1 %vm9378_vm0, %v11019_v20  ;;  %8390 = vmatprep.subr.mxu1 %v11019_v20  ;;  %v8335_v0 = vpop.f32.mrf.mxu0 }
 0x2c9   : > { %1218 = vrot.lane.b32.xlu1 %v9852_v52, %s9380_s20  ;;  %v9958_v4 = vadd.f32 %v8335_v0, %v7769_v2 }
 0x2ca   : > { %8383 = vmatmul.mubr.msk.f32.vlgmr.msra.gmra.mxu1 %vm1380_vm1, %v931_v63  ;;  %v1149_v1 = vpop.f32.mrf.mxu0 }
 0x2cb   : > { %1276 = vrot.lane.b32.xlu0 %v9859_v54, %s9380_s20  ;;  %8392 = vmatprep.mubr.msk.f32.mxu1 %vm9378_vm0, %v11019_v20  ;;  %v9952_v3 = vadd.f32 %v7769_v2, %v1149_v1 }
 0x2cc   : > { %v8338_v34 = vpop.f32.mrf.mxu0 }
 0x2cd   : > { %1262 = vrot.lane.b32.xlu1 %v1047_v58, %s9379_s9  ;;  %v9974_v7 = vadd.f32 %v8338_v34, %v7769_v2 }
 0x2ce   : > { %v1159_v5 = vpop.f32.mrf.mxu0 }
 0x2cf   : > { %1204 = vrot.lane.b32.xlu0 %v928_v57, %s9379_s9  ;;  %v9966_v41 = vadd.f32 %v7769_v2, %v1159_v5 }
 0x2d0   : > { %v8341_v6 = vpop.f32.mrf.mxu0 }
 0x2d1   : > { %1278 = vrot.lane.b32.xlu1 %v1047_v58, %s9380_s20  ;;  %v9996_v15 = vadd.f32 %v8341_v6, %v7769_v2 }
 0x2d2   : > { %v1169_v8 = vpop.f32.mrf.mxu0 }
 0x2d3   : > { %1264 = vrot.lane.b32.xlu0 %v1052_v61, %s9379_s9  ;;  %v9983_v10 = vadd.f32 %v7769_v2, %v1169_v8 }
 0x2d4   : > { %v8344_v11 = vpop.f32.mrf.mxu0 }
 0x2d5   : > { %1206 = vrot.lane.b32.xlu1 %v929_v59, %s9379_s9 }
 0x2d6   : > { %v1179_v14 = vpop.f32.mrf.mxu0 }
 0x2d7   : > { %1208 = vrot.lane.b32.xlu0 %v930_v33, %s9379_s9  ;;  %v10001_v19 = vadd.f32 %v7769_v2, %v1179_v14 }
 0x2d9   : > { %1266 = vrot.lane.b32.xlu1 %v1057_v62, %s9379_s9 }
 0x2db   : > { %1220 = vrot.lane.b32.xlu0 %v928_v57, %s9380_s20 }
 0x2dd   : > { %1210 = vrot.lane.b32.xlu1 %v931_v63, %s9379_s9 }
 0x2df   : > { %1280 = vrot.lane.b32.xlu0 %v1052_v61, %s9380_s20 }
 0x2e1   : > { %1222 = vrot.lane.b32.xlu1 %v929_v59, %s9380_s20 }
 0x2e3   : > { %1284 = vrot.lane.b32.xlu0 %v9798_v31, %s9381_s18 }
 0x2e5   : > { %1282 = vrot.lane.b32.xlu1 %v1057_v62, %s9380_s20 }
 0x2e7   : > { %1224 = vrot.lane.b32.xlu0 %v930_v33, %s9380_s20 }
 0x2e9   : > { %1226 = vrot.lane.b32.xlu1 %v931_v63, %s9380_s20 }
 0x2eb   : > { %1228 = vrot.lane.b32.xlu0 %v9803_v36, %s9381_s18 }
 0x2ed   : > { %1286 = vrot.lane.b32.xlu1 %v9789_v24, %s9381_s18  ;;  %v10013_v24 = vadd.f32 %v8344_v11, %v7769_v2 }
 0x2ef   : > { %1288 = vrot.lane.b32.xlu0 %v9825_v44, %s9381_s18 }
 0x2f1   : > { %1230 = vrot.lane.b32.xlu1 %v9814_v40, %s9381_s18 }
 0x2f3   : > { %1232 = vrot.lane.b32.xlu0 %v9836_v48, %s9381_s18 }
 0x2f5   : > { %1290 = vrot.lane.b32.xlu1 %v9842_v49, %s9381_s18 }
 0x2f7   : > { %1292 = vrot.lane.b32.xlu0 %v9859_v54, %s9381_s18 }
 0x2f9   : > { %1234 = vrot.lane.b32.xlu1 %v9852_v52, %s9381_s18 }
 0x2fb   : > { %1236 = vrot.lane.b32.xlu0 %v928_v57, %s9381_s18 }
 0x2fd   : > { %1294 = vrot.lane.b32.xlu1 %v1047_v58, %s9381_s18 }
 0x2ff   : > { %1296 = vrot.lane.b32.xlu0 %v1052_v61, %s9381_s18 }
 0x301   : > { %1238 = vrot.lane.b32.xlu1 %v929_v59, %s9381_s18 }
 0x303   : > { %1240 = vrot.lane.b32.xlu0 %v930_v33, %s9381_s18 }
 0x305   : > { %1298 = vrot.lane.b32.xlu1 %v1057_v62, %s9381_s18 }
 0x307   : > { %1308 = vrot.lane.b32.xlu0 %v9952_v3, %s9379_s9 }
 0x309   : > { %1242 = vrot.lane.b32.xlu1 %v931_v63, %s9381_s18 }
 0x30b   : > { %1332 = vrot.lane.b32.xlu0 %v9952_v3, %s9380_s20 }
 0x30d   : > { %1310 = vrot.lane.b32.xlu1 %v9958_v4, %s9379_s9 }
 0x30f   : > { %1356 = vrot.lane.b32.xlu0 %v9952_v3, %s9381_s18 }
 0x311   : > { %1334 = vrot.lane.b32.xlu1 %v9958_v4, %s9380_s20 }
 0x313   : > { %1312 = vrot.lane.b32.xlu0 %v9966_v41, %s9379_s9 }
 0x315   : > { %1358 = vrot.lane.b32.xlu1 %v9958_v4, %s9381_s18 }
 0x317   : > { %1336 = vrot.lane.b32.xlu0 %v9966_v41, %s9380_s20 }
 0x319   : > { %1314 = vrot.lane.b32.xlu1 %v9974_v7, %s9379_s9 }
 0x31b   : > { %v1255_v9 = vpop.permute.xlu1 %1254  ;;  %1360 = vrot.lane.b32.xlu0 %v9966_v41, %s9381_s18 }
 0x31c   : > { %8391 = vmatpush3.xpose.msk.msra.mxu1 %vm1380_vm1, %v1255_v9 }
 0x31d   : > { %1338 = vrot.lane.b32.xlu1 %v9974_v7, %s9380_s20  ;;  %v1253_v42 = vpop.permute.xlu0 %1252  ;;  %8400 = vmatprep.subr.mxu1 %v11019_v20 }
 0x31e   : > { %8386 = vmatpush3.xpose.msk.msra.mxu0 %vm1380_vm1, %v1253_v42 }
 0x31f   : > { %v9989_v12 = vpop.permute.xlu1 %1270  ;;  %1316 = vrot.lane.b32.xlu0 %v9983_v10, %s9379_s9  ;;  %8395 = vmatprep.subr.mxu0 %v11019_v20 }
 0x321   : > { %1362 = vrot.lane.b32.xlu1 %v9974_v7, %s9381_s18  ;;  %v1269_v13 = vpop.permute.xlu0 %1268 }
 0x323   : > { %v1199_v16 = vpop.permute.xlu1 %1198  ;;  %1340 = vrot.lane.b32.xlu0 %v9983_v10, %s9380_s20 }
 0x324   : > { %8393 = vmatmul.mubr.msk.f32.vlgmr.msra.gmra.mxu1 %vm1380_vm1, %v1199_v16 }
 0x325   : > { %1318 = vrot.lane.b32.xlu1 %v9996_v15, %s9379_s9  ;;  %v1213_v21 = vpop.permute.xlu0 %1212  ;;  %8402 = vmatprep.mubr.msk.f32.mxu1 %vm9378_vm0, %v11019_v20 }
 0x327   : > { %v10007_v22 = vpop.permute.xlu1 %1214  ;;  %1344 = vrot.lane.b32.xlu0 %v10001_v19, %s9380_s20 }
 0x329   : > { %1342 = vrot.lane.b32.xlu1 %v9996_v15, %s9380_s20  ;;  %v1257_v23 = vpop.permute.xlu0 %1256 }
 0x32b   : > { %v1197_v27 = vpop.permute.xlu1 %1196 }
 0x32c   : > { %8388 = vmatmul.mubr.msk.f32.vlgmr.msra.gmra.mxu0 %vm1380_vm1, %v1197_v27 }
 0x32d   : > { %8396 = vmatpush3.xpose.msk.msra.mxu0 %vm1380_vm1, %v1257_v23  ;;  %1322 = vrot.lane.b32.xlu1 %v10013_v24, %s9379_s9  ;;  %v1273_v28 = vpop.permute.xlu0 %1272 }
 0x32e   : > { %8397 = vmatprep.mubr.msk.f32.mxu0 %vm9378_vm0, %v11019_v20  ;;  %8405 = vmatprep.subr.mxu0 %v11019_v20 }
 0x32f   : > { %v1259_v29 = vpop.permute.xlu1 %1258 }
 0x330   : > { %8401 = vmatpush3.xpose.msk.msra.mxu1 %vm1380_vm1, %v1259_v29 }
 0x331   : > { %1346 = vrot.lane.b32.xlu1 %v10013_v24, %s9380_s20  ;;  %v1201_v30 = vpop.permute.xlu0 %1200  ;;  %8410 = vmatprep.subr.mxu1 %v11019_v20  ;;  %s10922_s20 = scalar_lea.vmem [#allocation16], %s7756_s22  ;;  %s7908_s22 = sshll.u32 %s9496_s0, 10 }
 0x332   : > { %8398 = vmatmul.mubr.msk.f32.vlgmr.msra.gmra.mxu0 %vm1380_vm1, %v1201_v30  ;;  %s10942_s5 = scalar_lea.hbm %s11078_s23, %s7908_s22  ;;  %s9382_s0 = smov [#allocation16]  }
 0x333   : > { %v1275_v31 = vpop.permute.xlu1 %1274  ;;  %8407 = vmatprep.mubr.msk.f32.mxu0 %vm9378_vm0, %v11019_v20  ;;  %s9287_s15 = sshll.u32 %s9382_s0, 4  ;;  %s9288_s15 = int_to_ptr.vmem [resolvable:$false] %s9287_s15 }
 0x334   : > { %s9289_s30 = scalar_lea.vmem %s9288_s15, 2048 }
 0x335   : > { %1320 = vrot.lane.b32.xlu1 %v10001_v19, %s9379_s9  ;;  %v1217_v32 = vpop.permute.xlu0 %1216 }
 0x337   : > { %v1203_v35 = vpop.permute.xlu1 %1202 }
 0x338   : > { %8403 = vmatmul.mubr.msk.f32.vlgmr.msra.gmra.mxu1 %vm1380_vm1, %v1203_v35 }
 0x339   : > { %v1261_v36 = vpop.permute.xlu0 %1260  ;;  %8412 = vmatprep.mubr.msk.f32.mxu1 %vm9378_vm0, %v11019_v20 }
 0x33a   : > { %8406 = vmatpush3.xpose.msk.msra.mxu0 %vm1380_vm1, %v1261_v36 }
 0x33b   : > { %v1219_v37 = vpop.permute.xlu1 %1218  ;;  %8415 = vmatprep.subr.mxu0 %v11019_v20 }
 0x33d   : > { %v1277_v38 = vpop.permute.xlu0 %1276 }
 0x33f   : > { %v1263_v39 = vpop.permute.xlu1 %1262 }
 0x340   : > { %8411 = vmatpush3.xpose.msk.msra.mxu1 %vm1380_vm1, %v1263_v39 }
 0x341   : > { %v1205_v40 = vpop.permute.xlu0 %1204  ;;  %8420 = vmatprep.subr.mxu1 %v11019_v20 }
 0x342   : > { %8408 = vmatmul.mubr.msk.f32.vlgmr.msra.gmra.mxu0 %vm1380_vm1, %v1205_v40 }
 0x343   : > { %v1279_v43 = vpop.permute.xlu1 %1278  ;;  %8417 = vmatprep.mubr.msk.f32.mxu0 %vm9378_vm0, %v11019_v20 }
 0x345   : > { %v1265_v44 = vpop.permute.xlu0 %1264 }
 0x346   : > { %8416 = vmatpush3.xpose.msk.msra.mxu0 %vm1380_vm1, %v1265_v44 }
 0x347   : > { %v1207_v45 = vpop.permute.xlu1 %1206  ;;  %8425 = vmatprep.subr.mxu0 %v11019_v20 }
 0x348   : > { %8413 = vmatmul.mubr.msk.f32.vlgmr.msra.gmra.mxu1 %vm1380_vm1, %v1207_v45 }
 0x349   : > { %v1209_v46 = vpop.permute.xlu0 %1208  ;;  %8422 = vmatprep.mubr.msk.f32.mxu1 %vm9378_vm0, %v11019_v20 }
 0x34a   : > { %8418 = vmatmul.mubr.msk.f32.vlgmr.msra.gmra.mxu0 %vm1380_vm1, %v1209_v46 }
 0x34b   : > { %8426 = vmatpush3.xpose.msk.msra.mxu0 %vm1380_vm1, %v1269_v13  ;;  %v1267_v47 = vpop.permute.xlu1 %1266  ;;  %8427 = vmatprep.mubr.msk.f32.mxu0 %vm9378_vm0, %v11019_v20 }
 0x34c   : > { %8421 = vmatpush3.xpose.msk.msra.mxu1 %vm1380_vm1, %v1267_v47  ;;  %8435 = vmatprep.subr.mxu0 %v11019_v20 }
 0x34d   : > { %v1221_v48 = vpop.permute.xlu0 %1220  ;;  %8430 = vmatprep.subr.mxu1 %v11019_v20 }
 0x34e   : > { %8428 = vmatmul.mubr.msk.f32.vlgmr.msra.gmra.mxu0 %vm1380_vm1, %v1213_v21 }
 0x34f   : > { %8436 = vmatpush3.xpose.msk.msra.mxu0 %vm1380_vm1, %v1273_v28  ;;  %v1211_v49 = vpop.permute.xlu1 %1210  ;;  %8437 = vmatprep.mubr.msk.f32.mxu0 %vm9378_vm0, %v11019_v20 }
 0x350   : > { %8423 = vmatmul.mubr.msk.f32.vlgmr.msra.gmra.mxu1 %vm1380_vm1, %v1211_v49  ;;  %8445 = vmatprep.subr.mxu0 %v11019_v20 }
 0x351   : > { %8431 = vmatpush3.xpose.msk.msra.mxu1 %vm1380_vm1, %v9989_v12  ;;  %v1281_v50 = vpop.permute.xlu0 %1280  ;;  %8432 = vmatprep.mubr.msk.f32.mxu1 %vm9378_vm0, %v11019_v20 }
 0x352   : > { %8438 = vmatmul.mubr.msk.f32.vlgmr.msra.gmra.mxu0 %vm1380_vm1, %v1217_v32  ;;  %8440 = vmatprep.subr.mxu1 %v11019_v20 }
 0x353   : > { %8446 = vmatpush3.xpose.msk.msra.mxu0 %vm1380_vm1, %v1277_v38  ;;  %v1223_v51 = vpop.permute.xlu1 %1222  ;;  %8447 = vmatprep.mubr.msk.f32.mxu0 %vm9378_vm0, %v11019_v20 }
 0x354   : > { %8433 = vmatmul.mubr.msk.f32.vlgmr.msra.gmra.mxu1 %vm1380_vm1, %v10007_v22  ;;  %8455 = vmatprep.subr.mxu0 %v11019_v20 }
 0x355   : > { %8441 = vmatpush3.xpose.msk.msra.mxu1 %vm1380_vm1, %v1275_v31  ;;  %v1285_v52 = vpop.permute.xlu0 %1284  ;;  %8442 = vmatprep.mubr.msk.f32.mxu1 %vm9378_vm0, %v11019_v20 }
 0x356   : > { %8448 = vmatmul.mubr.msk.f32.vlgmr.msra.gmra.mxu0 %vm1380_vm1, %v1221_v48  ;;  %8450 = vmatprep.subr.mxu1 %v11019_v20 }
 0x357   : > { %8456 = vmatpush3.xpose.msk.msra.mxu0 %vm1380_vm1, %v1281_v50  ;;  %v1283_v53 = vpop.permute.xlu1 %1282  ;;  %8457 = vmatprep.mubr.msk.f32.mxu0 %vm9378_vm0, %v11019_v20 }
 0x358   : > { %8443 = vmatmul.mubr.msk.f32.vlgmr.msra.gmra.mxu1 %vm1380_vm1, %v1219_v37  ;;  %8465 = vmatprep.subr.mxu0 %v11019_v20 }
 0x359   : > { %8451 = vmatpush3.xpose.msk.msra.mxu1 %vm1380_vm1, %v1279_v43  ;;  %v1225_v54 = vpop.permute.xlu0 %1224  ;;  %8452 = vmatprep.mubr.msk.f32.mxu1 %vm9378_vm0, %v11019_v20 }
 0x35a   : > { %8458 = vmatmul.mubr.msk.f32.vlgmr.msra.gmra.mxu0 %vm1380_vm1, %v1225_v54  ;;  %8460 = vmatprep.subr.mxu1 %v11019_v20 }
 0x35b   : > { %8466 = vmatpush3.xpose.msk.msra.mxu0 %vm1380_vm1, %v1285_v52  ;;  %v1227_v17 = vpop.permute.xlu1 %1226  ;;  %8467 = vmatprep.mubr.msk.f32.mxu0 %vm9378_vm0, %v11019_v20 }
 0x35c   : > { %8453 = vmatmul.mubr.msk.f32.vlgmr.msra.gmra.mxu1 %vm1380_vm1, %v1223_v51  ;;  %8475 = vmatprep.subr.mxu0 %v11019_v20 }
 0x35d   : > { %8461 = vmatpush3.xpose.msk.msra.mxu1 %vm1380_vm1, %v1283_v53  ;;  %v1229_v55 = vpop.permute.xlu0 %1228  ;;  %8462 = vmatprep.mubr.msk.f32.mxu1 %vm9378_vm0, %v11019_v20 }
 0x35e   : > { %8468 = vmatmul.mubr.msk.f32.vlgmr.msra.gmra.mxu0 %vm1380_vm1, %v1229_v55  ;;  %8470 = vmatprep.subr.mxu1 %v11019_v20 }
 0x35f   : > { %v1287_v56 = vpop.permute.xlu1 %1286  ;;  %8477 = vmatprep.mubr.msk.f32.mxu0 %vm9378_vm0, %v11019_v20 }
 0x360   : > { %8463 = vmatmul.mubr.msk.f32.vlgmr.msra.gmra.mxu1 %vm1380_vm1, %v1227_v17 }
 0x361   : > { %8471 = vmatpush3.xpose.msk.msra.mxu1 %vm1380_vm1, %v1287_v56  ;;  %v1289_v57 = vpop.permute.xlu0 %1288  ;;  %8472 = vmatprep.mubr.msk.f32.mxu1 %vm9378_vm0, %v11019_v20 }
 0x362   : > { %8476 = vmatpush3.xpose.msk.msra.mxu0 %vm1380_vm1, %v1289_v57  ;;  %8480 = vmatprep.subr.mxu1 %v11019_v20 }
 0x363   : > { %v1231_v58 = vpop.permute.xlu1 %1230  ;;  %8485 = vmatprep.subr.mxu0 %v11019_v20 }
 0x364   : > { %8473 = vmatmul.mubr.msk.f32.vlgmr.msra.gmra.mxu1 %vm1380_vm1, %v1231_v58 }
 0x365   : > { %v1233_v18 = vpop.permute.xlu0 %1232  ;;  %8482 = vmatprep.mubr.msk.f32.mxu1 %vm9378_vm0, %v11019_v20 }
 0x366   : > { %8478 = vmatmul.mubr.msk.f32.vlgmr.msra.gmra.mxu0 %vm1380_vm1, %v1233_v18 }
 0x367   : > { %v1291_v25 = vpop.permute.xlu1 %1290  ;;  %8487 = vmatprep.mubr.msk.f32.mxu0 %vm9378_vm0, %v11019_v20 }
 0x368   : > { %8481 = vmatpush3.xpose.msk.msra.mxu1 %vm1380_vm1, %v1291_v25 }
 0x369   : > { %v1293_v59 = vpop.permute.xlu0 %1292  ;;  %8490 = vmatprep.subr.mxu1 %v11019_v20 }
 0x36a   : > { %8486 = vmatpush3.xpose.msk.msra.mxu0 %vm1380_vm1, %v1293_v59 }
 0x36b   : > { %v1235_v60 = vpop.permute.xlu1 %1234  ;;  %8495 = vmatprep.subr.mxu0 %v11019_v20 }
 0x36c   : > { %8483 = vmatmul.mubr.msk.f32.vlgmr.msra.gmra.mxu1 %vm1380_vm1, %v1235_v60 }
 0x36d   : > { %v1237_v61 = vpop.permute.xlu0 %1236  ;;  %8492 = vmatprep.mubr.msk.f32.mxu1 %vm9378_vm0, %v11019_v20 }
 0x36e   : > { %v10118_v26 = vpop.f32.mrf.mxu1  ;;  %8488 = vmatmul.mubr.msk.f32.vlgmr.msra.gmra.mxu0 %vm1380_vm1, %v1237_v61 }
 0x36f   : > { %v1295_v33 = vpop.permute.xlu1 %1294  ;;  %v3750_v62 = vsel %vm3749_vm2, %v10118_v26, -inf  ;;  %8497 = vmatprep.mubr.msk.f32.mxu0 %vm9378_vm0, %v11019_v20 }
 0x370   : > { %v8349_v63 = vpop.f32.mrf.mxu1  ;;  %3751 = vmax.xlane.f32.xlu0 %v3750_v62  ;;  %8491 = vmatpush3.xpose.msk.msra.mxu1 %vm1380_vm1, %v1295_v33 }
 0x371   : > { %v1297_v0 = vpop.permute.xlu0 %1296  ;;  %8500 = vmatprep.subr.mxu1 %v11019_v20 }
 0x372   : > { %v10127_v1 = vpop.f32.mrf.mxu1  ;;  %8496 = vmatpush3.xpose.msk.msra.mxu0 %vm1380_vm1, %v1297_v0 }
 0x373   : > { %v1239_v2 = vpop.permute.xlu1 %1238  ;;  %v3753_v34 = vsel %vm3749_vm2, %v10127_v1, -inf  ;;  %8505 = vmatprep.subr.mxu0 %v11019_v20 }
 0x374   : > { %v8354_v5 = vpop.f32.mrf.mxu1  ;;  %3754 = vmax.xlane.f32.xlu1 %v3753_v34  ;;  %8493 = vmatmul.mubr.msk.f32.vlgmr.msra.gmra.mxu1 %vm1380_vm1, %v1239_v2 }
 0x375   : > { %v1241_v6 = vpop.permute.xlu0 %1240  ;;  %8502 = vmatprep.mubr.msk.f32.mxu1 %vm9378_vm0, %v11019_v20 }
 0x376   : > { %v10136_v8 = vpop.f32.mrf.mxu1  ;;  %8498 = vmatmul.mubr.msk.f32.vlgmr.msra.gmra.mxu0 %vm1380_vm1, %v1241_v6 }
 0x377   : > { %8506 = vmatpush3.msra.mxu0 %v9952_v3  ;;  %v1299_v9 = vpop.permute.xlu1 %1298  ;;  %v3756_v42 = vsel %vm3749_vm2, %v10136_v8, -inf  ;;  %8507 = vmatprep.mubr.msk.f32.mxu0 %vm9378_vm0, %v11019_v20 }
 0x378   : > { %v8359_v11 = vpop.f32.mrf.mxu1  ;;  %3757 = vmax.xlane.f32.xlu0 %v3756_v42  ;;  %8501 = vmatpush3.xpose.msk.msra.mxu1 %vm1380_vm1, %v1299_v9 }
 0x379   : > { %8510 = vmatprep.subr.mxu1 %v11019_v20  ;;  %8515 = vmatprep.subr.mxu0 %v11019_v20  ;;  %v10172_v36 = vpop.permute.xlu0 %1308 }
 0x37a   : > { %v10147_v12 = vpop.f32.mrf.mxu1 }
 0x37b   : > { %v1243_v13 = vpop.permute.xlu1 %1242  ;;  %v3759_v3 = vsel %vm3749_vm2, %v10147_v12, -inf }
 0x37c   : > { %v8364_v14 = vpop.f32.mrf.mxu1  ;;  %3760 = vmax.xlane.f32.xlu0 %v3759_v3  ;;  %8503 = vmatmul.mubr.msk.f32.vlgmr.msra.gmra.mxu1 %vm1380_vm1, %v1243_v13 }
 0x37d   : > { %8511 = vmatpush3.msra.mxu1 %v9958_v4  ;;  %8512 = vmatprep.mubr.msk.f32.mxu1 %vm9378_vm0, %v11019_v20  ;;  %v10176_v38 = vpop.permute.xlu0 %1332 }
 0x37e   : > { %v10155_v16 = vpop.f32.mrf.mxu1  ;;  %8520 = vmatprep.subr.mxu1 %v11019_v20 }
 0x37f   : > { %v3762_v21 = vsel %vm3749_vm2, %v10155_v16, -inf  ;;  %v10178_v39 = vpop.permute.xlu1 %1310 }
 0x380   : > { %v8369_v22 = vpop.f32.mrf.mxu1  ;;  %3763 = vmax.xlane.f32.xlu0 %v3762_v21 }
 0x381   : > { %v10182_v44 = vpop.permute.xlu0 %1356 }
 0x382   : > { %v10160_v23 = vpop.f32.mrf.mxu1  ;;  %11063 = vst [vmem:[#allocation26_spill] sm:$0xff] %v10182_v44 }
 0x383   : > { %v3765_v27 = vsel %vm3749_vm2, %v10160_v23, -inf  ;;  %v10184_v45 = vpop.permute.xlu1 %1334 }
 0x384   : > { %v8374_v28 = vpop.f32.mrf.mxu1  ;;  %3766 = vmax.xlane.f32.xlu1 %v3765_v27 }
 0x385   : > { %v10190_v49 = vpop.permute.xlu0 %1312 }
 0x386   : > { %v10164_v4 = vpop.f32.mrf.mxu1 }
 0x387   : > { %v3768_v29 = vsel %vm3749_vm2, %v10164_v4, -inf  ;;  %v10192_v50 = vpop.permute.xlu1 %1358 }
 0x388   : > { %3769 = vmax.xlane.f32.xlu0 %v3768_v29  ;;  %v8379_v30 = vpop.f32.mrf.mxu1  ;;  %11064 = vst [vmem:[#allocation27_spill] sm:$0xff] %v10192_v50 }
 0x389   : > { %v10198_v54 = vpop.permute.xlu0 %1336 }
 0x38a   : > { %v10168_v31 = vpop.f32.mrf.mxu1 }
 0x38b   : > { %v3771_v32 = vsel %vm3749_vm2, %v10168_v31, -inf  ;;  %v10200_v17 = vpop.permute.xlu1 %1314 }
 0x38c   : > { %3772 = vmax.xlane.f32.xlu1 %v3771_v32  ;;  %v8384_v35 = vpop.f32.mrf.mxu1 }
 0x38d   : > { %v10206_v58 = vpop.permute.xlu0 %1360 }
 0x38e   : > { %11065 = vst [vmem:[#allocation28_spill] sm:$0xff] %v10206_v58 }
 0x38f   : > { %v10208_v18 = vpop.permute.xlu1 %1338 }
 0x391   : > { %v10212_v59 = vpop.permute.xlu0 %1316 }
 0x393   : > { %v10214_v60 = vpop.permute.xlu1 %1362 }
 0x394   : > { %11066 = vst [vmem:[#allocation29_spill] sm:$0xff] %v10214_v60 }
 0x395   : > { %v10220_v63 = vpop.permute.xlu0 %1340 }
 0x397   : > { %v10222_v0 = vpop.permute.xlu1 %1318 }
 0x399   : > { %v10232_v11 = vpop.permute.xlu0 %1344 }
 0x39b   : > { %v10234_v13 = vpop.permute.xlu1 %1342 }
 0x39c   : > { %11067 = vst [vmem:[#allocation30_spill] sm:$0xff] %v10234_v13 }
 0x3e4   : > { %v10174_v37 = vpop.f32.mrf.mxu1 }
 0x3e5   : > { %v3777_v40 = vsel %vm3749_vm2, %v10174_v37, -inf }
 0x3e6   : > { %3778 = vmax.xlane.f32.xlu1 %v3777_v40  ;;  %v8394_v43 = vpop.f32.mrf.mxu1  ;;  %v10248_v40 = vpop.permute.xlu1 %1322 }
 0x3ec   : > { %v10186_v46 = vpop.f32.mrf.mxu0 }
 0x3ed   : > { %v3774_v47 = vsel %vm3749_vm2, %v10186_v46, -inf }
 0x3ee   : > { %3775 = vmax.xlane.f32.xlu0 %v3774_v47  ;;  %v8389_v48 = vpop.f32.mrf.mxu0 }
 0x3f2   : > { %v10194_v51 = vpop.f32.mrf.mxu0 }
 0x3f3   : > { %v3780_v52 = vsel %vm3749_vm2, %v10194_v51, -inf }
 0x3f4   : > { %3781 = vmax.xlane.f32.xlu0 %v3780_v52  ;;  %v8399_v53 = vpop.f32.mrf.mxu0 }
 0x3f8   : > { %v10202_v55 = vpop.f32.mrf.mxu1 }
 0x3f9   : > { %v3783_v56 = vsel %vm3749_vm2, %v10202_v55, -inf  ;;  %v3752_v29 = vpop.xlane.xlu0 %3751 }
 0x3fa   : > { %3784 = vmax.xlane.f32.xlu1 %v3783_v56  ;;  %v8404_v57 = vpop.f32.mrf.mxu1 }
 0x401   : > { %v3758_v52 = vpop.xlane.xlu0 %3757 }
 0x402   : > { %v10210_v25 = vpop.f32.mrf.mxu0 }
 0x403   : > { %v3786_v61 = vsel %vm3749_vm2, %v10210_v25, -inf }
 0x404   : > { %3787 = vmax.xlane.f32.xlu0 %v3786_v61  ;;  %v8409_v33 = vpop.f32.mrf.mxu0 }
 0x408   : > { %v10218_v62 = vpop.f32.mrf.mxu1 }
 0x409   : > { %v3789_v2 = vsel %vm3749_vm2, %v10218_v62, -inf }
 0x40a   : > { %3790 = vmax.xlane.f32.xlu1 %v3789_v2  ;;  %v8414_v34 = vpop.f32.mrf.mxu1  ;;  %v10226_v5 = vpop.f32.mrf.mxu0 }
 0x40b   : > { %v3792_v6 = vsel %vm3749_vm2, %v10226_v5, -inf  ;;  %v10262_v34 = vpop.permute.xlu1 %1346 }
 0x40c   : > { %3793 = vmax.xlane.f32.xlu0 %v3792_v6  ;;  %v8419_v9 = vpop.f32.mrf.mxu0  ;;  %11068 = vst [vmem:[#allocation31_spill] sm:$0xff] %v10262_v34  ;;  %v3846_v6 = vsub.f32 %v10118_v26, %v3752_v29 }
 0x40e   : > { %v10230_v42 = vpop.f32.mrf.mxu0 }
 0x40f   : > { %v3798_v3 = vsel %vm3749_vm2, %v10230_v42, -inf }
 0x410   : > { %v10238_v14 = vpop.f32.mrf.mxu1  ;;  %3799 = vmax.xlane.f32.xlu0 %v3798_v3  ;;  %v8429_v21 = vpop.f32.mrf.mxu0 }
 0x411   : > { %v3795_v22 = vsel %vm3749_vm2, %v10238_v14, -inf }
 0x412   : > { %3796 = vmax.xlane.f32.xlu1 %v3795_v22  ;;  %v8424_v27 = vpop.f32.mrf.mxu1  ;;  %v10242_v28 = vpop.f32.mrf.mxu0 }
 0x413   : > { %v3804_v30 = vsel %vm3749_vm2, %v10242_v28, -inf  ;;  %v3761_v22 = vpop.xlane.xlu0 %3760 }
 0x414   : > { %v10246_v32 = vpop.f32.mrf.mxu1  ;;  %3805 = vmax.xlane.f32.xlu0 %v3804_v30  ;;  %v8439_v35 = vpop.f32.mrf.mxu0 }
 0x415   : > { %v3801_v43 = vsel %vm3749_vm2, %v10246_v32, -inf }
 0x416   : > { %3802 = vmax.xlane.f32.xlu1 %v3801_v43  ;;  %v8434_v47 = vpop.f32.mrf.mxu1  ;;  %v10252_v48 = vpop.f32.mrf.mxu0  ;;  %v3878_v43 = vmul.f32 1.442695, %v3846_v6 }
 0x417   : > { %v3810_v53 = vsel %vm3749_vm2, %v10252_v48, -inf }
 0x418   : > { %v10256_v56 = vpop.f32.mrf.mxu1  ;;  %3811 = vmax.xlane.f32.xlu0 %v3810_v53  ;;  %v8449_v57 = vpop.f32.mrf.mxu0  ;;  %8889 = vpow2.f32 %v3878_v43 }
 0x419   : > { %v3807_v61 = vsel %vm3749_vm2, %v10256_v56, -inf  ;;  %v10277_v53 = vpop.permute.xlu1 %1320 }
 0x41a   : > { %3808 = vmax.xlane.f32.xlu1 %v3807_v61  ;;  %v8444_v33 = vpop.f32.mrf.mxu1  ;;  %v10260_v2 = vpop.f32.mrf.mxu0 }
 0x41b   : > { %v3816_v9 = vsel %vm3749_vm2, %v10260_v2, -inf  ;;  %v3848_v33 = vsub.f32 %v10136_v8, %v3758_v52 }
 0x41c   : > { %v10267_v3 = vpop.f32.mrf.mxu1  ;;  %3817 = vmax.xlane.f32.xlu0 %v3816_v9  ;;  %v8459_v21 = vpop.f32.mrf.mxu0 }
 0x41d   : > { %v3813_v27 = vsel %vm3749_vm2, %v10267_v3, -inf  ;;  %v3764_v9 = vpop.xlane.xlu0 %3763  ;;  %v3755_v6 = vpop.xlane.xlu1 %3754 }
 0x41e   : > { %3814 = vmax.xlane.f32.xlu1 %v3813_v27  ;;  %v8454_v30 = vpop.f32.mrf.mxu1  ;;  %v10271_v35 = vpop.f32.mrf.mxu0  ;;  %v3850_v20 = vsub.f32 %v10155_v16, %v3764_v9  ;;  %v3847_v52 = vsub.f32 %v10127_v1, %v3755_v6 }
 0x41f   : > { %v3822_v47 = vsel %vm3749_vm2, %v10271_v35, -inf }
 0x420   : > { %v10275_v26 = vpop.f32.mrf.mxu1  ;;  %3823 = vmax.xlane.f32.xlu0 %v3822_v47  ;;  %v8469_v29 = vpop.f32.mrf.mxu0 }
 0x421   : > { %v3819_v57 = vsel %vm3749_vm2, %v10275_v26, -inf  ;;  %v3882_v29 = vmul.f32 1.442695, %v3848_v33  ;;  %v3770_v43 = vpop.xlane.xlu0 %3769  ;;  %v3767_v33 = vpop.xlane.xlu1 %3766 }
 0x422   : > { %3820 = vmax.xlane.f32.xlu1 %v3819_v57  ;;  %v8464_v61 = vpop.f32.mrf.mxu1  ;;  %v3852_v60 = vsub.f32 %v10164_v4, %v3770_v43 }
 0x423   : > { %8891 = vpow2.f32 %v3882_v29  ;;  %v3886_v61 = vmul.f32 1.442695, %v3850_v20 }
 0x424   : > { %v10282_v21 = vpop.f32.mrf.mxu1 }
 0x425   : > { %v3825_v27 = vsel %vm3749_vm2, %v10282_v21, -inf  ;;  %8893 = vpow2.f32 %v3886_v61  ;;  %v10302_v1 = vpop.eup %8889 }
 0x426   : > { %3826 = vmax.xlane.f32.xlu1 %v3825_v27  ;;  %v8474_v30 = vpop.f32.mrf.mxu1  ;;  %v10286_v47 = vpop.f32.mrf.mxu0  ;;  %v3880_v27 = vmul.f32 1.442695, %v3847_v52  ;;  %v3942_v29 = vsel %vm3749_vm2, %v10302_v1, 0.0 }
 0x427   : > { %v3828_v57 = vsel %vm3749_vm2, %v10286_v47, -inf  ;;  %v3849_v30 = vsub.f32 %v10147_v12, %v3761_v22  ;;  %v3851_v12 = vsub.f32 %v10160_v23, %v3767_v33  ;;  %v3773_v22 = vpop.xlane.xlu1 %3772 }
 0x428   : > { %3829 = vmax.xlane.f32.xlu0 %v3828_v57  ;;  %v8479_v8 = vpop.f32.mrf.mxu0  ;;  %v3890_v57 = vmul.f32 1.442695, %v3852_v60  ;;  %8895 = vpow2.f32 %v3880_v27 }
 0x429   : > { %v3884_v6 = vmul.f32 1.442695, %v3849_v30  ;;  %v3888_v60 = vmul.f32 1.442695, %v3851_v12  ;;  %v3853_v8 = vsub.f32 %v10168_v31, %v3773_v22 }
 0x42a   : > { %8897 = vpow2.f32 %v3890_v57 }
 0x42b   : > { %8899 = vpow2.f32 %v3884_v6 }
 0x42c   : > { %v10293_v58 = vpop.f32.mrf.mxu1  ;;  %8901 = vpow2.f32 %v3888_v60 }
 0x42d   : > { %v3831_v16 = vsel %vm3749_vm2, %v10293_v58, -inf }
 0x42e   : > { %3832 = vmax.xlane.f32.xlu1 %v3831_v16  ;;  %v8484_v9 = vpop.f32.mrf.mxu1  ;;  %v10298_v50 = vpop.f32.mrf.mxu0  ;;  %v3892_v16 = vmul.f32 1.442695, %v3853_v8 }
 0x42f   : > { %v3834_v20 = vsel %vm3749_vm2, %v10298_v50, -inf }
 0x430   : > { %3835 = vmax.xlane.f32.xlu0 %v3834_v20  ;;  %v8489_v4 = vpop.f32.mrf.mxu0  ;;  %v10316_v30 = vpop.eup %8891  ;;  %8903 = vpow2.f32 %v3892_v16 }
 0x431   : > { %v3948_v9 = vsel %vm3749_vm2, %v10316_v30, 0.0 }
 0x432   : > { %v10320_v31 = vpop.eup %8893 }
 0x433   : > { %v3954_v12 = vsel %vm3749_vm2, %v10320_v31, 0.0 }
 0x434   : > { %v10307_v43 = vpop.f32.mrf.mxu1  ;;  %3943 = vadd.xlane.f32.xlu0 %v3942_v29 }
 0x435   : > { %v3837_v52 = vsel %vm3749_vm2, %v10307_v43, -inf  ;;  %v10326_v4 = vpop.eup %8895 }
 0x436   : > { %3838 = vmax.xlane.f32.xlu1 %v3837_v52  ;;  %v8494_v61 = vpop.f32.mrf.mxu1  ;;  %v10312_v27 = vpop.f32.mrf.mxu0  ;;  %v3945_v29 = vsel %vm3749_vm2, %v10326_v4, 0.0 }
 0x437   : > { %v3840_v23 = vsel %vm3749_vm2, %v10312_v27, -inf  ;;  %v10330_v22 = vpop.eup %8897 }
 0x438   : > { %v8499_v33 = vpop.f32.mrf.mxu0  ;;  %3841 = vmax.xlane.f32.xlu0 %v3840_v23  ;;  %v10334_v60 = vpop.eup %8899  ;;  %v3960_v8 = vsel %vm3749_vm2, %v10330_v22, 0.0 }
 0x439   : > { %v3951_v52 = vsel %vm3749_vm2, %v10334_v60, 0.0  ;;  %v10340_v61 = vpop.eup %8901 }
 0x43a   : > { %v3957_v23 = vsel %vm3749_vm2, %v10340_v61, 0.0 }
 0x43c   : > { %v10322_v57 = vpop.f32.mrf.mxu1  ;;  %3949 = vadd.xlane.f32.xlu0 %v3948_v9 }
 0x43d   : > { %v3843_v20 = vsel %vm3749_vm2, %v10322_v57, -inf  ;;  %v10344_v33 = vpop.eup %8903 }
 0x43e   : > { %3844 = vmax.xlane.f32.xlu1 %v3843_v20  ;;  %v8504_v6 = vpop.f32.mrf.mxu1  ;;  %v3963_v16 = vsel %vm3749_vm2, %v10344_v33, 0.0 }
 0x440   : > { %3955 = vadd.xlane.f32.xlu0 %v3954_v12 }
 0x442   : > { %3946 = vadd.xlane.f32.xlu1 %v3945_v29 }
 0x444   : > { %3961 = vadd.xlane.f32.xlu0 %v3960_v8 }
 0x446   : > { %3952 = vadd.xlane.f32.xlu1 %v3951_v52 }
 0x44a   : > { %3958 = vadd.xlane.f32.xlu1 %v3957_v23 }
 0x44e   : > { %3964 = vadd.xlane.f32.xlu1 %v3963_v16 }
 0x46f   : > { %v3779_v9 = vpop.xlane.xlu1 %3778 }
 0x470   : > { %v3855_v20 = vsub.f32 %v10174_v37, %v3779_v9 }
 0x472   : > { %v3896_v6 = vmul.f32 1.442695, %v3855_v20 }
 0x474   : > { %8905 = vpow2.f32 %v3896_v6 }
 0x477   : > { %v3776_v12 = vpop.xlane.xlu0 %3775 }
 0x478   : > { %v3854_v29 = vsub.f32 %v10186_v46, %v3776_v12 }
 0x47a   : > { %v3894_v8 = vmul.f32 1.442695, %v3854_v29 }
 0x47c   : > { %8907 = vpow2.f32 %v3894_v8 }
 0x47d   : > { %v3782_v52 = vpop.xlane.xlu0 %3781 }
 0x47e   : > { %v3856_v44 = vsub.f32 %v10194_v51, %v3782_v52 }
 0x480   : > { %v3898_v34 = vmul.f32 1.442695, %v3856_v44 }
 0x481   : > { %v10351_v13 = vpop.eup %8905 }
 0x482   : > { %8909 = vpow2.f32 %v3898_v34  ;;  %v3969_v23 = vsel %vm3749_vm2, %v10351_v13, 0.0 }
 0x483   : > { %v3785_v16 = vpop.xlane.xlu1 %3784  ;;  %3970 = vadd.xlane.f32.xlu1 %v3969_v23 }
 0x484   : > { %v3857_v37 = vsub.f32 %v10202_v55, %v3785_v16 }
 0x486   : > { %v3900_v9 = vmul.f32 1.442695, %v3857_v37 }
 0x488   : > { %8911 = vpow2.f32 %v3900_v9 }
 0x489   : > { %v10356_v20 = vpop.eup %8907 }
 0x48a   : > { %v3966_v46 = vsel %vm3749_vm2, %v10356_v20, 0.0 }
 0x48b   : > { %3967 = vadd.xlane.f32.xlu0 %v3966_v46 }
 0x48d   : > { %v3788_v51 = vpop.xlane.xlu0 %3787 }
 0x48e   : > { %v3858_v44 = vsub.f32 %v10210_v25, %v3788_v51 }
 0x48f   : > { %v10361_v6 = vpop.eup %8909 }
 0x490   : > { %v3902_v34 = vmul.f32 1.442695, %v3858_v44  ;;  %v3972_v12 = vsel %vm3749_vm2, %v10361_v6, 0.0 }
 0x491   : > { %3973 = vadd.xlane.f32.xlu0 %v3972_v12 }
 0x492   : > { %8913 = vpow2.f32 %v3902_v34 }
 0x493   : > { %v3791_v55 = vpop.xlane.xlu1 %3790 }
 0x494   : > { %v3859_v29 = vsub.f32 %v10218_v62, %v3791_v55 }
 0x495   : > { %v10366_v8 = vpop.eup %8911  ;;  %v3794_v52 = vpop.xlane.xlu0 %3793 }
 0x496   : > { %v3904_v23 = vmul.f32 1.442695, %v3859_v29  ;;  %v3860_v16 = vsub.f32 %v10226_v5, %v3794_v52  ;;  %v3975_v25 = vsel %vm3749_vm2, %v10366_v8, 0.0 }
 0x497   : > { %3976 = vadd.xlane.f32.xlu1 %v3975_v25 }
 0x498   : > { %8915 = vpow2.f32 %v3904_v23  ;;  %v3906_v37 = vmul.f32 1.442695, %v3860_v16 }
 0x499   : > { %v3800_v9 = vpop.xlane.xlu0 %3799 }
 0x49a   : > { %8917 = vpow2.f32 %v3906_v37  ;;  %v3862_v46 = vsub.f32 %v10230_v42, %v3800_v9 }
 0x49b   : > { %v3797_v51 = vpop.xlane.xlu1 %3796 }
 0x49c   : > { %v3910_v44 = vmul.f32 1.442695, %v3862_v46  ;;  %v3861_v62 = vsub.f32 %v10238_v14, %v3797_v51 }
 0x49d   : > { %v3806_v34 = vpop.xlane.xlu0 %3805 }
 0x49e   : > { %8919 = vpow2.f32 %v3910_v44  ;;  %v3908_v12 = vmul.f32 1.442695, %v3861_v62  ;;  %v3864_v55 = vsub.f32 %v10242_v28, %v3806_v34 }
 0x49f   : > { %v10374_v5 = vpop.eup %8913  ;;  %v3803_v29 = vpop.xlane.xlu1 %3802 }
 0x4a0   : > { %8921 = vpow2.f32 %v3908_v12  ;;  %v3914_v52 = vmul.f32 1.442695, %v3864_v55  ;;  %v3863_v23 = vsub.f32 %v10246_v32, %v3803_v29  ;;  %v3978_v16 = vsel %vm3749_vm2, %v10374_v5, 0.0 }
 0x4a1   : > { %3979 = vadd.xlane.f32.xlu0 %v3978_v16  ;;  %v3812_v42 = vpop.xlane.xlu0 %3811 }
 0x4a2   : > { %8923 = vpow2.f32 %v3914_v52  ;;  %v3912_v25 = vmul.f32 1.442695, %v3863_v23  ;;  %v3866_v14 = vsub.f32 %v10252_v48, %v3812_v42 }
 0x4a3   : > { %v3809_v37 = vpop.xlane.xlu1 %3808 }
 0x4a4   : > { %8925 = vpow2.f32 %v3912_v25  ;;  %v3918_v9 = vmul.f32 1.442695, %v3866_v14  ;;  %v3865_v28 = vsub.f32 %v10256_v56, %v3809_v37 }
 0x4a5   : > { %v10381_v46 = vpop.eup %8915  ;;  %v3818_v51 = vpop.xlane.xlu0 %3817 }
 0x4a6   : > { %8927 = vpow2.f32 %v3918_v9  ;;  %v3916_v44 = vmul.f32 1.442695, %v3865_v28  ;;  %v3868_v32 = vsub.f32 %v10260_v2, %v3818_v51  ;;  %v3981_v62 = vsel %vm3749_vm2, %v10381_v46, 0.0 }
 0x4a7   : > { %v10386_v34 = vpop.eup %8917  ;;  %v3815_v12 = vpop.xlane.xlu1 %3814  ;;  %3982 = vadd.xlane.f32.xlu1 %v3981_v62 }
 0x4a8   : > { %8929 = vpow2.f32 %v3916_v44  ;;  %v3867_v48 = vsub.f32 %v10267_v3, %v3815_v12  ;;  %v3984_v56 = vsel %vm3749_vm2, %v10386_v34, 0.0  ;;  %v3922_v29 = vmul.f32 1.442695, %v3868_v32 }
 0x4a9   : > { %3985 = vadd.xlane.f32.xlu0 %v3984_v56  ;;  %v3824_v55 = vpop.xlane.xlu0 %3823 }
 0x4aa   : > { %v3920_v52 = vmul.f32 1.442695, %v3867_v48  ;;  %v3870_v23 = vsub.f32 %v10271_v35, %v3824_v55 }
 0x4ab   : > { %v10392_v2 = vpop.eup %8919  ;;  %v3821_v16 = vpop.xlane.xlu1 %3820 }
 0x4ac   : > { %8931 = vpow2.f32 %v3920_v52  ;;  %v3869_v42 = vsub.f32 %v10275_v26, %v3821_v16  ;;  %v3990_v25 = vsel %vm3749_vm2, %v10392_v2, 0.0  ;;  %v3926_v3 = vmul.f32 1.442695, %v3870_v23 }
 0x4ad   : > { %v10397_v14 = vpop.eup %8921  ;;  %3991 = vadd.xlane.f32.xlu0 %v3990_v25  ;;  %8933 = vpow2.f32 %v3922_v29 }
 0x4ae   : > { %v3924_v37 = vmul.f32 1.442695, %v3869_v42  ;;  %v3987_v9 = vsel %vm3749_vm2, %v10397_v14, 0.0 }
 0x4af   : > { %v10401_v28 = vpop.eup %8923  ;;  %v3827_v35 = vpop.xlane.xlu1 %3826  ;;  %3988 = vadd.xlane.f32.xlu1 %v3987_v9 }
 0x4b0   : > { %8935 = vpow2.f32 %v3924_v37  ;;  %v3871_v51 = vsub.f32 %v10282_v21, %v3827_v35  ;;  %v3996_v26 = vsel %vm3749_vm2, %v10401_v28, 0.0 }
 0x4b1   : > { %v10406_v44 = vpop.eup %8925  ;;  %3997 = vadd.xlane.f32.xlu0 %v3996_v26  ;;  %v3830_v32 = vpop.xlane.xlu0 %3829  ;;  %8937 = vpow2.f32 %v3926_v3 }
 0x4b2   : > { %v3928_v62 = vmul.f32 1.442695, %v3871_v51  ;;  %v3872_v12 = vsub.f32 %v10286_v47, %v3830_v32  ;;  %v3993_v48 = vsel %vm3749_vm2, %v10406_v44, 0.0 }
 0x4b3   : > { %v10411_v56 = vpop.eup %8927  ;;  %3994 = vadd.xlane.f32.xlu1 %v3993_v48 }
 0x4b4   : > { %8939 = vpow2.f32 %v3928_v62  ;;  %v3930_v55 = vmul.f32 1.442695, %v3872_v12  ;;  %v4002_v21 = vsel %vm3749_vm2, %v10411_v56, 0.0 }
 0x4b5   : > { %v10415_v29 = vpop.eup %8929  ;;  %4003 = vadd.xlane.f32.xlu0 %v4002_v21 }
 0x4b6   : > { %8941 = vpow2.f32 %v3930_v55  ;;  %v3999_v52 = vsel %vm3749_vm2, %v10415_v29, 0.0 }
 0x4b7   : > { %v3833_v23 = vpop.xlane.xlu1 %3832  ;;  %4000 = vadd.xlane.f32.xlu1 %v3999_v52 }
 0x4b8   : > { %v3873_v47 = vsub.f32 %v10293_v58, %v3833_v23 }
 0x4b9   : > { %v10420_v16 = vpop.eup %8931  ;;  %v10422_v42 = vpop.xlane.xlu0 %3835 }
 0x4ba   : > { %v3932_v25 = vmul.f32 1.442695, %v3873_v47  ;;  %v4005_v3 = vsel %vm3749_vm2, %v10420_v16, 0.0  ;;  %v10426_v37 = vpop.eup %8933 }
 0x4bb   : > { %4006 = vadd.xlane.f32.xlu1 %v4005_v3  ;;  %v4008_v58 = vsel %vm3749_vm2, %v10426_v37, 0.0 }
 0x4bc   : > { %8943 = vpow2.f32 %v3932_v25 }
 0x4bd   : > { %v10428_v9 = vpop.eup %8935  ;;  %v3944_v35 = vpop.xlane.xlu0 %3943 }
 0x4be   : > { %v4011_v51 = vsel %vm3749_vm2, %v10428_v9, 0.0  ;;  %v10434_v26 = vpop.eup %8937  ;;  %8945 = vrcp.f32 %v3944_v35 }
 0x4bf   : > { %4012 = vadd.xlane.f32.xlu0 %v4011_v51  ;;  %4009 = vadd.xlane.f32.xlu1 %v4008_v58  ;;  %v4014_v48 = vsel %vm3749_vm2, %v10434_v26, 0.0  ;;  %v10446_v21 = vpop.xlane.xlu1 %3838 }
 0x4c1   : > { %v10436_v32 = vpop.eup %8939  ;;  %v10438_v62 = vpop.xlane.xlu0 %3841 }
 0x4c2   : > { %v4017_v12 = vsel %vm3749_vm2, %v10436_v32, 0.0 }
 0x4c3   : > { %v10444_v55 = vpop.eup %8941  ;;  %4018 = vadd.xlane.f32.xlu0 %v4017_v12  ;;  %4015 = vadd.xlane.f32.xlu1 %v4014_v48 }
 0x4c4   : > { %v4020_v23 = vsel %vm3749_vm2, %v10444_v55, 0.0 }
 0x4c5   : > { %v3950_v52 = vpop.xlane.xlu0 %3949 }
 0x4c6   : > { %8947 = vrcp.f32 %v3950_v52 }
 0x4c7   : > { %v10450_v47 = vpop.xlane.xlu1 %3844  ;;  %4021 = vadd.xlane.f32.xlu0 %v4020_v23  ;;  %v11070_v23 = vmov 0.0  }
 0x4c9   : > { %v10452_v25 = vpop.eup %8943  ;;  %v3956_v3 = vpop.xlane.xlu0 %3955 }
 0x4ca   : > { %11069 = vst [vmem:[#allocation32_spill] sm:$0xff] %v10452_v25  ;;  %8949 = vrcp.f32 %v3956_v3  ;;  %v4023_v35 = vsel %vm3749_vm2, %v10452_v25, 0.0 }
 0x4cb   : > { %v3947_v51 = vpop.xlane.xlu1 %3946  ;;  %4024 = vadd.xlane.f32.xlu1 %v4023_v35  ;;  %v8946_v58 = vpop.eup %8945 }
 0x4cc   : > { %8951 = vrcp.f32 %v3947_v51  ;;  %v4070_v48 = vmul.f32 %v8946_v58, %v10302_v1 }
 0x4cd   : > { %v3962_v12 = vpop.xlane.xlu0 %3961 }
 0x4ce   : > { %8953 = vrcp.f32 %v3962_v12  ;;  %8508 = vmatmul.mubr.msk.f32.vlgmr.msra.gmra.mxu0 %vm3749_vm2, %v4070_v48 }
 0x4cf   : > { %v3953_v52 = vpop.xlane.xlu1 %3952  ;;  %8516 = vmatpush3.msra.mxu0 %v9966_v41  ;;  %8517 = vmatprep.mubr.msk.f32.mxu0 %vm9378_vm0, %v11070_v23 }
 0x4d0   : > { %8955 = vrcp.f32 %v3953_v52  ;;  %8525 = vmatprep.subr.mxu0 %v11070_v23 }
 0x4d3   : > { %v3959_v3 = vpop.xlane.xlu1 %3958  ;;  %v8948_v25 = vpop.eup %8947 }
 0x4d4   : > { %8957 = vrcp.f32 %v3959_v3  ;;  %v4072_v35 = vmul.f32 %v8948_v25, %v10316_v30 }
 0x4d6   : > { %8518 = vmatmul.mubr.msk.f32.vlgmr.msra.gmra.mxu0 %vm3749_vm2, %v4072_v35 }
 0x4d7   : > { %v8950_v51 = vpop.eup %8949  ;;  %v3965_v1 = vpop.xlane.xlu1 %3964  ;;  %8526 = vmatpush3.msra.mxu0 %v9983_v10  ;;  %8527 = vmatprep.mubr.msk.f32.mxu0 %vm9378_vm0, %v11070_v23 }
 0x4d8   : > { %8959 = vrcp.f32 %v3965_v1  ;;  %v4074_v41 = vmul.f32 %v8950_v51, %v10320_v31  ;;  %8535 = vmatprep.subr.mxu0 %v11070_v23 }
 0x4d9   : > { %v8952_v58 = vpop.eup %8951 }
 0x4da   : > { %8528 = vmatmul.mubr.msk.f32.vlgmr.msra.gmra.mxu0 %vm3749_vm2, %v4074_v41  ;;  %v4071_v30 = vmul.f32 %v8952_v58, %v10326_v4 }
 0x4db   : > { %v8954_v12 = vpop.eup %8953  ;;  %8536 = vmatpush3.msra.mxu0 %v10001_v19  ;;  %8537 = vmatprep.mubr.msk.f32.mxu0 %vm9378_vm0, %v11070_v23 }
 0x4dc   : > { %1366 = vrot.lane.b32.xlu1 %v9996_v15, %s9381_s18  ;;  %v4076_v25 = vmul.f32 %v8954_v12, %v10330_v22  ;;  %8513 = vmatmul.mubr.msk.f32.vlgmr.msra.gmra.mxu1 %vm3749_vm2, %v4071_v30 }
 0x4dd   : > { %v8956_v48 = vpop.eup %8955  ;;  %1364 = vrot.lane.b32.xlu0 %v9983_v10, %s9381_s18  ;;  %8521 = vmatpush3.msra.mxu1 %v9974_v7  ;;  %v3874_v10 = vsub.f32 %v10298_v50, %v10422_v42  ;;  %v3877_v42 = vsub.f32 %v10322_v57, %v10450_v47 }
 0x4de   : > { %v4073_v31 = vmul.f32 %v8956_v48, %v10334_v60  ;;  %8545 = vmatprep.subr.mxu0 %v11070_v23  ;;  %8538 = vmatmul.mubr.msk.f32.vlgmr.msra.gmra.mxu0 %vm3749_vm2, %v4076_v25  ;;  %v3876_v60 = vsub.f32 %v10312_v27, %v10438_v62 }
 0x4df   : > { %8546 = vmatpush3.msra.mxu0 %v10172_v36  ;;  %8522 = vmatprep.mubr.msk.f32.mxu1 %vm9378_vm0, %v11070_v23  ;;  %v3934_v22 = vmul.f32 1.442695, %v3874_v10  ;;  %v3940_v27 = vmul.f32 1.442695, %v3877_v42 }
 0x4e0   : > { %8530 = vmatprep.subr.mxu1 %v11070_v23  ;;  %8523 = vmatmul.mubr.msk.f32.vlgmr.msra.gmra.mxu1 %vm3749_vm2, %v4073_v31 }
 0x4e1   : > { %v8958_v4 = vpop.eup %8957  ;;  %8531 = vmatpush3.msra.mxu1 %v9996_v15  ;;  %8532 = vmatprep.mubr.msk.f32.mxu1 %vm9378_vm0, %v11070_v23  ;;  %v3875_v15 = vsub.f32 %v10307_v43, %v10446_v21  ;;  %8961 = vpow2.f32 %v3934_v22  ;;  %v3938_v43 = vmul.f32 1.442695, %v3876_v60 }
 0x4e2   : > { %v4075_v7 = vmul.f32 %v8958_v4, %v10340_v61  ;;  %8540 = vmatprep.subr.mxu1 %v11070_v23  ;;  %8547 = vmatprep.mubr.msk.f32.mxu0 %vm9378_vm0, %v11070_v23 }
 0x4e3   : > { %8555 = vmatprep.subr.mxu0 %v11070_v23  ;;  %v3936_v61 = vmul.f32 1.442695, %v3875_v15 }
 0x4e4   : > { %8533 = vmatmul.mubr.msk.f32.vlgmr.msra.gmra.mxu1 %vm3749_vm2, %v4075_v7 }
 0x4e5   : > { %v8960_v36 = vpop.eup %8959  ;;  %8541 = vmatpush3.msra.mxu1 %v10013_v24  ;;  %8542 = vmatprep.mubr.msk.f32.mxu1 %vm9378_vm0, %v11070_v23  ;;  %8963 = vpow2.f32 %v3936_v61 }
 0x4e6   : > { %v4077_v50 = vmul.f32 %v8960_v36, %v10344_v33  ;;  %8550 = vmatprep.subr.mxu1 %v11070_v23  ;;  %8965 = vpow2.f32 %v3938_v43 }
 0x4e7   : > { %8967 = vpow2.f32 %v3940_v27 }
 0x4e8   : > { %8543 = vmatmul.mubr.msk.f32.vlgmr.msra.gmra.mxu1 %vm3749_vm2, %v4077_v50 }
 0x4e9   : > { %8551 = vmatpush3.msra.mxu1 %v10178_v39  ;;  %8552 = vmatprep.mubr.msk.f32.mxu1 %vm9378_vm0, %v11070_v23 }
 0x4ea   : > { %8560 = vmatprep.subr.mxu1 %v11070_v23 }
 0x4ee   : > { %v10516_v33 = vpop.eup %8961 }
 0x4ef   : > { %v4026_v39 = vsel %vm3749_vm2, %v10516_v33, 0.0 }
 0x4f2   : > { %v10518_v62 = vpop.eup %8963 }
 0x4f3   : > { %v10522_v21 = vpop.eup %8965  ;;  %v4029_v52 = vsel %vm3749_vm2, %v10518_v62, 0.0 }
 0x4f4   : > { %v4032_v57 = vsel %vm3749_vm2, %v10522_v21, 0.0  ;;  %v10528_v47 = vpop.eup %8967 }
 0x4f5   : > { %v4035_v3 = vsel %vm3749_vm2, %v10528_v47, 0.0 }
 0x4fc   : > { %4027 = vadd.xlane.f32.xlu0 %v4026_v39 }
 0x500   : > { %4030 = vadd.xlane.f32.xlu1 %v4029_v52  ;;  %4033 = vadd.xlane.f32.xlu0 %v4032_v57  ;;  %v11072_v52 = vld [vmem:[#allocation31_spill] sm:$0xff] }
 0x504   : > { %4036 = vadd.xlane.f32.xlu1 %v4035_v3 }
 0x50c   : > { %v3971_v35 = vpop.xlane.xlu1 %3970 }
 0x50d   : > { %8969 = vrcp.f32 %v3971_v35 }
 0x514   : > { %v3968_v51 = vpop.xlane.xlu0 %3967 }
 0x515   : > { %8971 = vrcp.f32 %v3968_v51  ;;  %1370 = vrot.lane.b32.xlu1 %v10013_v24, %s9381_s18  ;;  %v11073_v51 = vld [vmem:[#allocation26_spill] sm:$0xff] }
 0x516   : > { %1368 = vrot.lane.b32.xlu0 %v10001_v19, %s9381_s18  ;;  %s7602_s18 = sshll.u32 %s10922_s20, 4  ;;  %s10944_s18 = int_to_ptr.vmem [resolvable:$true] %s7602_s18 }
 0x517   : > { %s9283_s13 = scalar_lea.vmem %s10944_s18, 1024  ;;  %p9290_p1 = scmp.lt.s32.totalorder %s10944_s18, %s9288_s15 }
 0x518   : > { %p9284_p9 = scmp.ne.s32.totalorder %s10944_s18, %s9283_s13  ;;  %p9291_p3 = scmp.lt.s32.totalorder %s9289_s30, %s9283_s13 }
 0x51a   : > { %v8970_v1 = vpop.eup %8969  ;;  %v3974_v41 = vpop.xlane.xlu0 %3973  ;;  %p9285_p12 = pnand %p9284_p9, %p11079_p11  ;;  %p9292_p4 = por %p9291_p3, %p9290_p1 }
 0x51b   : > { %8973 = vrcp.f32 %v3974_v41  ;;  %v4079_v58 = vmul.f32 %v8970_v1, %v10351_v13  ;;  %v11074_v41 = vld [vmem:[#allocation27_spill] sm:$0xff] }
 0x51c   : > { %p9286_p13 = pneg %p9285_p12 }
 0x51d   : > { %8553 = vmatmul.mubr.msk.f32.vlgmr.msra.gmra.mxu1 %vm3749_vm2, %v4079_v58 }
 0x51e   : > { %8561 = vmatpush3.msra.mxu1 %v10200_v17  ;;  %8562 = vmatprep.mubr.msk.f32.mxu1 %vm9378_vm0, %v11070_v23  ;;  %p9293_p8 = pnand %p9292_p4, %p9286_p13 }
 0x51f   : > { %8570 = vmatprep.subr.mxu1 %v11070_v23 }
 0x520   : > { %v3977_v12 = vpop.xlane.xlu1 %3976 }
 0x521   : > { %8975 = vrcp.f32 %v3977_v12  ;;  %v11075_v12 = vld [vmem:[#allocation28_spill] sm:$0xff] }
 0x522   : > { %v8972_v24 = vpop.eup %8971 }
 0x523   : > { %v4078_v30 = vmul.f32 %v8972_v24, %v10356_v20  ;;  %v11076_v24 = vld [vmem:[#allocation29_spill] sm:$0xff] }
 0x525   : > { %8548 = vmatmul.mubr.msk.f32.vlgmr.msra.gmra.mxu0 %vm3749_vm2, %v4078_v30 }
 0x526   : > { %8556 = vmatpush3.msra.mxu0 %v10190_v49  ;;  %8557 = vmatprep.mubr.msk.f32.mxu0 %vm9378_vm0, %v11070_v23 }
 0x527   : > { %8565 = vmatprep.subr.mxu0 %v11070_v23 }
 0x528   : > { %v8974_v19 = vpop.eup %8973 }
 0x529   : > { %v4080_v17 = vmul.f32 %v8974_v19, %v10361_v6  ;;  %v11077_v19 = vld [vmem:[#allocation32_spill] sm:$0xff] }
 0x52a   : > { %v3980_v13 = vpop.xlane.xlu0 %3979 }
 0x52b   : > { %8977 = vrcp.f32 %v3980_v13  ;;  %8558 = vmatmul.mubr.msk.f32.vlgmr.msra.gmra.mxu0 %vm3749_vm2, %v4080_v17 }
 0x52c   : > { %8566 = vmatpush3.msra.mxu0 %v10212_v59  ;;  %8567 = vmatprep.mubr.msk.f32.mxu0 %vm9378_vm0, %v11070_v23 }
 0x52d   : > { %8575 = vmatprep.subr.mxu0 %v11070_v23 }
 0x52e   : > { %v8976_v49 = vpop.eup %8975 }
 0x52f   : > { %v4081_v20 = vmul.f32 %v8976_v49, %v10366_v8 }
 0x530   : > { %v3983_v25 = vpop.xlane.xlu1 %3982 }
 0x531   : > { %8979 = vrcp.f32 %v3983_v25  ;;  %8563 = vmatmul.mubr.msk.f32.vlgmr.msra.gmra.mxu1 %vm3749_vm2, %v4081_v20 }
 0x532   : > { %8571 = vmatpush3.msra.mxu1 %v10222_v0  ;;  %v3986_v6 = vpop.xlane.xlu0 %3985  ;;  %8572 = vmatprep.mubr.msk.f32.mxu1 %vm9378_vm0, %v11070_v23 }
 0x533   : > { %8981 = vrcp.f32 %v3986_v6  ;;  %8580 = vmatprep.subr.mxu1 %v11070_v23 }
 0x536   : > { %v3992_v59 = vpop.xlane.xlu0 %3991 }
 0x537   : > { %8983 = vrcp.f32 %v3992_v59 }
 0x538   : > { %v8978_v48 = vpop.eup %8977  ;;  %v3989_v31 = vpop.xlane.xlu1 %3988 }
 0x539   : > { %8985 = vrcp.f32 %v3989_v31  ;;  %v4082_v8 = vmul.f32 %v8978_v48, %v10374_v5 }
 0x53a   : > { %v3998_v4 = vpop.xlane.xlu0 %3997 }
 0x53b   : > { %8987 = vrcp.f32 %v3998_v4  ;;  %8568 = vmatmul.mubr.msk.f32.vlgmr.msra.gmra.mxu0 %vm3749_vm2, %v4082_v8  ;;  %v6445_v8 = vld [vmem:[#allocation11 + $0x38] sm:$0xff] }
 0x53c   : > { %8576 = vmatpush3.msra.mxu0 %v10277_v53  ;;  %v3995_v0 = vpop.xlane.xlu1 %3994  ;;  %8577 = vmatprep.mubr.msk.f32.mxu0 %vm9378_vm0, %v11070_v23 }
 0x53d   : > { %8989 = vrcp.f32 %v3995_v0  ;;  %8585 = vmatprep.subr.mxu0 %v11070_v23 }
 0x53e   : > { %v8980_v7 = vpop.eup %8979  ;;  %v4004_v10 = vpop.xlane.xlu0 %4003 }
 0x53f   : > { %8991 = vrcp.f32 %v4004_v10  ;;  %v4083_v36 = vmul.f32 %v8980_v7, %v10381_v46 }
 0x540   : > { %v8982_v15 = vpop.eup %8981  ;;  %v4001_v5 = vpop.xlane.xlu1 %4000 }
 0x541   : > { %8993 = vrcp.f32 %v4001_v5  ;;  %8573 = vmatmul.mubr.msk.f32.vlgmr.msra.gmra.mxu1 %vm3749_vm2, %v4083_v36  ;;  %v4084_v50 = vmul.f32 %v8982_v15, %v10386_v34 }
 0x542   : > { %8581 = vmatpush3.msra.mxu1 %v10248_v40  ;;  %8582 = vmatprep.mubr.msk.f32.mxu1 %vm9378_vm0, %v11070_v23 }
 0x543   : > { %8578 = vmatmul.mubr.msk.f32.vlgmr.msra.gmra.mxu0 %vm3749_vm2, %v4084_v50  ;;  %8590 = vmatprep.subr.mxu1 %v11070_v23  ;;  %v6441_v50 = vld [vmem:[#allocation11 + $0x18] sm:$0xff] }
 0x544   : > { %v8984_v53 = vpop.eup %8983  ;;  %8586 = vmatpush3.msra.mxu0 %v10176_v38  ;;  %v4007_v46 = vpop.xlane.xlu1 %4006  ;;  %8587 = vmatprep.mubr.msk.f32.mxu0 %vm9378_vm0, %v11070_v23 }
 0x545   : > { %8995 = vrcp.f32 %v4007_v46  ;;  %8595 = vmatprep.subr.mxu0 %v11070_v23  ;;  %v4086_v34 = vmul.f32 %v8984_v53, %v10392_v2 }
 0x546   : > { %v8986_v40 = vpop.eup %8985 }
 0x547   : > { %8588 = vmatmul.mubr.msk.f32.vlgmr.msra.gmra.mxu0 %vm3749_vm2, %v4086_v34  ;;  %v4085_v22 = vmul.f32 %v8986_v40, %v10397_v14  ;;  %v6444_v34 = vld [vmem:[#allocation11 + $0x30] sm:$0xff] }
 0x548   : > { %v8988_v60 = vpop.eup %8987  ;;  %8596 = vmatpush3.msra.mxu0 %v10198_v54  ;;  %v4010_v61 = vpop.xlane.xlu1 %4009  ;;  %8597 = vmatprep.mubr.msk.f32.mxu0 %vm9378_vm0, %v11070_v23 }
 0x549   : > { %v4013_v43 = vpop.xlane.xlu0 %4012  ;;  %8997 = vrcp.f32 %v4010_v61  ;;  %8583 = vmatmul.mubr.msk.f32.vlgmr.msra.gmra.mxu1 %vm3749_vm2, %v4085_v22  ;;  %8605 = vmatprep.subr.mxu0 %v11070_v23  ;;  %v4088_v38 = vmul.f32 %v8988_v60, %v10401_v28  ;;  %v6440_v60 = vld [vmem:[#allocation11 + $0x10] sm:$0xff] }
 0x54a   : > { %v8990_v2 = vpop.eup %8989  ;;  %8999 = vrcp.f32 %v4013_v43  ;;  %8591 = vmatpush3.msra.mxu1 %v10184_v45  ;;  %8592 = vmatprep.mubr.msk.f32.mxu1 %vm9378_vm0, %v11070_v23 }
 0x54b   : > { %8598 = vmatmul.mubr.msk.f32.vlgmr.msra.gmra.mxu0 %vm3749_vm2, %v4088_v38  ;;  %8600 = vmatprep.subr.mxu1 %v11070_v23  ;;  %v4087_v54 = vmul.f32 %v8990_v2, %v10406_v44  ;;  %v6439_v38 = vld [vmem:[#allocation11 + $0x8] sm:$0xff]  ;;  %v6442_v2 = vld [vmem:[#allocation11 + $0x20] sm:$0xff] }
 0x54c   : > { %v8992_v14 = vpop.eup %8991  ;;  %8606 = vmatpush3.msra.mxu0 %v10220_v63  ;;  %v4016_v42 = vpop.xlane.xlu1 %4015  ;;  %8607 = vmatprep.mubr.msk.f32.mxu0 %vm9378_vm0, %v11070_v23 }
 0x54d   : > { %v4019_v27 = vpop.xlane.xlu0 %4018  ;;  %9001 = vrcp.f32 %v4016_v42  ;;  %8593 = vmatmul.mubr.msk.f32.vlgmr.msra.gmra.mxu1 %vm3749_vm2, %v4087_v54  ;;  %8615 = vmatprep.subr.mxu0 %v11070_v23  ;;  %v4090_v45 = vmul.f32 %v8992_v14, %v10411_v56  ;;  %v11071_v56 = vld [vmem:[#allocation30_spill] sm:$0xff]  ;;  %v6707_v42 = vld [vmem:[#allocation11 + $0x58] sm:$0xff] }
 0x54e   : > { %v8994_v28 = vpop.eup %8993  ;;  %9003 = vrcp.f32 %v4019_v27  ;;  %8601 = vmatpush3.msra.mxu1 %v10208_v18  ;;  %8602 = vmatprep.mubr.msk.f32.mxu1 %vm9378_vm0, %v11070_v23 }
 0x54f   : > { %8608 = vmatmul.mubr.msk.f32.vlgmr.msra.gmra.mxu0 %vm3749_vm2, %v4090_v45  ;;  %8610 = vmatprep.subr.mxu1 %v11070_v23  ;;  %v4089_v63 = vmul.f32 %v8994_v28, %v10415_v29  ;;  %v6848_v45 = vld [vmem:[#allocation11 + $0x78] sm:$0xff] }
 0x550   : > { %8616 = vmatpush3.msra.mxu0 %v10232_v11  ;;  %8617 = vmatprep.mubr.msk.f32.mxu0 %vm9378_vm0, %v11070_v23 }
 0x551   : > { %v4022_v44 = vpop.xlane.xlu0 %4021  ;;  %8603 = vmatmul.mubr.msk.f32.vlgmr.msra.gmra.mxu1 %vm3749_vm2, %v4089_v63  ;;  %8625 = vmatprep.subr.mxu0 %v11070_v23  ;;  %v6847_v63 = vld [vmem:[#allocation11 + $0x70] sm:$0xff] }
 0x552   : > { %9005 = vrcp.f32 %v4022_v44  ;;  %v8996_v18 = vpop.eup %8995  ;;  %8611 = vmatpush3.msra.mxu1 %v11071_v56  ;;  %8612 = vmatprep.mubr.msk.f32.mxu1 %vm9378_vm0, %v11070_v23 }
 0x553   : > { %8620 = vmatprep.subr.mxu1 %v11070_v23  ;;  %v4091_v29 = vmul.f32 %v8996_v18, %v10420_v16  ;;  %v6846_v18 = vld [vmem:[#allocation11 + $0x68] sm:$0xff] }
 0x554   : > { %v4025_v11 = vpop.xlane.xlu1 %4024 }
 0x555   : > { %9007 = vrcp.f32 %v4025_v11  ;;  %8613 = vmatmul.mubr.msk.f32.vlgmr.msra.gmra.mxu1 %vm3749_vm2, %v4091_v29  ;;  %v6845_v29 = vld [vmem:[#allocation11 + $0x60] sm:$0xff] }
 0x556   : > { %v8998_v39 = vpop.eup %8997  ;;  %8621 = vmatpush3.msra.mxu1 %v11072_v52  ;;  %8622 = vmatprep.mubr.msk.f32.mxu1 %vm9378_vm0, %v11070_v23 }
 0x557   : > { %v9000_v57 = vpop.eup %8999  ;;  %8630 = vmatprep.subr.mxu1 %v11070_v23  ;;  %v4092_v3 = vmul.f32 %v8998_v39, %v10426_v37 }
 0x558   : > { %v4093_v35 = vmul.f32 %v9000_v57, %v10428_v9 }
 0x559   : > { %8618 = vmatmul.mubr.msk.f32.vlgmr.msra.gmra.mxu0 %vm3749_vm2, %v4092_v3  ;;  %v6706_v3 = vld [vmem:[#allocation11 + $0x50] sm:$0xff] }
 0x55a   : > { %v9002_v16 = vpop.eup %9001  ;;  %8623 = vmatmul.mubr.msk.f32.vlgmr.msra.gmra.mxu1 %vm3749_vm2, %v4093_v35  ;;  %8626 = vmatpush3.msra.mxu0 %v11073_v51  ;;  %v6704_v51 = vld [vmem:[#allocation11 + $0x40] sm:$0xff] }
 0x55b   : > { %v9004_v1 = vpop.eup %9003  ;;  %8631 = vmatpush3.msra.mxu1 %v11074_v41  ;;  %8627 = vmatprep.mubr.msk.f32.mxu0 %vm9378_vm0, %v11070_v23  ;;  %v4094_v58 = vmul.f32 %v9002_v16, %v10434_v26  ;;  %v6705_v16 = vld [vmem:[#allocation11 + $0x48] sm:$0xff] }
 0x55c   : > { %8632 = vmatprep.mubr.msk.f32.mxu1 %vm9378_vm0, %v11070_v23  ;;  %8635 = vmatprep.subr.mxu0 %v11070_v23  ;;  %v4095_v37 = vmul.f32 %v9004_v1, %v10436_v32  ;;  %v1365_v32 = vpop.permute.xlu0 %1364 }
 0x55d   : > { %8640 = vmatprep.subr.mxu1 %v11070_v23  ;;  %8628 = vmatmul.mubr.msk.f32.vlgmr.msra.gmra.mxu0 %vm3749_vm2, %v4094_v58 }
 0x55e   : > { %8633 = vmatmul.mubr.msk.f32.vlgmr.msra.gmra.mxu1 %vm3749_vm2, %v4095_v37  ;;  %8636 = vmatpush3.msra.mxu0 %v11075_v12 }
 0x55f   : > { %v9006_v9 = vpop.eup %9005  ;;  %8641 = vmatpush3.msra.mxu1 %v11076_v24  ;;  %8637 = vmatprep.mubr.msk.f32.mxu0 %vm9378_vm0, %v11070_v23 }
 0x560   : > { %v4096_v26 = vmul.f32 %v9006_v9, %v10444_v55  ;;  %8645 = vmatprep.subr.mxu0 %v11070_v23  ;;  %8642 = vmatprep.mubr.msk.f32.mxu1 %vm9378_vm0, %v11070_v23  ;;  %v1367_v55 = vpop.permute.xlu1 %1366 }
 0x561   : > { %8650 = vmatprep.subr.mxu1 %v11070_v23 }
 0x562   : > { %8638 = vmatmul.mubr.msk.f32.vlgmr.msra.gmra.mxu0 %vm3749_vm2, %v4096_v26  ;;  %v9008_v30 = vpop.eup %9007 }
 0x563   : > { %8646 = vmatpush3.msra.mxu0 %v1365_v32  ;;  %8647 = vmatprep.mubr.msk.f32.mxu0 %vm9378_vm0, %v11070_v23  ;;  %v4097_v17 = vmul.f32 %v9008_v30, %v11077_v19 }
 0x564   : > { %8655 = vmatprep.subr.mxu0 %v11070_v23 }
 0x565   : > { %8643 = vmatmul.mubr.msk.f32.vlgmr.msra.gmra.mxu1 %vm3749_vm2, %v4097_v17 }
 0x566   : > { %8651 = vmatpush3.msra.mxu1 %v1367_v55  ;;  %8652 = vmatprep.mubr.msk.f32.mxu1 %vm9378_vm0, %v11070_v23 }
 0x567   : > { %8660 = vmatprep.subr.mxu1 %v11070_v23 }
 0x585   : > { %v4028_v13 = vpop.xlane.xlu0 %4027 }
 0x586   : > { %9009 = vrcp.f32 %v4028_v13 }
 0x589   : > { %v4031_v49 = vpop.xlane.xlu1 %4030  ;;  %v4034_v20 = vpop.xlane.xlu0 %4033 }
 0x58a   : > { %9011 = vrcp.f32 %v4031_v49 }
 0x58b   : > { %9013 = vrcp.f32 %v4034_v20 }
 0x58d   : > { %v4037_v25 = vpop.xlane.xlu1 %4036  ;;  %v1369_v4 = vpop.permute.xlu0 %1368 }
 0x58e   : > { %9015 = vrcp.f32 %v4037_v25  ;;  %v4171_v6 = vpop.f32.mrf.mxu0 }
 0x590   : > { %v8509_v59 = vpop.f32.mrf.mxu0 }
 0x591   : > { %v1371_v53 = vpop.permute.xlu1 %1370 }
 0x593   : > { %v9010_v48 = vpop.eup %9009 }
 0x594   : > { %v4098_v31 = vmul.f32 %v9010_v48, %v10516_v33 }
 0x596   : > { %8648 = vmatmul.mubr.msk.f32.vlgmr.msra.gmra.mxu0 %vm3749_vm2, %v4098_v31  ;;  %v4317_v7 = vpop.f32.mrf.mxu0 }
 0x597   : > { %v9012_v0 = vpop.eup %9011  ;;  %8656 = vmatpush3.msra.mxu0 %v1369_v4  ;;  %8657 = vmatprep.mubr.msk.f32.mxu0 %vm9378_vm0, %v11070_v23 }
 0x598   : > { %v9014_v10 = vpop.eup %9013  ;;  %v4099_v36 = vmul.f32 %v9012_v0, %v10518_v62  ;;  %8665 = vmatprep.subr.mxu0 %v6445_v8  ;;  %v8519_v15 = vpop.f32.mrf.mxu0 }
 0x599   : > { %v4100_v5 = vmul.f32 %v9014_v10, %v10522_v21  ;;  %v6443_v21 = vld [vmem:[#allocation11 + $0x28] sm:$0xff] }
 0x59a   : > { %8653 = vmatmul.mubr.msk.f32.vlgmr.msra.gmra.mxu1 %vm3749_vm2, %v4099_v36  ;;  %v4463_v46 = vpop.f32.mrf.mxu0 }
 0x59b   : > { %v9016_v33 = vpop.eup %9015  ;;  %8658 = vmatmul.mubr.msk.f32.vlgmr.msra.gmra.mxu0 %vm3749_vm2, %v4100_v5  ;;  %8661 = vmatpush3.msra.mxu1 %v1371_v53 }
 0x59c   : > { %8662 = vmatprep.mubr.msk.f32.mxu1 %vm9378_vm0, %v11070_v23  ;;  %8685 = vmatprep.subr.mxu1 %v6441_v50  ;;  %v4101_v62 = vmul.f32 %v9016_v33, %v10528_v47  ;;  %v4244_v40 = vpop.f32.mrf.mxu1  ;;  %v8529_v22 = vpop.f32.mrf.mxu0  ;;  %v6438_v47 = vld [vmem:[#allocation11] sm:$0xff] }
 0x59d   : > { %8666 = vmatpush3.msra.mxu0 %v6445_v8 }
 0x59e   : > { %8663 = vmatmul.mubr.msk.f32.vlgmr.msra.gmra.mxu1 %vm3749_vm2, %v4101_v62  ;;  %8667 = vmatprep.subr.mxu0 %v6444_v34  ;;  %v8514_v61 = vpop.f32.mrf.mxu1  ;;  %v4609_v43 = vpop.f32.mrf.mxu0 }
 0x59f   : > { %8686 = vmatpush3.msra.mxu1 %v6441_v50  ;;  %8693 = vmatprep.mubr.msk.f32.mxu1 %vm1380_vm1, %v4171_v6 }
 0x5a0   : > { %8687 = vmatprep.subr.mxu1 %v6440_v60  ;;  %8668 = vmatpush3.msra.mxu0 %v6444_v34  ;;  %v4390_v54 = vpop.f32.mrf.mxu1  ;;  %v8539_v14 = vpop.f32.mrf.mxu0 }
 0x5a1   : > { %8688 = vmatpush3.msra.mxu1 %v6440_v60  ;;  %8669 = vmatprep.subr.mxu0 %v6443_v21 }
 0x5a2   : > { %8689 = vmatprep.subr.mxu1 %v6439_v38  ;;  %8670 = vmatpush3.msra.mxu0 %v6443_v21  ;;  %v8524_v27 = vpop.f32.mrf.mxu1 }
 0x5a3   : > { %8690 = vmatpush3.msra.mxu1 %v6439_v38  ;;  %8671 = vmatprep.subr.mxu0 %v6442_v2 }
 0x5a4   : > { %8691 = vmatprep.subr.mxu1 %v6438_v47  ;;  %8672 = vmatpush3.msra.mxu0 %v6442_v2  ;;  %v4536_v28 = vpop.f32.mrf.mxu1 }
 0x5a5   : > { %8692 = vmatpush3.msra.mxu1 %v6438_v47  ;;  %8705 = vmatprep.subr.mxu0 %v6707_v42 }
 0x5a6   : > { %8694 = vmatmul.mubr.msk.f32.vlgmr.msra.gmra.mxu1 %vm1380_vm1, %v4244_v40  ;;  %8725 = vmatprep.subr.mxu1 %v6848_v45  ;;  %v8534_v44 = vpop.f32.mrf.mxu1 }
 0x5a7   : > { %8696 = vmatprep.mubr.msk.f32.mxu1 %vm1380_vm1, %v4317_v7  ;;  %8726 = vmatpush3.msra.mxu1 %v6848_v45 }
 0x5a8   : > { %8727 = vmatprep.subr.mxu1 %v6847_v63  ;;  %v4682_v56 = vpop.f32.mrf.mxu1 }
 0x5a9   : > { %8728 = vmatpush3.msra.mxu1 %v6847_v63 }
 0x5aa   : > { %8697 = vmatmul.mubr.msk.f32.gmra.mxu1 %vm1380_vm1, %v4390_v54  ;;  %8729 = vmatprep.subr.mxu1 %v6846_v18  ;;  %v8544_v11 = vpop.f32.mrf.mxu1 }
 0x5ab   : > { %8699 = vmatprep.mubr.msk.f32.mxu1 %vm1380_vm1, %v4463_v46  ;;  %8730 = vmatpush3.msra.mxu1 %v6846_v18 }
 0x5ac   : > { %8731 = vmatprep.subr.mxu1 %v6845_v29 }
 0x5ad   : > { %8732 = vmatpush3.msra.mxu1 %v6845_v29 }
 0x5ae   : > { %8700 = vmatmul.mubr.msk.f32.gmra.mxu1 %vm1380_vm1, %v4536_v28 }
 0x5af   : > { %8702 = vmatprep.mubr.msk.f32.mxu1 %vm1380_vm1, %v4609_v43 }
 0x5b2   : > { %8703 = vmatmul.mubr.msk.f32.gmra.mxu1 %vm1380_vm1, %v4682_v56 }
 0x5dd   : > { %v4828_v39 = vpop.f32.mrf.mxu1 }
 0x5df   : > { %v8554_v52 = vpop.f32.mrf.mxu1 }
 0x5e5   : > { %v4755_v57 = vpop.f32.mrf.mxu0 }
 0x5e6   : > { %8673 = vmatprep.mubr.msk.f32.mxu0 %vm1380_vm1, %v4755_v57 }
 0x5e7   : > { %v8549_v35 = vpop.f32.mrf.mxu0  ;;  %8674 = vmatmul.mubr.msk.f32.vlgmr.msra.gmra.mxu0 %vm1380_vm1, %v4828_v39 }
 0x5e8   : > { %8706 = vmatpush3.msra.mxu0 %v6707_v42 }
 0x5e9   : > { %8707 = vmatprep.subr.mxu0 %v6706_v3 }
 0x5ea   : > { %8708 = vmatpush3.msra.mxu0 %v6706_v3 }
 0x5eb   : > { %v4901_v1 = vpop.f32.mrf.mxu0  ;;  %8709 = vmatprep.subr.mxu0 %v6705_v16 }
 0x5ec   : > { %8676 = vmatprep.mubr.msk.f32.mxu0 %vm1380_vm1, %v4901_v1  ;;  %8710 = vmatpush3.msra.mxu0 %v6705_v16 }
 0x5ed   : > { %v8559_v41 = vpop.f32.mrf.mxu0  ;;  %8711 = vmatprep.subr.mxu0 %v6704_v51 }
 0x5ee   : > { %8712 = vmatpush3.msra.mxu0 %v6704_v51 }
 0x5f1   : > { %v4974_v58 = vpop.f32.mrf.mxu1 }
 0x5f2   : > { %8677 = vmatmul.mubr.msk.f32.gmra.mxu0 %vm1380_vm1, %v4974_v58 }
 0x5f3   : > { %v8564_v37 = vpop.f32.mrf.mxu1 }
 0x5fb   : > { %v5047_v9 = vpop.f32.mrf.mxu0 }
 0x5fc   : > { %8679 = vmatprep.mubr.msk.f32.mxu0 %vm1380_vm1, %v5047_v9 }
 0x5fd   : > { %v8569_v12 = vpop.f32.mrf.mxu0 }
 0x601   : > { %v5120_v24 = vpop.f32.mrf.mxu1 }
 0x602   : > { %8680 = vmatmul.mubr.msk.f32.gmra.mxu0 %vm1380_vm1, %v5120_v24 }
 0x603   : > { %v8574_v26 = vpop.f32.mrf.mxu1  ;;  %v5193_v32 = vpop.f32.mrf.mxu0 }
 0x604   : > { %8682 = vmatprep.mubr.msk.f32.mxu0 %vm1380_vm1, %v5193_v32 }
 0x605   : > { %v8579_v30 = vpop.f32.mrf.mxu0 }
 0x607   : > { %v5339_v19 = vpop.f32.mrf.mxu0 }
 0x609   : > { %v5266_v17 = vpop.f32.mrf.mxu1  ;;  %v8589_v55 = vpop.f32.mrf.mxu0 }
 0x60a   : > { %8683 = vmatmul.mubr.msk.f32.gmra.mxu0 %vm1380_vm1, %v5266_v17  ;;  %v7898_v17 = vld [vmem:[%s10999_s10] ss:$0 sm:$0xff]  ;;  %v9065_v55 = vld [vmem:[%s9675_s1 + $0x8] sm:$0xff] }
 0x60b   : > { %v8584_v13 = vpop.f32.mrf.mxu1  ;;  %v5485_v49 = vpop.f32.mrf.mxu0  ;;  %8713 = vmatprep.mubr.msk.f32.mxu0 %vm1380_vm1, %v5339_v19 }
 0x60d   : > { %v5412_v20 = vpop.f32.mrf.mxu1  ;;  %v8599_v25 = vpop.f32.mrf.mxu0 }
 0x60e   : > { %8714 = vmatmul.mubr.msk.f32.vlgmr.msra.gmra.mxu0 %vm1380_vm1, %v5412_v20  ;;  %v9066_v25 = vld [vmem:[%s9675_s1] sm:$0xff] }
 0x60f   : > { %v8594_v6 = vpop.f32.mrf.mxu1  ;;  %v5631_v59 = vpop.f32.mrf.mxu0  ;;  %8716 = vmatprep.mubr.msk.f32.mxu0 %vm1380_vm1, %v5485_v49 }
 0x611   : > { %v5558_v48 = vpop.f32.mrf.mxu1  ;;  %v8609_v31 = vpop.f32.mrf.mxu0 }
 0x612   : > { %8717 = vmatmul.mubr.msk.f32.gmra.mxu0 %vm1380_vm1, %v5558_v48 }
 0x613   : > { %v8604_v8 = vpop.f32.mrf.mxu1  ;;  %8719 = vmatprep.mubr.msk.f32.mxu0 %vm1380_vm1, %v5631_v59 }
 0x615   : > { %v5704_v4 = vpop.f32.mrf.mxu1 }
 0x616   : > { %8720 = vmatmul.mubr.msk.f32.gmra.mxu0 %vm1380_vm1, %v5704_v4 }
 0x617   : > { %v8614_v0 = vpop.f32.mrf.mxu1 }
 0x619   : > { %v5777_v7 = vpop.f32.mrf.mxu0 }
 0x61a   : > { %v5850_v10 = vpop.f32.mrf.mxu1  ;;  %8722 = vmatprep.mubr.msk.f32.mxu0 %vm1380_vm1, %v5777_v7 }
 0x61b   : > { %v8619_v36 = vpop.f32.mrf.mxu0  ;;  %8723 = vmatmul.mubr.msk.f32.gmra.mxu0 %vm1380_vm1, %v5850_v10 }
 0x61c   : > { %v8624_v15 = vpop.f32.mrf.mxu1  ;;  %7235 = vmatprep.mubr.f32.mxu0 %v11070_v23 }
 0x61d   : > { %v5923_v5 = vpop.f32.mrf.mxu0 }
 0x61e   : > { %v5996_v50 = vpop.f32.mrf.mxu1  ;;  %8733 = vmatprep.mubr.msk.f32.mxu1 %vm1380_vm1, %v5923_v5  ;;  %v9067_v5 = vld [vmem:[%s9675_s1 + $0x10] sm:$0xff] }
 0x61f   : > { %v8629_v53 = vpop.f32.mrf.mxu0  ;;  %8734 = vmatmul.mubr.msk.f32.vlgmr.msra.gmra.mxu1 %vm1380_vm1, %v5996_v50 }
 0x620   : > { %v8634_v33 = vpop.f32.mrf.mxu1  ;;  %v9068_v53 = vld [vmem:[%s9675_s1 + $0x18] sm:$0xff] }
 0x622   : > { %v6069_v46 = vpop.f32.mrf.mxu0 }
 0x623   : > { %8736 = vmatprep.mubr.msk.f32.mxu1 %vm1380_vm1, %v6069_v46 }
 0x624   : > { %v8639_v34 = vpop.f32.mrf.mxu0 }
 0x625   : > { %v6142_v62 = vpop.f32.mrf.mxu1 }
 0x626   : > { %8737 = vmatmul.mubr.msk.f32.gmra.mxu1 %vm1380_vm1, %v6142_v62 }
 0x627   : > { %v8644_v40 = vpop.f32.mrf.mxu1 }
 0x656   : > { %v6215_v22 = vpop.f32.mrf.mxu0 }
 0x657   : > { %8739 = vmatprep.mubr.msk.f32.mxu1 %vm1380_vm1, %v6215_v22 }
 0x658   : > { %v8649_v60 = vpop.f32.mrf.mxu0 }
 0x65a   : > { %v6288_v21 = vpop.f32.mrf.mxu1 }
 0x65b   : > { %v6361_v61 = vpop.f32.mrf.mxu0  ;;  %8740 = vmatmul.mubr.msk.f32.gmra.mxu1 %vm1380_vm1, %v6288_v21 }
 0x65c   : > { %v8654_v43 = vpop.f32.mrf.mxu1  ;;  %8742 = vmatprep.mubr.msk.f32.mxu1 %vm1380_vm1, %v6361_v61 }
 0x65d   : > { %v8659_v38 = vpop.f32.mrf.mxu0 }
 0x65e   : > { %v6434_v2 = vpop.f32.mrf.mxu1 }
 0x65f   : > { %8743 = vmatmul.mubr.msk.f32.gmra.mxu1 %vm1380_vm1, %v6434_v2 }
 0x660   : > { %v8664_v54 = vpop.f32.mrf.mxu1 }
 0x666   : > { %v8695_v14 = vpop.f32.mrf.mxu1 }
 0x668   : > { %v6665_v47 = vpop.f32.mrf.mxu1 }
 0x66a   : > { %v8698_v27 = vpop.f32.mrf.mxu1 }
 0x66c   : > { %v6675_v28 = vpop.f32.mrf.mxu1 }
 0x66e   : > { %v8701_v44 = vpop.f32.mrf.mxu1 }
 0x670   : > { %v6685_v11 = vpop.f32.mrf.mxu1 }
 0x672   : > { %v8704_v57 = vpop.f32.mrf.mxu1 }
 0x674   : > { %v6695_v16 = vpop.f32.mrf.mxu1 }
 0x6a7   : > { %v8675_v42 = vpop.f32.mrf.mxu0 }
 0x6a8   : > { %v6671_v58 = vadd.f32 %v8695_v14, %v8675_v42  ;;  %v9069_v14 = vld [vmem:[%s9675_s1 + $0x28] sm:$0xff] }
 0x6a9   : > { %v6536_v45 = vpop.f32.mrf.mxu0 }
 0x6aa   : > { %v6666_v9 = vadd.f32 %v6665_v47, %v6536_v45 }
 0x6b2   : > { %v8678_v63 = vpop.f32.mrf.mxu0 }
 0x6b3   : > { %v6681_v48 = vadd.f32 %v8698_v27, %v8678_v63 }
 0x6b4   : > { %v6546_v18 = vpop.f32.mrf.mxu0 }
 0x6b5   : > { %v6676_v31 = vadd.f32 %v6675_v28, %v6546_v18  ;;  %v9070_v28 = vld [vmem:[%s9675_s1 + $0x20] sm:$0xff] }
 0x6c2   : > { %v8681_v56 = vpop.f32.mrf.mxu0 }
 0x6c3   : > { %v6691_v29 = vadd.f32 %v8701_v44, %v8681_v56 }
 0x6c4   : > { %v6556_v39 = vpop.f32.mrf.mxu0 }
 0x6c5   : > { %v6686_v52 = vadd.f32 %v6685_v11, %v6556_v39 }
 0x6ca   : > { %v8684_v3 = vpop.f32.mrf.mxu0 }
 0x6cb   : > { %v6701_v35 = vadd.f32 %v8704_v57, %v8684_v3  ;;  %v9072_v57 = vld [vmem:[%s9675_s1 + $0x30] sm:$0xff] }
 0x6cc   : > { %v6566_v51 = vpop.f32.mrf.mxu0 }
 0x6cd   : > { %v6696_v1 = vadd.f32 %v6695_v16, %v6566_v51  ;;  %v7158_v51 = vld [vmem:[#allocation13 + $0xf8] sm:$0xff] }
 0x6ce   : > { %v8715_v41 = vpop.f32.mrf.mxu0  ;;  %7171 = vmatprep.subr.mxu0 %v7158_v51 }
 0x6cf   : > { %v6838_v12 = vadd.f32 %v8715_v41, %v6671_v58  ;;  %v7156_v41 = vld [vmem:[#allocation13 + $0xe8] sm:$0xff]  ;;  %v7155_v58 = vld [vmem:[#allocation13 + $0xe0] sm:$0xff] }
 0x6d0   : > { %v6798_v37 = vpop.f32.mrf.mxu0 }
 0x6d1   : > { %v6837_v26 = vadd.f32 %v6798_v37, %v6666_v9  ;;  %v7154_v37 = vld [vmem:[#allocation13 + $0xd8] sm:$0xff]  ;;  %v7153_v9 = vld [vmem:[#allocation13 + $0xd0] sm:$0xff] }
 0x6d2   : > { %v8718_v32 = vpop.f32.mrf.mxu0 }
 0x6d3   : > { %v6840_v0 = vadd.f32 %v8718_v32, %v6681_v48 }
 0x6d4   : > { %v6808_v20 = vpop.f32.mrf.mxu0 }
 0x6d5   : > { %v6839_v7 = vadd.f32 %v6808_v20, %v6676_v31 }
 0x6d6   : > { %v8721_v62 = vpop.f32.mrf.mxu0 }
 0x6d7   : > { %v6842_v60 = vadd.f32 %v8721_v62, %v6691_v29  ;;  %v9071_v29 = vld [vmem:[%s9675_s1 + $0x38] sm:$0xff]  ;;  %v7143_v62 = vld [vmem:[#allocation13 + $0x80] sm:$0xff]  ;;  %s7589_s1 = scalar_lea.sflag [#allocation4], %s9669_s26 }
 0x6d8   : > { %v6818_v40 = vpop.f32.mrf.mxu0 }
 0x6d9   : > { %v6841_v61 = vadd.f32 %v6818_v40, %v6686_v52  ;;  %v7142_v40 = vld [vmem:[#allocation13 + $0x78] sm:$0xff] }
 0x6db   : > { %v8724_v22 = vpop.f32.mrf.mxu0 }
 0x6dc   : > { %v6844_v54 = vadd.f32 %v8724_v22, %v6701_v35  ;;  %v7141_v22 = vld [vmem:[#allocation13 + $0x70] sm:$0xff] }
 0x6dd   : > { %v6828_v38 = vpop.f32.mrf.mxu0 }
 0x6de   : > { %v6843_v45 = vadd.f32 %v6828_v38, %v6696_v1  ;;  %v7157_v1 = vld [vmem:[#allocation13 + $0xf0] sm:$0xff]  ;;  %v7136_v38 = vld [vmem:[#allocation13 + $0x48] sm:$0xff] }
 0x6df   : > { %v8735_v24 = vpop.f32.mrf.mxu1  ;;  %7172 = vmatpush1.msra.mxu0 %v7157_v1 }
 0x6e0   : > { %v6979_v30 = vadd.f32 %v8735_v24, %v6838_v12  ;;  %7173 = vmatprep.subr.mxu0 %v7156_v41 }
 0x6e1   : > { %v6939_v19 = vpop.f32.mrf.mxu1  ;;  %7174 = vmatpush1.msra.mxu0 %v7155_v58 }
 0x6e2   : > { %v6987_v13 = vadd.f32 %v9065_v55, %v6979_v30  ;;  %v6978_v49 = vadd.f32 %v6939_v19, %v6837_v26  ;;  %7175 = vmatprep.subr.mxu0 %v7154_v37 }
 0x6e3   : > { %7176 = vmatpush1.msra.mxu0 %v7153_v9 }
 0x6e4   : > { %v6986_v6 = vadd.f32 %v9066_v25, %v6978_v49  ;;  %v10704_v59 = vadd.f32 %v7898_v17, %v6987_v13 }
 0x6e6   : > { %v8738_v8 = vpop.f32.mrf.mxu1  ;;  %7011 = vadd.xlane.f32.xlu1 %v10704_v59  ;;  %v10707_v4 = vadd.f32 %v7898_v17, %v6986_v6 }
 0x6e7   : > { %v6981_v36 = vadd.f32 %v8738_v8, %v6840_v0  ;;  %v7152_v0 = vld [vmem:[#allocation13 + $0xc8] sm:$0xff] }
 0x6e8   : > { %v6949_v10 = vpop.f32.mrf.mxu1  ;;  %7009 = vadd.xlane.f32.xlu0 %v10707_v4  ;;  %7177 = vmatprep.subr.mxu0 %v7152_v0 }
 0x6e9   : > { %v6980_v15 = vadd.f32 %v6949_v10, %v6839_v7  ;;  %v6989_v33 = vadd.f32 %v9068_v53, %v6981_v36  ;;  %v7151_v7 = vld [vmem:[#allocation13 + $0xc0] sm:$0xff]  ;;  %v7150_v10 = vld [vmem:[#allocation13 + $0xb8] sm:$0xff]  ;;  %v7149_v36 = vld [vmem:[#allocation13 + $0xb0] sm:$0xff] }
 0x6ea   : > { %7178 = vmatpush1.msra.mxu0 %v7151_v7  ;;  %v7145_v53 = vld [vmem:[#allocation13 + $0x90] sm:$0xff] }
 0x6eb   : > { %v6988_v50 = vadd.f32 %v9067_v5, %v6980_v15  ;;  %v10715_v34 = vadd.f32 %v7898_v17, %v6989_v33  ;;  %7179 = vmatprep.subr.mxu0 %v7150_v10  ;;  %v7148_v15 = vld [vmem:[#allocation13 + $0xa8] sm:$0xff]  ;;  %v7147_v5 = vld [vmem:[#allocation13 + $0xa0] sm:$0xff] }
 0x6ec   : > { %7180 = vmatpush1.msra.mxu0 %v7149_v36  ;;  %v7144_v33 = vld [vmem:[#allocation13 + $0x88] sm:$0xff] }
 0x6ed   : > { %v10712_v46 = vadd.f32 %v7898_v17, %v6988_v50  ;;  %7181 = vmatprep.subr.mxu0 %v7148_v15  ;;  %v7146_v50 = vld [vmem:[#allocation13 + $0x98] sm:$0xff] }
 0x6ee   : > { %7182 = vmatpush1.msra.mxu0 %v7147_v5 }
 0x6ef   : > { %7013 = vadd.xlane.f32.xlu0 %v10712_v46  ;;  %7183 = vmatprep.subr.mxu0 %v7146_v50 }
 0x6f0   : > { %7184 = vmatpush1.msra.mxu0 %v7145_v53  ;;  %v7899_v53 = vld [vmem:[%s11000_s11] ss:$0 sm:$0xff] }
 0x6f1   : > { %7185 = vmatprep.subr.mxu0 %v7144_v33 }
 0x6f2   : > { %7186 = vmatpush1.msra.mxu0 %v7143_v62  ;;  %v7900_v62 = vld [vmem:[%s11001_s12] ss:$0 sm:$0xff] }
 0x6f3   : > { %7015 = vadd.xlane.f32.xlu0 %v10715_v34  ;;  %7187 = vmatprep.subr.mxu0 %v7142_v40 }
 0x6f4   : > { %7188 = vmatpush1.msra.mxu0 %v7141_v22 }
 0x71b   : > { %v8741_v21 = vpop.f32.mrf.mxu1 }
 0x71c   : > { %v6983_v43 = vadd.f32 %v8741_v21, %v6842_v60  ;;  %v7140_v60 = vld [vmem:[#allocation13 + $0x68] sm:$0xff]  ;;  %v7139_v21 = vld [vmem:[#allocation13 + $0x60] sm:$0xff] }
 0x71d   : > { %v6959_v2 = vpop.f32.mrf.mxu1  ;;  %7189 = vmatprep.subr.mxu0 %v7140_v60 }
 0x71e   : > { %v6991_v47 = vadd.f32 %v9069_v14, %v6983_v43  ;;  %v6982_v42 = vadd.f32 %v6959_v2, %v6841_v61  ;;  %7190 = vmatpush1.msra.mxu0 %v7139_v21  ;;  %v7138_v61 = vld [vmem:[#allocation13 + $0x58] sm:$0xff]  ;;  %v7137_v43 = vld [vmem:[#allocation13 + $0x50] sm:$0xff]  ;;  %v7135_v2 = vld [vmem:[#allocation13 + $0x40] sm:$0xff] }
 0x71f   : > { %v8744_v27 = vpop.f32.mrf.mxu1  ;;  %7191 = vmatprep.subr.mxu0 %v7138_v61  ;;  %v7133_v14 = vld [vmem:[#allocation13 + $0x30] sm:$0xff] }
 0x720   : > { %v6990_v63 = vadd.f32 %v9070_v28, %v6982_v42  ;;  %v6985_v44 = vadd.f32 %v8744_v27, %v6844_v54  ;;  %v10720_v18 = vadd.f32 %v7898_v17, %v6991_v47  ;;  %7192 = vmatpush1.msra.mxu0 %v7137_v43  ;;  %v7134_v54 = vld [vmem:[#allocation13 + $0x38] sm:$0xff]  ;;  %v7132_v47 = vld [vmem:[#allocation13 + $0x28] sm:$0xff]  ;;  %v7131_v42 = vld [vmem:[#allocation13 + $0x20] sm:$0xff] }
 0x721   : > { %v6969_v56 = vpop.f32.mrf.mxu1  ;;  %7193 = vmatprep.subr.mxu0 %v7136_v38  ;;  %v7130_v27 = vld [vmem:[#allocation13 + $0x18] sm:$0xff]  ;;  %v7128_v28 = vld [vmem:[#allocation13 + $0x8] sm:$0xff] }
 0x722   : > { %v6993_v11 = vadd.f32 %v9071_v29, %v6985_v44  ;;  %v6984_v39 = vadd.f32 %v6969_v56, %v6843_v45  ;;  %7019 = vadd.xlane.f32.xlu1 %v10720_v18  ;;  %v10724_v52 = vadd.f32 %v7898_v17, %v6990_v63  ;;  %7194 = vmatpush1.msra.mxu0 %v7135_v2  ;;  %v7129_v45 = vld [vmem:[#allocation13 + $0x10] sm:$0xff]  ;;  %v7127_v63 = vld [vmem:[#allocation13] sm:$0xff] }
 0x723   : > { %7195 = vmatprep.subr.mxu0 %v7134_v54 }
 0x724   : > { %v6992_v3 = vadd.f32 %v9072_v57, %v6984_v39  ;;  %7017 = vadd.xlane.f32.xlu0 %v10724_v52  ;;  %v10728_v35 = vadd.f32 %v7898_v17, %v6993_v11  ;;  %7196 = vmatpush1.msra.mxu0 %v7133_v14 }
 0x725   : > { %7197 = vmatprep.subr.mxu0 %v7132_v47 }
 0x726   : > { %7023 = vadd.xlane.f32.xlu1 %v10728_v35  ;;  %v10731_v16 = vadd.f32 %v7898_v17, %v6992_v3  ;;  %7198 = vmatpush1.msra.mxu0 %v7131_v42 }
 0x727   : > { %7199 = vmatprep.subr.mxu0 %v7130_v27 }
 0x728   : > { %7021 = vadd.xlane.f32.xlu0 %v10731_v16  ;;  %7200 = vmatpush1.msra.mxu0 %v7129_v45 }
 0x729   : > { %7201 = vmatprep.subr.mxu0 %v7128_v28 }
 0x72a   : > { %7202 = vmatpush1.msra.mxu0 %v7127_v63 }
 0x76f   : > { %v7012_v12 = vpop.xlane.xlu1 %7011 }
 0x770   : > { %v7026_v24 = vmul.f32 0.0078125, %v7012_v12 }
 0x771   : > { %v7010_v26 = vpop.xlane.xlu0 %7009 }
 0x772   : > { %v10735_v32 = vsub.f32 %v10704_v59, %v7026_v24  ;;  %v7025_v30 = vmul.f32 0.0078125, %v7010_v26 }
 0x774   : > { %v10738_v19 = vsub.f32 %v10707_v4, %v7025_v30  ;;  %v7042_v17 = vmul.f32 %v10735_v32, %v10735_v32 }
 0x776   : > { %7051 = vadd.xlane.f32.xlu1 %v7042_v17  ;;  %v7041_v55 = vmul.f32 %v10738_v19, %v10738_v19 }
 0x778   : > { %v7014_v13 = vpop.xlane.xlu0 %7013  ;;  %7049 = vadd.xlane.f32.xlu0 %v7041_v55 }
 0x779   : > { %v7027_v49 = vmul.f32 0.0078125, %v7014_v13 }
 0x77b   : > { %v10745_v20 = vsub.f32 %v10712_v46, %v7027_v49 }
 0x77c   : > { %v7016_v25 = vpop.xlane.xlu0 %7015 }
 0x77d   : > { %v7028_v6 = vmul.f32 0.0078125, %v7016_v25  ;;  %v7043_v48 = vmul.f32 %v10745_v20, %v10745_v20 }
 0x77f   : > { %v10750_v31 = vsub.f32 %v10715_v34, %v7028_v6  ;;  %7053 = vadd.xlane.f32.xlu0 %v7043_v48 }
 0x781   : > { %v7044_v8 = vmul.f32 %v10750_v31, %v10750_v31 }
 0x783   : > { %7055 = vadd.xlane.f32.xlu1 %v7044_v8 }
 0x7ab   : > { %v7020_v44 = vpop.xlane.xlu1 %7019 }
 0x7ac   : > { %v7030_v56 = vmul.f32 0.0078125, %v7020_v44 }
 0x7ad   : > { %v7018_v29 = vpop.xlane.xlu0 %7017 }
 0x7ae   : > { %v10755_v11 = vsub.f32 %v10720_v18, %v7030_v56  ;;  %v7029_v39 = vmul.f32 0.0078125, %v7018_v29 }
 0x7af   : > { %v7024_v57 = vpop.xlane.xlu1 %7023 }
 0x7b0   : > { %v10758_v3 = vsub.f32 %v10724_v52, %v7029_v39  ;;  %v7032_v51 = vmul.f32 0.0078125, %v7024_v57  ;;  %v7046_v1 = vmul.f32 %v10755_v11, %v10755_v11 }
 0x7b1   : > { %v7022_v41 = vpop.xlane.xlu0 %7021 }
 0x7b2   : > { %v10763_v58 = vsub.f32 %v10728_v35, %v7032_v51  ;;  %v7031_v37 = vmul.f32 0.0078125, %v7022_v41  ;;  %7059 = vadd.xlane.f32.xlu1 %v7046_v1  ;;  %v7045_v9 = vmul.f32 %v10758_v3, %v10758_v3 }
 0x7b4   : > { %v10768_v12 = vsub.f32 %v10731_v16, %v7031_v37  ;;  %7057 = vadd.xlane.f32.xlu0 %v7045_v9  ;;  %v7048_v24 = vmul.f32 %v10763_v58, %v10763_v58 }
 0x7b6   : > { %7063 = vadd.xlane.f32.xlu1 %v7048_v24  ;;  %v7047_v26 = vmul.f32 %v10768_v12, %v10768_v12 }
 0x7b8   : > { %7061 = vadd.xlane.f32.xlu0 %v7047_v26 }
 0x7ff   : > { %v7052_v30 = vpop.xlane.xlu1 %7051 }
 0x800   : > { %v7066_v17 = vmul.f32 0.0078125, %v7052_v30 }
 0x801   : > { %v7050_v55 = vpop.xlane.xlu0 %7049 }
 0x802   : > { %v7074_v13 = vadd.f32 1e-05, %v7066_v17  ;;  %v7065_v49 = vmul.f32 0.0078125, %v7050_v55 }
 0x804   : > { %9017 = vrsqrt.f32 %v7074_v13  ;;  %v7073_v25 = vadd.f32 1e-05, %v7065_v49 }
 0x806   : > { %9019 = vrsqrt.f32 %v7073_v25  ;;  %v7459_v25 = vld [vmem:[#allocation14 + $0xf8] sm:$0xff] }
 0x807   : > { %8157 = vmatprep.subr.mxu1 %v7459_v25 }
 0x808   : > { %v7054_v6 = vpop.xlane.xlu0 %7053 }
 0x809   : > { %v7067_v48 = vmul.f32 0.0078125, %v7054_v6  ;;  %v7458_v6 = vld [vmem:[#allocation14 + $0xf0] sm:$0xff] }
 0x80b   : > { %v7075_v8 = vadd.f32 1e-05, %v7067_v48  ;;  %v7442_v48 = vld [vmem:[#allocation14 + $0x70] sm:$0xff] }
 0x80c   : > { %v7056_v0 = vpop.xlane.xlu1 %7055 }
 0x80d   : > { %9021 = vrsqrt.f32 %v7075_v8  ;;  %v7068_v7 = vmul.f32 0.0078125, %v7056_v0  ;;  %v7457_v8 = vld [vmem:[#allocation14 + $0xe8] sm:$0xff]  ;;  %v7456_v0 = vld [vmem:[#allocation14 + $0xe0] sm:$0xff] }
 0x80f   : > { %v7076_v10 = vadd.f32 1e-05, %v7068_v7  ;;  %v7440_v7 = vld [vmem:[#allocation14 + $0x60] sm:$0xff] }
 0x811   : > { %v9018_v36 = vpop.eup %9017  ;;  %9023 = vrsqrt.f32 %v7076_v10  ;;  %v7455_v10 = vld [vmem:[#allocation14 + $0xd8] sm:$0xff] }
 0x812   : > { %v7090_v50 = vmul.f32 %v9018_v36, %v10735_v32  ;;  %v7454_v36 = vld [vmem:[#allocation14 + $0xd0] sm:$0xff] }
 0x813   : > { %v9020_v15 = vpop.eup %9019 }
 0x814   : > { %v7089_v5 = vmul.f32 %v9020_v15, %v10738_v19  ;;  %v7105_v22 = vmul.f32 %v7899_v53, %v7090_v50  ;;  %v7438_v15 = vld [vmem:[#allocation14 + $0x50] sm:$0xff]  ;;  %v7437_v50 = vld [vmem:[#allocation14 + $0x48] sm:$0xff] }
 0x816   : > { %v7104_v33 = vmul.f32 %v7899_v53, %v7089_v5  ;;  %v7120_v19 = vadd.f32 %v7900_v62, %v7105_v22  ;;  %v7453_v5 = vld [vmem:[#allocation14 + $0xc8] sm:$0xff]  ;;  %v7450_v22 = vld [vmem:[#allocation14 + $0xb0] sm:$0xff] }
 0x818   : > { %v7119_v40 = vadd.f32 %v7900_v62, %v7104_v33  ;;  %v7436_v33 = vld [vmem:[#allocation14 + $0x40] sm:$0xff] }
 0x81a   : > { %v9022_v60 = vpop.eup %9021  ;;  %7236 = vmatmul.mubr.f32.vlgmr.msra.gmra.mxu0 %v7119_v40  ;;  %v7435_v40 = vld [vmem:[#allocation14 + $0x38] sm:$0xff] }
 0x81b   : > { %7241 = vmatprep.mubr.f32.mxu0 %v11070_v23  ;;  %v7091_v21 = vmul.f32 %v9022_v60, %v10745_v20  ;;  %v7434_v60 = vld [vmem:[#allocation14 + $0x30] sm:$0xff] }
 0x81d   : > { %v7106_v61 = vmul.f32 %v7899_v53, %v7091_v21  ;;  %v7449_v21 = vld [vmem:[#allocation14 + $0xa8] sm:$0xff] }
 0x81e   : > { %v9024_v32 = vpop.eup %9023  ;;  %7242 = vmatmul.mubr.f32.gmra.mxu0 %v7120_v19  ;;  %v7433_v19 = vld [vmem:[#allocation14 + $0x28] sm:$0xff] }
 0x81f   : > { %7247 = vmatprep.mubr.f32.mxu0 %v11070_v23  ;;  %v7121_v43 = vadd.f32 %v7900_v62, %v7106_v61  ;;  %v7092_v38 = vmul.f32 %v9024_v32, %v10750_v31  ;;  %v7448_v61 = vld [vmem:[#allocation14 + $0xa0] sm:$0xff] }
 0x820   : > { %v7432_v32 = vld [vmem:[#allocation14 + $0x20] sm:$0xff] }
 0x821   : > { %v7107_v2 = vmul.f32 %v7899_v53, %v7092_v38  ;;  %v7431_v38 = vld [vmem:[#allocation14 + $0x18] sm:$0xff] }
 0x822   : > { %7248 = vmatmul.mubr.f32.gmra.mxu0 %v7121_v43  ;;  %v7447_v43 = vld [vmem:[#allocation14 + $0x98] sm:$0xff] }
 0x823   : > { %7253 = vmatprep.mubr.f32.mxu0 %v11070_v23  ;;  %v7122_v54 = vadd.f32 %v7900_v62, %v7107_v2  ;;  %v7446_v2 = vld [vmem:[#allocation14 + $0x90] sm:$0xff] }
 0x826   : > { %7254 = vmatmul.mubr.f32.gmra.mxu0 %v7122_v54  ;;  %v7430_v54 = vld [vmem:[#allocation14 + $0x10] sm:$0xff] }
 0x827   : > { %7259 = vmatprep.mubr.f32.mxu0 %v11070_v23 }
 0x83b   : > { %v7060_v14 = vpop.xlane.xlu1 %7059 }
 0x83c   : > { %v7070_v47 = vmul.f32 0.0078125, %v7060_v14  ;;  %v7445_v14 = vld [vmem:[#allocation14 + $0x88] sm:$0xff] }
 0x83d   : > { %v7058_v20 = vpop.xlane.xlu0 %7057 }
 0x83e   : > { %v7078_v42 = vadd.f32 1e-05, %v7070_v47  ;;  %v7069_v27 = vmul.f32 0.0078125, %v7058_v20  ;;  %v7429_v47 = vld [vmem:[#allocation14 + $0x8] sm:$0xff]  ;;  %v7444_v20 = vld [vmem:[#allocation14 + $0x80] sm:$0xff] }
 0x83f   : > { %v7064_v45 = vpop.xlane.xlu1 %7063 }
 0x840   : > { %9025 = vrsqrt.f32 %v7078_v42  ;;  %v7077_v28 = vadd.f32 1e-05, %v7069_v27  ;;  %v7072_v63 = vmul.f32 0.0078125, %v7064_v45  ;;  %v7428_v42 = vld [vmem:[#allocation14] sm:$0xff]  ;;  %v7161_v27 = vlaneseq }
 0x841   : > { %v7062_v44 = vpop.xlane.xlu0 %7061 }
 0x842   : > { %9027 = vrsqrt.f32 %v7077_v28  ;;  %v7071_v31 = vmul.f32 0.0078125, %v7062_v44  ;;  %v7080_v56 = vadd.f32 1e-05, %v7072_v63  ;;  %v7162_v45 = vshrl.u32 %v7161_v27, 7  ;;  %v7159_v63 = vld [vmem:[%s11003_s14] sm:$0x3] }
 0x844   : > { %v7079_v29 = vadd.f32 1e-05, %v7071_v31  ;;  %v7163_v28 = vsub.s32 0, %v7162_v45  ;;  %v7167_v44 = vsub.s32 1, %v7162_v45 }
 0x846   : > { %9029 = vrsqrt.f32 %v7079_v29  ;;  %v10798_v31 = vrot.slane %v7159_v63, %v7163_v28 }
 0x847   : > { %9031 = vrsqrt.f32 %v7080_v56  ;;  %v10800_v56 = vrot.slane %v7159_v63, %v7167_v44 }
 0x84d   : > { %v9026_v39 = vpop.eup %9025 }
 0x84e   : > { %v7094_v1 = vmul.f32 %v9026_v39, %v10755_v11 }
 0x84f   : > { %v9028_v57 = vpop.eup %9027 }
 0x850   : > { %v7093_v51 = vmul.f32 %v9028_v57, %v10758_v3  ;;  %v7109_v24 = vmul.f32 %v7899_v53, %v7094_v1 }
 0x852   : > { %v7108_v41 = vmul.f32 %v7899_v53, %v7093_v51  ;;  %v7124_v17 = vadd.f32 %v7900_v62, %v7109_v24 }
 0x853   : > { %v9030_v37 = vpop.eup %9029 }
 0x854   : > { %v7123_v9 = vadd.f32 %v7900_v62, %v7108_v41  ;;  %v7095_v26 = vmul.f32 %v9030_v37, %v10768_v12  ;;  %v9032_v30 = vpop.eup %9031  ;;  %v7443_v12 = vld [vmem:[#allocation14 + $0x78] sm:$0xff] }
 0x855   : > { %v7096_v13 = vmul.f32 %v9032_v30, %v10763_v58  ;;  %8158 = vmatpush3.msra.mxu1 %v7443_v12  ;;  %v7441_v58 = vld [vmem:[#allocation14 + $0x68] sm:$0xff] }
 0x856   : > { %7260 = vmatmul.mubr.f32.gmra.mxu0 %v7123_v9  ;;  %v7110_v55 = vmul.f32 %v7899_v53, %v7095_v26  ;;  %8159 = vmatprep.subr.mxu1 %v7458_v6 }
 0x857   : > { %7265 = vmatprep.mubr.f32.mxu0 %v11070_v23  ;;  %v7111_v49 = vmul.f32 %v7899_v53, %v7096_v13  ;;  %8160 = vmatpush3.msra.mxu1 %v7442_v48  ;;  %v7452_v53 = vld [vmem:[#allocation14 + $0xc0] sm:$0xff] }
 0x858   : > { %v7125_v3 = vadd.f32 %v7900_v62, %v7110_v55  ;;  %8161 = vmatprep.subr.mxu1 %v7457_v8 }
 0x859   : > { %v7126_v11 = vadd.f32 %v7900_v62, %v7111_v49  ;;  %8162 = vmatpush3.msra.mxu1 %v7441_v58  ;;  %v7451_v62 = vld [vmem:[#allocation14 + $0xb8] sm:$0xff] }
 0x85a   : > { %7266 = vmatmul.mubr.f32.gmra.mxu0 %v7124_v17  ;;  %8163 = vmatprep.subr.mxu1 %v7456_v0 }
 0x85b   : > { %7271 = vmatprep.mubr.f32.mxu0 %v11070_v23  ;;  %8164 = vmatpush3.msra.mxu1 %v7440_v7 }
 0x85c   : > { %8165 = vmatprep.subr.mxu1 %v7455_v10 }
 0x85e   : > { %7272 = vmatmul.mubr.f32.gmra.mxu0 %v7125_v3 }
 0x85f   : > { %7277 = vmatprep.mubr.f32.mxu0 %v11070_v23  ;;  %v7439_v23 = vld [vmem:[#allocation14 + $0x58] sm:$0xff] }
 0x860   : > { %8166 = vmatpush3.msra.mxu1 %v7439_v23 }
 0x861   : > { %8167 = vmatprep.subr.mxu1 %v7454_v36 }
 0x862   : > { %7278 = vmatmul.mubr.f32.gmra.mxu0 %v7126_v11  ;;  %8168 = vmatpush3.msra.mxu1 %v7438_v15 }
 0x863   : > { %8169 = vmatprep.subr.mxu1 %v7453_v5 }
 0x864   : > { %8170 = vmatpush3.msra.mxu1 %v7437_v50 }
 0x865   : > { %8171 = vmatprep.subr.mxu1 %v7452_v53 }
 0x866   : > { %8172 = vmatpush3.msra.mxu1 %v7436_v33 }
 0x867   : > { %8173 = vmatprep.subr.mxu1 %v7451_v62 }
 0x868   : > { %8174 = vmatpush3.msra.mxu1 %v7435_v40 }
 0x869   : > { %8175 = vmatprep.subr.mxu1 %v7450_v22 }
 0x86a   : > { %8176 = vmatpush3.msra.mxu1 %v7434_v60 }
 0x86b   : > { %8177 = vmatprep.subr.mxu1 %v7449_v21 }
 0x86c   : > { %8178 = vmatpush3.msra.mxu1 %v7433_v19 }
 0x86d   : > { %8179 = vmatprep.subr.mxu1 %v7448_v61 }
 0x86e   : > { %8180 = vmatpush3.msra.mxu1 %v7432_v32 }
 0x86f   : > { %8181 = vmatprep.subr.mxu1 %v7447_v43 }
 0x870   : > { %8182 = vmatpush3.msra.mxu1 %v7431_v38 }
 0x871   : > { %8183 = vmatprep.subr.mxu1 %v7446_v2 }
 0x872   : > { %8184 = vmatpush3.msra.mxu1 %v7430_v54 }
 0x873   : > { %8185 = vmatprep.subr.mxu1 %v7445_v14 }
 0x874   : > { %8186 = vmatpush3.msra.mxu1 %v7429_v47 }
 0x875   : > { %8187 = vmatprep.subr.mxu1 %v7444_v20 }
 0x876   : > { %8188 = vmatpush3.msra.mxu1 %v7428_v42 }
 0x8da   : > { %v7237_v29 = vpop.f32.mrf.mxu0 }
 0x8db   : > { %v10803_v39 = vadd.f32 %v7237_v29, %v10798_v31 }
 0x8dc   : > { %v7239_v57 = vpop.f32.mrf.mxu0 }
 0x8dd   : > { %v7284_v51 = vmul.f32 %v10803_v39, %v10803_v39  ;;  %v10808_v1 = vadd.f32 %v7239_v57, %v10800_v56 }
 0x8de   : > { %v7243_v41 = vpop.f32.mrf.mxu0 }
 0x8df   : > { %v7300_v37 = vmul.f32 %v7284_v51, %v10803_v39  ;;  %v7285_v9 = vmul.f32 %v10808_v1, %v10808_v1  ;;  %v10814_v24 = vadd.f32 %v7243_v41, %v10798_v31 }
 0x8e0   : > { %v7245_v26 = vpop.f32.mrf.mxu0 }
 0x8e1   : > { %v7316_v30 = vmul.f32 0.044715, %v7300_v37  ;;  %v7301_v17 = vmul.f32 %v7285_v9, %v10808_v1  ;;  %v7286_v55 = vmul.f32 %v10814_v24, %v10814_v24  ;;  %v10820_v13 = vadd.f32 %v7245_v26, %v10800_v56 }
 0x8e2   : > { %v7249_v3 = vpop.f32.mrf.mxu0 }
 0x8e3   : > { %v7332_v49 = vadd.f32 %v7316_v30, %v10803_v39  ;;  %v7317_v11 = vmul.f32 0.044715, %v7301_v17  ;;  %v7302_v25 = vmul.f32 %v7286_v55, %v10814_v24  ;;  %v7287_v12 = vmul.f32 %v10820_v13, %v10820_v13 }
 0x8e4   : > { %v10827_v6 = vadd.f32 %v7249_v3, %v10798_v31  ;;  %v7251_v48 = vpop.f32.mrf.mxu0 }
 0x8e5   : > { %v7348_v8 = vmul.f32 0.7978846, %v7332_v49  ;;  %v7333_v58 = vadd.f32 %v7317_v11, %v10808_v1  ;;  %v7318_v0 = vmul.f32 0.044715, %v7302_v25  ;;  %v7303_v7 = vmul.f32 %v7287_v12, %v10820_v13 }
 0x8e6   : > { %v7288_v10 = vmul.f32 %v10827_v6, %v10827_v6  ;;  %v10834_v23 = vadd.f32 %v7251_v48, %v10800_v56  ;;  %v7255_v36 = vpop.f32.mrf.mxu0 }
 0x8e7   : > { %9033 = vtanh.f32 %v7348_v8  ;;  %v7349_v15 = vmul.f32 0.7978846, %v7333_v58  ;;  %v7334_v5 = vadd.f32 %v7318_v0, %v10814_v24  ;;  %v7319_v50 = vmul.f32 0.044715, %v7303_v7 }
 0x8e8   : > { %v7304_v53 = vmul.f32 %v7288_v10, %v10827_v6  ;;  %v7289_v33 = vmul.f32 %v10834_v23, %v10834_v23  ;;  %v10841_v62 = vadd.f32 %v7255_v36, %v10798_v31  ;;  %v7257_v40 = vpop.f32.mrf.mxu0 }
 0x8e9   : > { %9035 = vtanh.f32 %v7349_v15  ;;  %v7350_v22 = vmul.f32 0.7978846, %v7334_v5  ;;  %v7335_v60 = vadd.f32 %v7319_v50, %v10820_v13  ;;  %v7258_v21 = vadd.f32 %v7257_v40, %v10800_v56 }
 0x8ea   : > { %v7320_v19 = vmul.f32 0.044715, %v7304_v53  ;;  %v7305_v61 = vmul.f32 %v7289_v33, %v10834_v23  ;;  %v7290_v32 = vmul.f32 %v10841_v62, %v10841_v62 }
 0x8eb   : > { %9037 = vtanh.f32 %v7350_v22  ;;  %v7351_v43 = vmul.f32 0.7978846, %v7335_v60  ;;  %v7291_v38 = vmul.f32 %v7258_v21, %v7258_v21 }
 0x8ec   : > { %v7336_v2 = vadd.f32 %v7320_v19, %v10827_v6  ;;  %v7321_v54 = vmul.f32 0.044715, %v7305_v61  ;;  %v7306_v14 = vmul.f32 %v7290_v32, %v10841_v62 }
 0x8ed   : > { %9039 = vtanh.f32 %v7351_v43  ;;  %v7307_v47 = vmul.f32 %v7291_v38, %v7258_v21 }
 0x8ee   : > { %v7352_v20 = vmul.f32 0.7978846, %v7336_v2  ;;  %v7337_v42 = vadd.f32 %v7321_v54, %v10834_v23  ;;  %v7322_v27 = vmul.f32 0.044715, %v7306_v14 }
 0x8ef   : > { %v7323_v45 = vmul.f32 0.044715, %v7307_v47 }
 0x8f0   : > { %9041 = vtanh.f32 %v7352_v20  ;;  %v7353_v28 = vmul.f32 0.7978846, %v7337_v42  ;;  %v7338_v63 = vadd.f32 %v7322_v27, %v10841_v62 }
 0x8f1   : > { %v7339_v44 = vadd.f32 %v7323_v45, %v7258_v21 }
 0x8f2   : > { %9043 = vtanh.f32 %v7353_v28  ;;  %v7354_v29 = vmul.f32 0.7978846, %v7338_v63 }
 0x8f3   : > { %v7355_v57 = vmul.f32 0.7978846, %v7339_v44 }
 0x8f4   : > { %v9034_v51 = vpop.eup %9033  ;;  %9045 = vtanh.f32 %v7354_v29 }
 0x8f5   : > { %v7380_v41 = vadd.f32 1.0, %v9034_v51  ;;  %9047 = vtanh.f32 %v7355_v57 }
 0x8f6   : > { %v9036_v37 = vpop.eup %9035 }
 0x8f7   : > { %v7381_v9 = vadd.f32 1.0, %v9036_v37  ;;  %v7396_v30 = vmul.f32 0.5, %v7380_v41 }
 0x8f8   : > { %v9038_v26 = vpop.eup %9037 }
 0x8f9   : > { %v7397_v17 = vmul.f32 0.5, %v7381_v9  ;;  %v7382_v55 = vadd.f32 1.0, %v9038_v26  ;;  %v7412_v25 = vmul.f32 %v7396_v30, %v10803_v39 }
 0x8fa   : > { %v9040_v3 = vpop.eup %9039 }
 0x8fb   : > { %v7413_v49 = vmul.f32 %v7397_v17, %v10808_v1  ;;  %v7383_v11 = vadd.f32 1.0, %v9040_v3  ;;  %v7398_v12 = vmul.f32 0.5, %v7382_v55 }
 0x8fd   : > { %v9042_v48 = vpop.eup %9041  ;;  %7531 = vmatprep.mubr.f32.mxu1 %v7413_v49  ;;  %v7399_v8 = vmul.f32 0.5, %v7383_v11  ;;  %v7414_v10 = vmul.f32 %v7398_v12, %v10814_v24 }
 0x8fe   : > { %7532 = vmatmul.mubr.f32.vlgmr.msra.gmra.mxu1 %v7412_v25  ;;  %v7384_v58 = vadd.f32 1.0, %v9042_v48 }
 0x8ff   : > { %v9044_v0 = vpop.eup %9043  ;;  %v7415_v7 = vmul.f32 %v7399_v8, %v10820_v13 }
 0x900   : > { %v7385_v36 = vadd.f32 1.0, %v9044_v0  ;;  %v7400_v5 = vmul.f32 0.5, %v7384_v58 }
 0x901   : > { %v9046_v15 = vpop.eup %9045  ;;  %7536 = vmatprep.mubr.f32.mxu1 %v7415_v7 }
 0x902   : > { %v9048_v50 = vpop.eup %9047  ;;  %7537 = vmatmul.mubr.f32.gmra.mxu1 %v7414_v10  ;;  %v7401_v1 = vmul.f32 0.5, %v7385_v36  ;;  %v7386_v53 = vadd.f32 1.0, %v9046_v15  ;;  %v7416_v40 = vmul.f32 %v7400_v5, %v10827_v6 }
 0x903   : > { %v7387_v39 = vadd.f32 1.0, %v9048_v50 }
 0x904   : > { %v7417_v33 = vmul.f32 %v7401_v1, %v10834_v23  ;;  %v7402_v60 = vmul.f32 0.5, %v7386_v53 }
 0x905   : > { %v7403_v22 = vmul.f32 0.5, %v7387_v39 }
 0x906   : > { %7541 = vmatprep.mubr.f32.mxu1 %v7417_v33  ;;  %v7418_v24 = vmul.f32 %v7402_v60, %v10841_v62 }
 0x907   : > { %7542 = vmatmul.mubr.f32.gmra.mxu1 %v7416_v40  ;;  %v7419_v13 = vmul.f32 %v7403_v22, %v7258_v21 }
 0x909   : > { %7546 = vmatprep.mubr.f32.mxu1 %v7419_v13 }
 0x90b   : > { %7547 = vmatmul.mubr.f32.gmra.mxu1 %v7418_v24 }
 0x916   : > { %v7261_v19 = vpop.f32.mrf.mxu0 }
 0x917   : > { %v10860_v61 = vadd.f32 %v7261_v19, %v10798_v31 }
 0x918   : > { %v7263_v32 = vpop.f32.mrf.mxu0 }
 0x919   : > { %v7292_v43 = vmul.f32 %v10860_v61, %v10860_v61  ;;  %v10865_v23 = vadd.f32 %v7263_v32, %v10800_v56 }
 0x91a   : > { %v7267_v6 = vpop.f32.mrf.mxu0 }
 0x91b   : > { %v7308_v38 = vmul.f32 %v7292_v43, %v10860_v61  ;;  %v7293_v21 = vmul.f32 %v10865_v23, %v10865_v23  ;;  %v10871_v62 = vadd.f32 %v7267_v6, %v10798_v31 }
 0x91c   : > { %v7269_v2 = vpop.f32.mrf.mxu0 }
 0x91d   : > { %v7324_v54 = vmul.f32 0.044715, %v7308_v38  ;;  %v7309_v14 = vmul.f32 %v7293_v21, %v10865_v23  ;;  %v7294_v47 = vmul.f32 %v10871_v62, %v10871_v62  ;;  %v10877_v20 = vadd.f32 %v7269_v2, %v10800_v56 }
 0x91e   : > { %v7273_v42 = vpop.f32.mrf.mxu0 }
 0x91f   : > { %v7340_v27 = vadd.f32 %v7324_v54, %v10860_v61  ;;  %v7325_v45 = vmul.f32 0.044715, %v7309_v14  ;;  %v7310_v28 = vmul.f32 %v7294_v47, %v10871_v62  ;;  %v7295_v63 = vmul.f32 %v10877_v20, %v10877_v20 }
 0x920   : > { %v10884_v44 = vadd.f32 %v7273_v42, %v10798_v31  ;;  %v7275_v29 = vpop.f32.mrf.mxu0 }
 0x921   : > { %v7356_v57 = vmul.f32 0.7978846, %v7340_v27  ;;  %v7341_v51 = vadd.f32 %v7325_v45, %v10865_v23  ;;  %v7326_v41 = vmul.f32 0.044715, %v7310_v28  ;;  %v7311_v37 = vmul.f32 %v7295_v63, %v10877_v20 }
 0x922   : > { %v7296_v9 = vmul.f32 %v10884_v44, %v10884_v44  ;;  %v10891_v26 = vadd.f32 %v7275_v29, %v10800_v56  ;;  %v7279_v30 = vpop.f32.mrf.mxu0 }
 0x923   : > { %9049 = vtanh.f32 %v7356_v57  ;;  %v7357_v17 = vmul.f32 0.7978846, %v7341_v51  ;;  %v7342_v55 = vadd.f32 %v7326_v41, %v10871_v62  ;;  %v7327_v3 = vmul.f32 0.044715, %v7311_v37 }
 0x924   : > { %v7312_v49 = vmul.f32 %v7296_v9, %v10884_v44  ;;  %v7297_v11 = vmul.f32 %v10891_v26, %v10891_v26  ;;  %v10898_v25 = vadd.f32 %v7279_v30, %v10798_v31  ;;  %v7281_v12 = vpop.f32.mrf.mxu0 }
 0x925   : > { %9051 = vtanh.f32 %v7357_v17  ;;  %v7358_v48 = vmul.f32 0.7978846, %v7342_v55  ;;  %v7343_v8 = vadd.f32 %v7327_v3, %v10877_v20  ;;  %v7282_v58 = vadd.f32 %v7281_v12, %v10800_v56 }
 0x926   : > { %v7328_v0 = vmul.f32 0.044715, %v7312_v49  ;;  %v7313_v7 = vmul.f32 %v7297_v11, %v10891_v26  ;;  %v7298_v10 = vmul.f32 %v10898_v25, %v10898_v25 }
 0x927   : > { %9053 = vtanh.f32 %v7358_v48  ;;  %v7359_v36 = vmul.f32 0.7978846, %v7343_v8  ;;  %v7299_v15 = vmul.f32 %v7282_v58, %v7282_v58  ;;  %v7901_v8 = vld [vmem:[%s11005_s16] ss:$0 sm:$0xff] }
 0x928   : > { %v7344_v5 = vadd.f32 %v7328_v0, %v10884_v44  ;;  %v7329_v31 = vmul.f32 0.044715, %v7313_v7  ;;  %v7314_v50 = vmul.f32 %v7298_v10, %v10898_v25 }
 0x929   : > { %9055 = vtanh.f32 %v7359_v36  ;;  %v7315_v1 = vmul.f32 %v7299_v15, %v7282_v58 }
 0x92a   : > { %v7360_v53 = vmul.f32 0.7978846, %v7344_v5  ;;  %v7345_v39 = vadd.f32 %v7329_v31, %v10891_v26  ;;  %v7330_v56 = vmul.f32 0.044715, %v7314_v50 }
 0x92b   : > { %v7331_v33 = vmul.f32 0.044715, %v7315_v1 }
 0x92c   : > { %9057 = vtanh.f32 %v7360_v53  ;;  %v7361_v40 = vmul.f32 0.7978846, %v7345_v39  ;;  %v7346_v22 = vadd.f32 %v7330_v56, %v10898_v25 }
 0x92d   : > { %v7347_v60 = vadd.f32 %v7331_v33, %v7282_v58 }
 0x92e   : > { %9059 = vtanh.f32 %v7361_v40  ;;  %v7362_v13 = vmul.f32 0.7978846, %v7346_v22 }
 0x92f   : > { %v7363_v24 = vmul.f32 0.7978846, %v7347_v60 }
 0x930   : > { %v9050_v19 = vpop.eup %9049  ;;  %9061 = vtanh.f32 %v7362_v13 }
 0x931   : > { %9063 = vtanh.f32 %v7363_v24  ;;  %v7388_v32 = vadd.f32 1.0, %v9050_v19 }
 0x932   : > { %v9052_v43 = vpop.eup %9051 }
 0x933   : > { %v7389_v6 = vadd.f32 1.0, %v9052_v43  ;;  %v7404_v21 = vmul.f32 0.5, %v7388_v32 }
 0x934   : > { %v9054_v38 = vpop.eup %9053 }
 0x935   : > { %v7405_v2 = vmul.f32 0.5, %v7389_v6  ;;  %v7390_v54 = vadd.f32 1.0, %v9054_v38  ;;  %v7420_v27 = vmul.f32 %v7404_v21, %v10860_v61 }
 0x936   : > { %v9056_v14 = vpop.eup %9055 }
 0x937   : > { %v7421_v47 = vmul.f32 %v7405_v2, %v10865_v23  ;;  %v7391_v42 = vadd.f32 1.0, %v9056_v14  ;;  %v7406_v45 = vmul.f32 0.5, %v7390_v54 }
 0x939   : > { %v9058_v28 = vpop.eup %9057  ;;  %7551 = vmatprep.mubr.f32.mxu1 %v7421_v47  ;;  %v7407_v63 = vmul.f32 0.5, %v7391_v42  ;;  %v7422_v41 = vmul.f32 %v7406_v45, %v10871_v62 }
 0x93a   : > { %7552 = vmatmul.mubr.f32.gmra.mxu1 %v7420_v27  ;;  %v7392_v29 = vadd.f32 1.0, %v9058_v28 }
 0x93b   : > { %v9060_v57 = vpop.eup %9059  ;;  %v7423_v51 = vmul.f32 %v7407_v63, %v10877_v20 }
 0x93c   : > { %v7393_v37 = vadd.f32 1.0, %v9060_v57  ;;  %v7408_v30 = vmul.f32 0.5, %v7392_v29 }
 0x93d   : > { %v9062_v9 = vpop.eup %9061  ;;  %7556 = vmatprep.mubr.f32.mxu1 %v7423_v51 }
 0x93e   : > { %v9064_v17 = vpop.eup %9063  ;;  %7557 = vmatmul.mubr.f32.gmra.mxu1 %v7422_v41  ;;  %v7409_v23 = vmul.f32 0.5, %v7393_v37  ;;  %v7394_v55 = vadd.f32 1.0, %v9062_v9  ;;  %v7424_v49 = vmul.f32 %v7408_v30, %v10884_v44 }
 0x93f   : > { %v7395_v61 = vadd.f32 1.0, %v9064_v17 }
 0x940   : > { %v7425_v3 = vmul.f32 %v7409_v23, %v10891_v26  ;;  %v7410_v12 = vmul.f32 0.5, %v7394_v55 }
 0x941   : > { %v7411_v11 = vmul.f32 0.5, %v7395_v61 }
 0x942   : > { %7561 = vmatprep.mubr.f32.mxu1 %v7425_v3  ;;  %v7426_v62 = vmul.f32 %v7410_v12, %v10898_v25 }
 0x943   : > { %7562 = vmatmul.mubr.f32.gmra.mxu1 %v7424_v49  ;;  %v7427_v20 = vmul.f32 %v7411_v11, %v7282_v58 }
 0x945   : > { %7566 = vmatprep.mubr.f32.mxu1 %v7427_v20 }
 0x947   : > { %7567 = vmatmul.mubr.f32.gmra.mxu1 %v7426_v62 }
 0x9be   : > { %v8189_v48 = vpop.f32.mrf.mxu1 }
 0x9c0   : > { %v8190_v0 = vpop.f32.mrf.mxu1 }
 0x9c1   : > { %v8191_v7 = vadd.f32 %v8190_v0, %v8189_v48 }
 0x9c2   : > { %v8192_v26 = vpop.f32.mrf.mxu1 }
 0x9c3   : > { %v7534_v10 = vadd.f32 %v8191_v7, %v7901_v8 }
 0x9c4   : > { %v8193_v44 = vpop.f32.mrf.mxu1 }
 0x9c5   : > { %v7572_v36 = vadd.f32 %v7534_v10, %v10707_v4  ;;  %v8194_v15 = vadd.f32 %v8193_v44, %v8192_v26 }
 0x9c7   : > { %7580 = vst [vmem:[%s10922_s20] sm:$0xff] %v7572_v36  ;;  %v7539_v25 = vadd.f32 %v8194_v15, %v7901_v8  ;;  %v8195_v58 = vpop.f32.mrf.mxu1 }
 0x9c9   : > { %v7573_v5 = vadd.f32 %v7539_v25, %v10704_v59  ;;  %v8196_v31 = vpop.f32.mrf.mxu1 }
 0x9ca   : > { %v8197_v50 = vadd.f32 %v8196_v31, %v8195_v58 }
 0x9cb   : > { %7581 = vst [vmem:[%s10922_s20 + $0x8] sm:$0xff] %v7573_v5  ;;  %v8198_v1 = vpop.f32.mrf.mxu1 }
 0x9cc   : > { %v7544_v53 = vadd.f32 %v8197_v50, %v7901_v8 }
 0x9cd   : > { %v8199_v4 = vpop.f32.mrf.mxu1 }
 0x9ce   : > { %v7574_v39 = vadd.f32 %v7544_v53, %v10712_v46  ;;  %v8200_v56 = vadd.f32 %v8199_v4, %v8198_v1 }
 0x9d0   : > { %7582 = vst [vmem:[%s10922_s20 + $0x10] sm:$0xff] %v7574_v39  ;;  %v7549_v33 = vadd.f32 %v8200_v56, %v7901_v8 }
 0x9d2   : > { %v7575_v40 = vadd.f32 %v7549_v33, %v10715_v34 }
 0x9d4   : > { %7583 = vst [vmem:[%s10922_s20 + $0x18] sm:$0xff] %v7575_v40 }
 0x9fa   : > { %v8201_v22 = vpop.f32.mrf.mxu1 }
 0x9fc   : > { %v8202_v60 = vpop.f32.mrf.mxu1 }
 0x9fd   : > { %v8203_v13 = vadd.f32 %v8202_v60, %v8201_v22 }
 0x9fe   : > { %v8204_v59 = vpop.f32.mrf.mxu1 }
 0x9ff   : > { %v7554_v24 = vadd.f32 %v8203_v13, %v7901_v8 }
 0xa00   : > { %v8205_v19 = vpop.f32.mrf.mxu1 }
 0xa01   : > { %v7576_v32 = vadd.f32 %v7554_v24, %v10724_v52  ;;  %v8206_v43 = vadd.f32 %v8205_v19, %v8204_v59 }
 0xa03   : > { %7584 = vst [vmem:[%s10922_s20 + $0x20] sm:$0xff] %v7576_v32  ;;  %v7559_v46 = vadd.f32 %v8206_v43, %v7901_v8  ;;  %v8207_v6 = vpop.f32.mrf.mxu1 }
 0xa05   : > { %v7577_v38 = vadd.f32 %v7559_v46, %v10720_v18  ;;  %v8208_v34 = vpop.f32.mrf.mxu1 }
 0xa06   : > { %v8209_v21 = vadd.f32 %v8208_v34, %v8207_v6 }
 0xa07   : > { %7585 = vst [vmem:[%s10922_s20 + $0x28] sm:$0xff] %v7577_v38  ;;  %v8210_v2 = vpop.f32.mrf.mxu1 }
 0xa08   : > { %v7564_v54 = vadd.f32 %v8209_v21, %v7901_v8 }
 0xa09   : > { %v8211_v14 = vpop.f32.mrf.mxu1 }
 0xa0a   : > { %v7578_v47 = vadd.f32 %v7564_v54, %v10731_v16  ;;  %v8212_v42 = vadd.f32 %v8211_v14, %v8210_v2 }
 0xa0c   : > { %7586 = vst [vmem:[%s10922_s20 + $0x30] sm:$0xff] %v7578_v47  ;;  %v7569_v52 = vadd.f32 %v8212_v42, %v7901_v8 }
 0xa0e   : > { %v7579_v18 = vadd.f32 %v7569_v52, %v10728_v35 }
 0xa10   : > { %7587 = vst [vmem:[%s10922_s20 + $0x38] sm:$0xff] %v7579_v18 }
 0xa11   : > { %9296 = shalt.err (!%p9293_p8)
}
 0xa12   : > { %s9297_s21 = scalar_lea.hbm %s10942_s5, 1024  ;;  %s9301_s9 = scalar_lea.hbm %s11078_s23, 2048 }
 0xa13   : > { %p9298_p6 = scmp.ne.s32.totalorder %s10942_s5, %s9297_s21  ;;  %p9302_p0 = scmp.lt.s32.totalorder %s10942_s5, %s11078_s23 }
 0xa14   : > { %p9303_p2 = scmp.lt.s32.totalorder %s9301_s9, %s9297_s21 }
 0xa15   : > { %p9299_p10 = pnand %p9298_p6, %p11079_p11 }
 0xa16   : > { %p9304_p5 = por %p9303_p2, %p9302_p0 }
 0xa17   : > { %p9300_p7 = pneg %p9299_p10 }
 0xa19   : > { %p9305_p9 = pnand %p9304_p5, %p9300_p7 }
 0xa1b   : > { %9308 = shalt.err (!%p9305_p9)
}
 0xa1c   : > { %s9383_s28 = smov 128   ;;  %s9384_s2 = smov 8  }
 0xa1d   : > { %8775 = dma.vmem_to_hbm [thread:$0]  (%p11079_p11), %s10944_s18, 1024, %s10942_s5, %s7589_s1, %s9383_s28, %s9383_s28, %s9384_s2  }
 0xa1e PF: > { %s7617_s13 = sand.u32 1, %s9351_s24   ;;  %p11080_p12 = scmp.ne.s32.totalorder %s11048_s29, 0 }
 0xa1f   : > { %p11081_p13 = scmp.ge.s32.totalorder %s9363_s27, 2  ;;  %s7618_s0 = scalar_lea.sflag [#allocation4], %s7617_s13 }
 0xa21   : > { %p8804_p1 = pnand %p11081_p13, %p11080_p12 }
 0xa23   : > { %p8805_p3 = pneg %p8804_p1 }
 0xa25   : > { %9346 = dma.done.wait (%p8805_p3), %s7618_s0, 1024  }
 0xa26   : > { %9348 = vsyncadd (%p8805_p3), %s7618_s0, 4294966272  ;;  %s11082_s27 = sld [smem:[#allocation24_spill]]  ;;  %s11085_s24 = smov %s9355_s25 }
 0xa27   : > { %s11083_s15 = sld [smem:[#allocation23_spill]] }
 0xa28   : > { %s11084_s26 = sld [smem:[#allocation25_spill]] }
 0xa2c   : > { %p34_p4 = scmp.ge.s32.totalorder %s11082_s27, 4  }
 0xa2d   : > { %s11086_s25 = smov %s11083_s15 }
 0xa2e   :  { %36 = sbr.rel (!%p34_p4) target bundleno = 20 (0x14), region = 161 }
 0xa33   :  { %7623 = vsyncpa [#allocation3], 1 }
 0xa34   :  { %7625 = vsyncpa [#allocation3 + $0x1], 1 }
 0xa35   :  { %7626 = vsyncpa [#allocation6], 1 }
 0xa36   :  { %7627 = vsyncpa [#allocation9], 1 }
 0xa37   :  { %7628 = vsyncpa [#allocation12], 1 }
 0xa38   :  { %7629 = vsyncpa [#allocation15], 1 }
 0xa39   :  { %7630 = vsyncpa [#allocation4], 1 }
 0xa3a   :  { %7632 = vsyncpa [#allocation4 + $0x1], 1 }

</bundles_post_ra>
